<compile_context>
chip_gen: v5e
topology: v5e:2x2
jax: 0.10.0
libtpu: 0.0.40
codegen_flags: <defaults>
</compile_context>

<pallas_src>
import functools
import math

import jax
import jax.numpy as jnp
from jax import lax
from jax.experimental import pallas as pl
from jax.experimental.pallas import tpu as pltpu


def _round_up(a, m):
    return (a + m - 1) // m * m


def _vmem_capacity_bytes():
    """Physical VMEM per TensorCore, or None if it cannot be queried."""
    try:
        return int(pltpu.get_tpu_info().vmem_capacity_bytes)
    except Exception:
        return None


def _dnl_kernel(x_ref, wq_ref, wk_ref, wv_ref, b_ref, o_ref,
                q_scr, k_scr, v_scr, u_scr, mask_scr,
                *, n_real, n_pad, tq, inv_scale):
    # x_ref:   (1, Np, C) f32  -- resident for the whole batch element
    # w*_ref:  (C, C)    f32   -- pre-transposed for the (N, C) layout
    # b_ref:   (3, C)    f32   -- rows = [bq, bk, bv]
    # o_ref:   (1, tq, C) f32  -- output tile
    # scratch: q_scr (Np, C)   whitened Q, pre-scaled by 1/(scale*temp)
    #          k_scr (C, Np)   whitened K, transposed once per batch
    #          v_scr (Np, C)   V
    #          u_scr (1, C)    unary branch output
    #          mask_scr (1, Np) additive padding mask (0 / -1e30)
    qi = pl.program_id(1)
    n_fake = n_pad - n_real
    inv_n = 1.0 / n_real

    # ---- per-batch setup: projections, whitening, unary branch -------------
    @pl.when(qi == 0)
    def _setup():
        x = x_ref[0]                                               # (Np, C)

        # Q projection -> whiten -> fold 1/(scale*temp) -> scratch.
        bq = b_ref[0:1, :]
        q = jnp.dot(x, wq_ref[...], preferred_element_type=jnp.float32) + bq
        q_sum = jnp.sum(q, axis=0, keepdims=True)
        if n_fake:
            q_sum = q_sum - float(n_fake) * bq   # padded rows are exactly bq
        q_mean = q_sum * inv_n                                     # (1, C)
        q_scr[...] = ((q - q_mean) * inv_scale).astype(q_scr.dtype)

        # K projection -> whiten -> transpose ONCE -> (C, Np) scratch.
        bk = b_ref[1:2, :]
        k = jnp.dot(x, wk_ref[...], preferred_element_type=jnp.float32) + bk
        k_sum = jnp.sum(k, axis=0, keepdims=True)
        if n_fake:
            k_sum = k_sum - float(n_fake) * bk
        k_mean = k_sum * inv_n                                     # (1, C)
        k_scr[...] = jnp.transpose(k - k_mean).astype(k_scr.dtype)

        # V projection -> scratch.
        bv = b_ref[2:3, :]
        v = jnp.dot(x, wv_ref[...], preferred_element_type=jnp.float32) + bv
        v_scr[...] = v.astype(v_scr.dtype)

        # Additive padding mask, built once per batch (reused every q tile).
        if n_fake:
            col = lax.broadcasted_iota(jnp.int32, (1, n_pad), 1)
            mask_scr[...] = jnp.where(col < n_real, 0.0, -1e30)

        # Unary branch: softmax(q_mean . K_whitened) weighted sum of V.
        # Logits are (1, Np) -> lane-oriented softmax.  (Not scaled, as in
        # the PyTorch reference.)
        u = jnp.dot(q_mean.astype(k_scr.dtype), k_scr[...],
                    preferred_element_type=jnp.float32)            # (1, Np)
        if n_fake:
            u = u + mask_scr[...]
        u = jnp.exp(u - jnp.max(u, axis=-1, keepdims=True))
        u_out = jnp.dot(u.astype(v_scr.dtype), v_scr[...],
                        preferred_element_type=jnp.float32)        # (1, C)
        u_scr[...] = u_out / jnp.sum(u, axis=-1, keepdims=True)

    # ---- pairwise attention for this query tile -----------------------------
    q0 = pl.multiple_of(qi * tq, 8)
    q_tile = q_scr[pl.ds(q0, tq), :]                               # (tq, C)
    sim = jnp.dot(q_tile, k_scr[...],
                  preferred_element_type=jnp.float32)              # (tq, Np)
    if n_fake:
        sim = sim + mask_scr[...]
    p = jnp.exp(sim - jnp.max(sim, axis=-1, keepdims=True))
    denom = jnp.sum(p, axis=-1, keepdims=True)                     # (tq, 1)
    out = jnp.dot(p.astype(v_scr.dtype), v_scr[...],
                  preferred_element_type=jnp.float32)              # (tq, C)
    out = out / denom                       # deferred, exact normalization

    x_tile = x_ref[0, pl.ds(q0, tq), :]                            # residual
    o_ref[0] = x_tile + out + u_scr[...]


def dnl_forward(x, wq, bq, wk, bk, wv, bv, *, scale, temperature=1.0,
                block_q=256, matmul_dtype=jnp.bfloat16):
    """DNL forward.  x: (B, C, H, W) float32 -> (B, C, H, W) float32."""
    B, C, H, W = x.shape
    N = H * W

    tq = min(block_q, _round_up(N, 8))
    n_pad = _round_up(N, tq)
    nq = n_pad // tq

    # (B, N, C) layout, zero-padded on the spatial axis.
    x_nc = jnp.transpose(x.reshape(B, C, N), (0, 2, 1))            # (B, N, C)
    if n_pad != N:
        x_nc = jnp.pad(x_nc, ((0, 0), (0, n_pad - N), (0, 0)))
    # TODO(synk): when C % 128 != 0 (or to drop the two wrapper transposes),
    # emit a lane-dense (C, tq) output tile directly from the kernel.

    wq_t, wk_t, wv_t = wq.T, wk.T, wv.T                            # (C, C)
    b_qkv = jnp.stack([bq, bk, bv], axis=0)                        # (3, C)

    kernel = functools.partial(
        _dnl_kernel, n_real=N, n_pad=n_pad, tq=tq,
        inv_scale=float(1.0 / (scale * temperature)))

    cap = _vmem_capacity_bytes()             # per-core VMEM (None if unknown)
    mm_bytes = jnp.dtype(matmul_dtype).itemsize

    # x stays double-buffered (overlap the next batch's DMA) except on
    # small-VMEM parts (v7x: 64 MiB/TC) with a large resident block.
    x_block_bytes = n_pad * C * 4
    x_buffers = None
    if cap is not None and cap <= 64 * 1024 * 1024 and x_block_bytes > 8 * 1024 * 1024:
        x_buffers = 1

    # Honest VMEM estimate: pipeline buffers + scratch + largest live
    # temporaries (one (Np,C) f32 projection + whitened copy at setup,
    # ~3 copies of the (tq,Np) f32 sim/p in steady state).
    est_bytes = (
        (1 if x_buffers == 1 else 2) * x_block_bytes               # x block
        + 3 * C * C * 4 + 3 * C * 4                                # W + bias
        + 2 * tq * C * 4                                           # out tile
        + 3 * n_pad * C * mm_bytes + C * 4 + n_pad * 4             # scratch
        + 2 * n_pad * C * 4                                        # setup temps
        + 3 * tq * n_pad * 4)                                      # sim/p temps
    vmem_limit = None
    if est_bytes > 16 * 1024 * 1024:
        hard_cap = int(0.85 * (cap if cap is not None else 64 * 1024 * 1024))
        vmem_limit = min(int(est_bytes * 1.25) + (4 << 20), hard_cap)

    # TODO(synk): on v7x (2 TCs) with B == 1, split the query-tile axis across
    # cores (each redoing the cheap setup) so the second core is not idle.
    # TODO(synk): for very large N on v7x, add a KV-tile grid axis with online
    # softmax so scratch scales as O(tq*tkv + tkv*C) instead of O(3*Np*C).

    def _build_and_run(min_buffers):
        def spec(shape, index_map, buffers=None):
            if buffers is None or not min_buffers:
                return pl.BlockSpec(shape, index_map)
            try:
                return pl.BlockSpec(shape, index_map,
                                    pipeline_mode=pl.Buffered(buffers))
            except Exception:      # older jax without pipeline_mode/Buffered
                return pl.BlockSpec(shape, index_map)

        return pl.pallas_call(
            kernel,
            out_shape=jax.ShapeDtypeStruct((B, n_pad, C), jnp.float32),
            grid_spec=pltpu.PrefetchScalarGridSpec(
                num_scalar_prefetch=0,
                grid=(B, nq),
                in_specs=[
                    spec((1, n_pad, C), lambda b, q: (b, 0, 0), x_buffers),
                    spec((C, C), lambda b, q: (0, 0), 1),    # Wq^T
                    spec((C, C), lambda b, q: (0, 0), 1),    # Wk^T
                    spec((C, C), lambda b, q: (0, 0), 1),    # Wv^T
                    spec((3, C), lambda b, q: (0, 0), 1),    # [bq; bk; bv]
                ],
                out_specs=pl.BlockSpec((1, tq, C), lambda b, q: (b, q, 0)),
                scratch_shapes=[
                    pltpu.VMEM((n_pad, C), matmul_dtype),    # whitened+scaled Q
                    pltpu.VMEM((C, n_pad), matmul_dtype),    # whitened K^T
                    pltpu.VMEM((n_pad, C), matmul_dtype),    # V
                    pltpu.VMEM((1, C), jnp.float32),         # unary output
                    pltpu.VMEM((1, n_pad), jnp.float32),     # padding mask
                ]),
            compiler_params=pltpu.CompilerParams(
                dimension_semantics=("parallel", "arbitrary"),
                vmem_limit_bytes=vmem_limit),
        )(x_nc, wq_t, wk_t, wv_t, b_qkv)

    try:
        out_flat = _build_and_run(True)
    except Exception:
        # pl.Buffered(1) not supported by this jax/Mosaic version; retry with
        # default double-buffering.
        out_flat = _build_and_run(False)

    out = out_flat[:, :N, :]                            # drop spatial padding
    return jnp.transpose(out, (0, 2, 1)).reshape(B, C, H, W)


def dnl_reference(x, wq, bq, wk, bk, wv, bv, *, scale, temperature=1.0):
    """Plain-JAX f32 reference mirroring the PyTorch forward."""
    B, C, H, W = x.shape
    N = H * W
    hp = lax.Precision.HIGHEST
    xf = x.reshape(B, C, N)
    q = jnp.einsum("oc,bcn->bon", wq, xf, precision=hp) + bq[None, :, None]
    k = jnp.einsum("oc,bcn->bon", wk, xf, precision=hp) + bk[None, :, None]
    v = jnp.einsum("oc,bcn->bon", wv, xf, precision=hp) + bv[None, :, None]
    q_mean = q.mean(axis=2, keepdims=True)
    k_mean = k.mean(axis=2, keepdims=True)
    q = q - q_mean
    k = k - k_mean
    sim = jnp.einsum("bcm,bcn->bmn", q, k, precision=hp) / (scale * temperature)
    sim = jax.nn.softmax(sim, axis=2)
    out = jnp.einsum("bmn,bcn->bmc", sim, v, precision=hp)    # (B, N, C)
    out = jnp.transpose(out, (0, 2, 1))                       # (B, C, N)
    unary = jnp.einsum("bco,bcn->bon", q_mean, k, precision=hp)   # (B, 1, N)
    unary = jax.nn.softmax(unary, axis=2)
    out_unary = jnp.einsum("bcn,bon->bco", v, unary, precision=hp)  # (B, C, 1)
    out = out + out_unary
    return (xf + out).reshape(B, C, H, W)


def _run_case(B, C, H, W, key, block_q=256):
    scale = math.sqrt(C)
    kx, kwq, kbq, kwk, kbk, kwv, kbv = jax.random.split(key, 7)
    fan = 1.0 / math.sqrt(C)
    x = jax.random.normal(kx, (B, C, H, W), dtype=jnp.float32)
    # Conv2d(C, C, 1) weights are (C, C, 1, 1) -> stored here as (C, C).
    wq = jax.random.uniform(kwq, (C, C), jnp.float32, -fan, fan)
    bq = jax.random.uniform(kbq, (C,), jnp.float32, -fan, fan)
    wk = jax.random.uniform(kwk, (C, C), jnp.float32, -fan, fan)
    bk = jax.random.uniform(kbk, (C,), jnp.float32, -fan, fan)
    wv = jax.random.uniform(kwv, (C, C), jnp.float32, -fan, fan)
    bv = jax.random.uniform(kbv, (C,), jnp.float32, -fan, fan)

    out = dnl_forward(x, wq, bq, wk, bk, wv, bv,
                      scale=scale, temperature=1.0, block_q=block_q)
    out = jax.block_until_ready(out)

    ref = dnl_reference(x, wq, bq, wk, bk, wv, bv, scale=scale, temperature=1.0)
    assert out.shape == (B, C, H, W)
    err = float(jnp.max(jnp.abs(out - ref)))
    # The attention matmuls intentionally use bf16 MXU operands, so the
    # tolerance is bf16-level rather than f32-level.
    assert jnp.allclose(out, ref, atol=2e-2, rtol=2e-2), f"max abs err {err}"


if __name__ == "__main__":
    key = jax.random.PRNGKey(0)
    k1, k2, k3 = jax.random.split(key, 3)
    # N = 256, two query tiles: per-batch K/V scratch reuse + megacore batch axis.
    _run_case(B=2, C=4, H=16, W=16, key=k1, block_q=128)
    # N = 81 (padded to 88): masked-padding / bias-corrected mean path.
    _run_case(B=1, C=8, H=9, W=9, key=k2)
    # N = 400 (padded to 512) with the default tq=256: padding + multiple tiles.
    _run_case(B=1, C=8, H=20, W=20, key=k3)
    print("KERNEL_OK")
</pallas_src>

<mosaic_0001>
module attributes {stable_mosaic.version = 11 : i64} {
  func.func @_dnl_kernel(%arg0: i32, %arg1: i32, %arg2: memref<1x256x4xf32, #tpu.memory_space<vmem>>, %arg3: memref<4x4xf32, #tpu.memory_space<vmem>>, %arg4: memref<4x4xf32, #tpu.memory_space<vmem>>, %arg5: memref<4x4xf32, #tpu.memory_space<vmem>>, %arg6: memref<3x4xf32, #tpu.memory_space<vmem>>, %arg7: memref<1x128x4xf32, #tpu.memory_space<vmem>>, %arg8: memref<256x4xbf16, #tpu.memory_space<vmem>>, %arg9: memref<4x256xbf16, #tpu.memory_space<vmem>>, %arg10: memref<256x4xbf16, #tpu.memory_space<vmem>>, %arg11: memref<1x4xf32, #tpu.memory_space<vmem>>, %arg12: memref<1x256xf32, #tpu.memory_space<vmem>>) attributes {dimension_semantics = [#tpu.dimension_semantics<parallel>, #tpu.dimension_semantics<arbitrary>], iteration_bounds = array<i64: 2, 2>, scalar_prefetch = 0 : i64, scratch_operands = 5 : i64, tpu.core_type = #tpu.core_type<tc>, window_params = [{transform_indices = @transform_0, window_bounds = array<i64: 1, 256, 4>}, {pipeline_mode = #tpu.pipeline_mode<synchronous>, transform_indices = @transform_1, window_bounds = array<i64: 4, 4>}, {pipeline_mode = #tpu.pipeline_mode<synchronous>, transform_indices = @transform_2, window_bounds = array<i64: 4, 4>}, {pipeline_mode = #tpu.pipeline_mode<synchronous>, transform_indices = @transform_3, window_bounds = array<i64: 4, 4>}, {pipeline_mode = #tpu.pipeline_mode<synchronous>, transform_indices = @transform_4, window_bounds = array<i64: 3, 4>}, {transform_indices = @transform_5, window_bounds = array<i64: 1, 128, 4>}]} {
    %c0_i32 = arith.constant 0 : i32
    %0 = arith.cmpi eq, %arg1, %c0_i32 : i32
    %1 = arith.extui %0 : i1 to i32
    %c0_i32_0 = arith.constant 0 : i32
    %2 = arith.cmpi ne, %1, %c0_i32_0 : i32
    scf.if %2 {
      %c0_15 = arith.constant 0 : index
      %c0_16 = arith.constant 0 : index
      %c0_17 = arith.constant 0 : index
      %31 = vector.load %arg2[%c0_15, %c0_16, %c0_17] : memref<1x256x4xf32, #tpu.memory_space<vmem>>, vector<1x256x4xf32>
      %32 = vector.shape_cast %31 : vector<1x256x4xf32> to vector<256x4xf32>
      %c0_18 = arith.constant 0 : index
      %c0_19 = arith.constant 0 : index
      %33 = vector.load %arg6[%c0_18, %c0_19] : memref<3x4xf32, #tpu.memory_space<vmem>>, vector<1x4xf32>
      %c0_20 = arith.constant 0 : index
      %c0_21 = arith.constant 0 : index
      %34 = vector.load %arg3[%c0_20, %c0_21] : memref<4x4xf32, #tpu.memory_space<vmem>>, vector<4x4xf32>
      %cst_22 = arith.constant dense<0.000000e+00> : vector<256x4xf32>
      %35 = tpu.matmul %32, %34, %cst_22 {dimension_numbers = #tpu.dot_dimension_numbers<[1], [0], [0], [1], [0, 0, 1, 1], [], []>} : vector<256x4xf32>, vector<4x4xf32>, vector<256x4xf32> -> vector<256x4xf32>
      %36 = vector.broadcast %33 : vector<1x4xf32> to vector<256x4xf32>
      %37 = arith.addf %35, %36 : vector<256x4xf32>
      %cst_23 = arith.constant dense<0.000000e+00> : vector<4xf32>
      %38 = vector.multi_reduction <add>, %37, %cst_23 [0] : vector<256x4xf32> to vector<4xf32>
      %39 = vector.shape_cast %38 : vector<4xf32> to vector<1x4xf32>
      %cst_24 = arith.constant 3.906250e-03 : f32
      %40 = vector.broadcast %cst_24 : f32 to vector<1x4xf32>
      %41 = arith.mulf %39, %40 : vector<1x4xf32>
      %42 = vector.broadcast %41 : vector<1x4xf32> to vector<256x4xf32>
      %43 = arith.subf %37, %42 : vector<256x4xf32>
      %cst_25 = arith.constant 5.000000e-01 : f32
      %44 = vector.broadcast %cst_25 : f32 to vector<256x4xf32>
      %45 = arith.mulf %43, %44 : vector<256x4xf32>
      %46 = arith.truncf %45 : vector<256x4xf32> to vector<256x4xbf16>
      %c0_26 = arith.constant 0 : index
      %c0_27 = arith.constant 0 : index
      %47 = vector.load %arg8[%c0_26, %c0_27] : memref<256x4xbf16, #tpu.memory_space<vmem>>, vector<256x4xbf16>
      tpu.vector_store %arg8[%c0_26, %c0_27], %46 {strides = array<i32>} : memref<256x4xbf16, #tpu.memory_space<vmem>>, vector<256x4xbf16>,
      %c1 = arith.constant 1 : index
      %c0_28 = arith.constant 0 : index
      %48 = vector.load %arg6[%c1, %c0_28] : memref<3x4xf32, #tpu.memory_space<vmem>>, vector<1x4xf32>
      %c0_29 = arith.constant 0 : index
      %c0_30 = arith.constant 0 : index
      %49 = vector.load %arg4[%c0_29, %c0_30] : memref<4x4xf32, #tpu.memory_space<vmem>>, vector<4x4xf32>
      %cst_31 = arith.constant dense<0.000000e+00> : vector<256x4xf32>
      %50 = tpu.matmul %32, %49, %cst_31 {dimension_numbers = #tpu.dot_dimension_numbers<[1], [0], [0], [1], [0, 0, 1, 1], [], []>} : vector<256x4xf32>, vector<4x4xf32>, vector<256x4xf32> -> vector<256x4xf32>
      %51 = vector.broadcast %48 : vector<1x4xf32> to vector<256x4xf32>
      %52 = arith.addf %50, %51 : vector<256x4xf32>
      %cst_32 = arith.constant dense<0.000000e+00> : vector<4xf32>
      %53 = vector.multi_reduction <add>, %52, %cst_32 [0] : vector<256x4xf32> to vector<4xf32>
      %54 = vector.shape_cast %53 : vector<4xf32> to vector<1x4xf32>
      %cst_33 = arith.constant 3.906250e-03 : f32
      %55 = vector.broadcast %cst_33 : f32 to vector<1x4xf32>
      %56 = arith.mulf %54, %55 : vector<1x4xf32>
      %57 = vector.broadcast %56 : vector<1x4xf32> to vector<256x4xf32>
      %58 = arith.subf %52, %57 : vector<256x4xf32>
      %59 = tpu.transpose %58, [1, 0] : vector<256x4xf32> -> vector<4x256xf32>
      %60 = arith.truncf %59 : vector<4x256xf32> to vector<4x256xbf16>
      %c0_34 = arith.constant 0 : index
      %c0_35 = arith.constant 0 : index
      %61 = vector.load %arg9[%c0_34, %c0_35] : memref<4x256xbf16, #tpu.memory_space<vmem>>, vector<4x256xbf16>
      tpu.vector_store %arg9[%c0_34, %c0_35], %60 {strides = array<i32>} : memref<4x256xbf16, #tpu.memory_space<vmem>>, vector<4x256xbf16>,
      %c2 = arith.constant 2 : index
      %c0_36 = arith.constant 0 : index
      %62 = vector.load %arg6[%c2, %c0_36] : memref<3x4xf32, #tpu.memory_space<vmem>>, vector<1x4xf32>
      %c0_37 = arith.constant 0 : index
      %c0_38 = arith.constant 0 : index
      %63 = vector.load %arg5[%c0_37, %c0_38] : memref<4x4xf32, #tpu.memory_space<vmem>>, vector<4x4xf32>
      %cst_39 = arith.constant dense<0.000000e+00> : vector<256x4xf32>
      %64 = tpu.matmul %32, %63, %cst_39 {dimension_numbers = #tpu.dot_dimension_numbers<[1], [0], [0], [1], [0, 0, 1, 1], [], []>} : vector<256x4xf32>, vector<4x4xf32>, vector<256x4xf32> -> vector<256x4xf32>
      %65 = vector.broadcast %62 : vector<1x4xf32> to vector<256x4xf32>
      %66 = arith.addf %64, %65 : vector<256x4xf32>
      %67 = arith.truncf %66 : vector<256x4xf32> to vector<256x4xbf16>
      %c0_40 = arith.constant 0 : index
      %c0_41 = arith.constant 0 : index
      %68 = vector.load %arg10[%c0_40, %c0_41] : memref<256x4xbf16, #tpu.memory_space<vmem>>, vector<256x4xbf16>
      tpu.vector_store %arg10[%c0_40, %c0_41], %67 {strides = array<i32>} : memref<256x4xbf16, #tpu.memory_space<vmem>>, vector<256x4xbf16>,
      %69 = arith.truncf %41 : vector<1x4xf32> to vector<1x4xbf16>
      %c0_42 = arith.constant 0 : index
      %c0_43 = arith.constant 0 : index
      %70 = vector.load %arg9[%c0_42, %c0_43] : memref<4x256xbf16, #tpu.memory_space<vmem>>, vector<4x256xbf16>
      %cst_44 = arith.constant dense<0.000000e+00> : vector<1x256xf32>
      %71 = tpu.matmul %69, %70, %cst_44 {dimension_numbers = #tpu.dot_dimension_numbers<[1], [0], [0], [1], [0, 0, 1, 1], [], []>} : vector<1x4xbf16>, vector<4x256xbf16>, vector<1x256xf32> -> vector<1x256xf32>
      %cst_45 = arith.constant dense<0xFF800000> : vector<1xf32>
      %72 = vector.multi_reduction <maximumf>, %71, %cst_45 [1] : vector<1x256xf32> to vector<1xf32>
      %73 = vector.shape_cast %72 : vector<1xf32> to vector<1x1xf32>
      %74 = vector.broadcast %73 : vector<1x1xf32> to vector<1x256xf32>
      %75 = arith.subf %71, %74 : vector<1x256xf32>
      %76 = math.exp %75 : vector<1x256xf32>
      %77 = arith.truncf %76 : vector<1x256xf32> to vector<1x256xbf16>
      %c0_46 = arith.constant 0 : index
      %c0_47 = arith.constant 0 : index
      %78 = vector.load %arg10[%c0_46, %c0_47] : memref<256x4xbf16, #tpu.memory_space<vmem>>, vector<256x4xbf16>
      %cst_48 = arith.constant dense<0.000000e+00> : vector<1x4xf32>
      %79 = tpu.matmul %77, %78, %cst_48 {dimension_numbers = #tpu.dot_dimension_numbers<[1], [0], [0], [1], [0, 0, 1, 1], [], []>} : vector<1x256xbf16>, vector<256x4xbf16>, vector<1x4xf32> -> vector<1x4xf32>
      %cst_49 = arith.constant dense<0.000000e+00> : vector<1xf32>
      %80 = vector.multi_reduction <add>, %76, %cst_49 [1] : vector<1x256xf32> to vector<1xf32>
      %81 = vector.shape_cast %80 : vector<1xf32> to vector<1x1xf32>
      %82 = vector.broadcast %81 : vector<1x1xf32> to vector<1x4xf32>
      %83 = arith.divf %79, %82 : vector<1x4xf32>
      %c0_50 = arith.constant 0 : index
      %c0_51 = arith.constant 0 : index
      %84 = vector.load %arg11[%c0_50, %c0_51] : memref<1x4xf32, #tpu.memory_space<vmem>>, vector<1x4xf32>
      tpu.vector_store %arg11[%c0_50, %c0_51], %83 {strides = array<i32>} : memref<1x4xf32, #tpu.memory_space<vmem>>, vector<1x4xf32>,
    } else {
    }
    %c128_i32 = arith.constant 128 : i32
    %3 = arith.muli %arg1, %c128_i32 : i32
    %4 = tpu.assume_multiple %3, 8 : i32
    %5 = arith.index_cast %4 : i32 to index
    %c0 = arith.constant 0 : index
    %6 = vector.load %arg8[%5, %c0] : memref<256x4xbf16, #tpu.memory_space<vmem>>, vector<128x4xbf16>
    %c0_1 = arith.constant 0 : index
    %c0_2 = arith.constant 0 : index
    %7 = vector.load %arg9[%c0_1, %c0_2] : memref<4x256xbf16, #tpu.memory_space<vmem>>, vector<4x256xbf16>
    %cst = arith.constant dense<0.000000e+00> : vector<128x256xf32>
    %8 = tpu.matmul %6, %7, %cst {dimension_numbers = #tpu.dot_dimension_numbers<[1], [0], [0], [1], [0, 0, 1, 1], [], []>} : vector<128x4xbf16>, vector<4x256xbf16>, vector<128x256xf32> -> vector<128x256xf32>
    %cst_3 = arith.constant dense<0xFF800000> : vector<128xf32>
    %9 = vector.multi_reduction <maximumf>, %8, %cst_3 [1] : vector<128x256xf32> to vector<128xf32>
    %10 = vector.shape_cast %9 : vector<128xf32> to vector<128x1xf32>
    %11 = vector.broadcast %10 : vector<128x1xf32> to vector<128x256xf32>
    %12 = arith.subf %8, %11 : vector<128x256xf32>
    %13 = math.exp %12 : vector<128x256xf32>
    %cst_4 = arith.constant dense<0.000000e+00> : vector<128xf32>
    %14 = vector.multi_reduction <add>, %13, %cst_4 [1] : vector<128x256xf32> to vector<128xf32>
    %15 = vector.shape_cast %14 : vector<128xf32> to vector<128x1xf32>
    %16 = arith.truncf %13 : vector<128x256xf32> to vector<128x256xbf16>
    %c0_5 = arith.constant 0 : index
    %c0_6 = arith.constant 0 : index
    %17 = vector.load %arg10[%c0_5, %c0_6] : memref<256x4xbf16, #tpu.memory_space<vmem>>, vector<256x4xbf16>
    %cst_7 = arith.constant dense<0.000000e+00> : vector<128x4xf32>
    %18 = tpu.matmul %16, %17, %cst_7 {dimension_numbers = #tpu.dot_dimension_numbers<[1], [0], [0], [1], [0, 0, 1, 1], [], []>} : vector<128x256xbf16>, vector<256x4xbf16>, vector<128x4xf32> -> vector<128x4xf32>
    %19 = vector.broadcast %15 : vector<128x1xf32> to vector<128x4xf32>
    %20 = arith.divf %18, %19 : vector<128x4xf32>
    %c0_8 = arith.constant 0 : index
    %21 = arith.index_cast %4 : i32 to index
    %c0_9 = arith.constant 0 : index
    %22 = vector.load %arg2[%c0_8, %21, %c0_9] : memref<1x256x4xf32, #tpu.memory_space<vmem>>, vector<1x128x4xf32>
    %23 = vector.shape_cast %22 : vector<1x128x4xf32> to vector<128x4xf32>
    %24 = arith.addf %23, %20 : vector<128x4xf32>
    %c0_10 = arith.constant 0 : index
    %c0_11 = arith.constant 0 : index
    %25 = vector.load %arg11[%c0_10, %c0_11] : memref<1x4xf32, #tpu.memory_space<vmem>>, vector<1x4xf32>
    %26 = vector.broadcast %25 : vector<1x4xf32> to vector<128x4xf32>
    %27 = arith.addf %24, %26 : vector<128x4xf32>
    %c0_12 = arith.constant 0 : index
    %c0_13 = arith.constant 0 : index
    %c0_14 = arith.constant 0 : index
    %28 = vector.load %arg7[%c0_12, %c0_13, %c0_14] : memref<1x128x4xf32, #tpu.memory_space<vmem>>, vector<1x128x4xf32>
    %29 = vector.shape_cast %28 : vector<1x128x4xf32> to vector<128x4xf32>
    %30 = vector.shape_cast %27 : vector<128x4xf32> to vector<1x128x4xf32>
    tpu.vector_store %arg7[%c0_12, %c0_13, %c0_14], %30 {strides = array<i32>} : memref<1x128x4xf32, #tpu.memory_space<vmem>>, vector<1x128x4xf32>,
    return
  }
  func.func @transform_0(%arg0: i32, %arg1: i32) -> (i32, i32, i32) {
    %c0_i32 = arith.constant 0 : i32
    %c0_i32_0 = arith.constant 0 : i32
    %c0_i32_1 = arith.constant 0 : i32
    return %arg0, %c0_i32, %c0_i32_0 : i32, i32, i32
  }
  func.func @transform_1(%arg0: i32, %arg1: i32) -> (i32, i32) {
    %c0_i32 = arith.constant 0 : i32
    %c0_i32_0 = arith.constant 0 : i32
    %c0_i32_1 = arith.constant 0 : i32
    return %c0_i32, %c0_i32_0 : i32, i32
  }
  func.func @transform_2(%arg0: i32, %arg1: i32) -> (i32, i32) {
    %c0_i32 = arith.constant 0 : i32
    %c0_i32_0 = arith.constant 0 : i32
    %c0_i32_1 = arith.constant 0 : i32
    return %c0_i32, %c0_i32_0 : i32, i32
  }
  func.func @transform_3(%arg0: i32, %arg1: i32) -> (i32, i32) {
    %c0_i32 = arith.constant 0 : i32
    %c0_i32_0 = arith.constant 0 : i32
    %c0_i32_1 = arith.constant 0 : i32
    return %c0_i32, %c0_i32_0 : i32, i32
  }
  func.func @transform_4(%arg0: i32, %arg1: i32) -> (i32, i32) {
    %c0_i32 = arith.constant 0 : i32
    %c0_i32_0 = arith.constant 0 : i32
    %c0_i32_1 = arith.constant 0 : i32
    return %c0_i32, %c0_i32_0 : i32, i32
  }
  func.func @transform_5(%arg0: i32, %arg1: i32) -> (i32, i32, i32) {
    %c0_i32 = arith.constant 0 : i32
    %c0_i32_0 = arith.constant 0 : i32
    return %arg0, %arg1, %c0_i32 : i32, i32, i32
  }
}

module attributes {stable_mosaic.version = 11 : i64} {
  func.func @_dnl_kernel(%arg0: i32, %arg1: i32, %arg2: memref<1x256x4xf32, #tpu.memory_space<vmem>>, %arg3: memref<4x4xf32, #tpu.memory_space<vmem>>, %arg4: memref<4x4xf32, #tpu.memory_space<vmem>>, %arg5: memref<4x4xf32, #tpu.memory_space<vmem>>, %arg6: memref<3x4xf32, #tpu.memory_space<vmem>>, %arg7: memref<1x128x4xf32, #tpu.memory_space<vmem>>, %arg8: memref<256x4xbf16, #tpu.memory_space<vmem>>, %arg9: memref<4x256xbf16, #tpu.memory_space<vmem>>, %arg10: memref<256x4xbf16, #tpu.memory_space<vmem>>, %arg11: memref<1x4xf32, #tpu.memory_space<vmem>>, %arg12: memref<1x256xf32, #tpu.memory_space<vmem>>) attributes {dimension_semantics = [#tpu.dimension_semantics<parallel>, #tpu.dimension_semantics<arbitrary>], iteration_bounds = array<i64: 2, 2>, scalar_prefetch = 0 : i64, scratch_operands = 5 : i64, tpu.core_type = #tpu.core_type<tc>, window_params = [{transform_indices = @transform_0, window_bounds = array<i64: 1, 256, 4>}, {pipeline_mode = #tpu.pipeline_mode<synchronous>, transform_indices = @transform_1, window_bounds = array<i64: 4, 4>}, {pipeline_mode = #tpu.pipeline_mode<synchronous>, transform_indices = @transform_2, window_bounds = array<i64: 4, 4>}, {pipeline_mode = #tpu.pipeline_mode<synchronous>, transform_indices = @transform_3, window_bounds = array<i64: 4, 4>}, {pipeline_mode = #tpu.pipeline_mode<synchronous>, transform_indices = @transform_4, window_bounds = array<i64: 3, 4>}, {transform_indices = @transform_5, window_bounds = array<i64: 1, 128, 4>}]} {
    %c0_i32 = arith.constant 0 : i32
    %0 = arith.cmpi eq, %arg1, %c0_i32 : i32
    %1 = arith.extui %0 : i1 to i32
    %c0_i32_0 = arith.constant 0 : i32
    %2 = arith.cmpi ne, %1, %c0_i32_0 : i32
    scf.if %2 {
      %c0_15 = arith.constant 0 : index
      %c0_16 = arith.constant 0 : index
      %c0_17 = arith.constant 0 : index
      %31 = vector.load %arg2[%c0_15, %c0_16, %c0_17] : memref<1x256x4xf32, #tpu.memory_space<vmem>>, vector<1x256x4xf32>
      %32 = vector.shape_cast %31 : vector<1x256x4xf32> to vector<256x4xf32>
      %c0_18 = arith.constant 0 : index
      %c0_19 = arith.constant 0 : index
      %33 = vector.load %arg6[%c0_18, %c0_19] : memref<3x4xf32, #tpu.memory_space<vmem>>, vector<1x4xf32>
      %c0_20 = arith.constant 0 : index
      %c0_21 = arith.constant 0 : index
      %34 = vector.load %arg3[%c0_20, %c0_21] : memref<4x4xf32, #tpu.memory_space<vmem>>, vector<4x4xf32>
      %cst_22 = arith.constant dense<0.000000e+00> : vector<256x4xf32>
      %35 = tpu.matmul %32, %34, %cst_22 {dimension_numbers = #tpu.dot_dimension_numbers<[1], [0], [0], [1], [0, 0, 1, 1], [], []>} : vector<256x4xf32>, vector<4x4xf32>, vector<256x4xf32> -> vector<256x4xf32>
      %36 = vector.broadcast %33 : vector<1x4xf32> to vector<256x4xf32>
      %37 = arith.addf %35, %36 : vector<256x4xf32>
      %cst_23 = arith.constant dense<0.000000e+00> : vector<4xf32>
      %38 = vector.multi_reduction <add>, %37, %cst_23 [0] : vector<256x4xf32> to vector<4xf32>
      %39 = vector.shape_cast %38 : vector<4xf32> to vector<1x4xf32>
      %cst_24 = arith.constant 3.906250e-03 : f32
      %40 = vector.broadcast %cst_24 : f32 to vector<1x4xf32>
      %41 = arith.mulf %39, %40 : vector<1x4xf32>
      %42 = vector.broadcast %41 : vector<1x4xf32> to vector<256x4xf32>
      %43 = arith.subf %37, %42 : vector<256x4xf32>
      %cst_25 = arith.constant 5.000000e-01 : f32
      %44 = vector.broadcast %cst_25 : f32 to vector<256x4xf32>
      %45 = arith.mulf %43, %44 : vector<256x4xf32>
      %46 = arith.truncf %45 : vector<256x4xf32> to vector<256x4xbf16>
      %c0_26 = arith.constant 0 : index
      %c0_27 = arith.constant 0 : index
      %47 = vector.load %arg8[%c0_26, %c0_27] : memref<256x4xbf16, #tpu.memory_space<vmem>>, vector<256x4xbf16>
      tpu.vector_store %arg8[%c0_26, %c0_27], %46 {strides = array<i32>} : memref<256x4xbf16, #tpu.memory_space<vmem>>, vector<256x4xbf16>,
      %c1 = arith.constant 1 : index
      %c0_28 = arith.constant 0 : index
      %48 = vector.load %arg6[%c1, %c0_28] : memref<3x4xf32, #tpu.memory_space<vmem>>, vector<1x4xf32>
      %c0_29 = arith.constant 0 : index
      %c0_30 = arith.constant 0 : index
      %49 = vector.load %arg4[%c0_29, %c0_30] : memref<4x4xf32, #tpu.memory_space<vmem>>, vector<4x4xf32>
      %cst_31 = arith.constant dense<0.000000e+00> : vector<256x4xf32>
      %50 = tpu.matmul %32, %49, %cst_31 {dimension_numbers = #tpu.dot_dimension_numbers<[1], [0], [0], [1], [0, 0, 1, 1], [], []>} : vector<256x4xf32>, vector<4x4xf32>, vector<256x4xf32> -> vector<256x4xf32>
      %51 = vector.broadcast %48 : vector<1x4xf32> to vector<256x4xf32>
      %52 = arith.addf %50, %51 : vector<256x4xf32>
      %cst_32 = arith.constant dense<0.000000e+00> : vector<4xf32>
      %53 = vector.multi_reduction <add>, %52, %cst_32 [0] : vector<256x4xf32> to vector<4xf32>
      %54 = vector.shape_cast %53 : vector<4xf32> to vector<1x4xf32>
      %cst_33 = arith.constant 3.906250e-03 : f32
      %55 = vector.broadcast %cst_33 : f32 to vector<1x4xf32>
      %56 = arith.mulf %54, %55 : vector<1x4xf32>
      %57 = vector.broadcast %56 : vector<1x4xf32> to vector<256x4xf32>
      %58 = arith.subf %52, %57 : vector<256x4xf32>
      %59 = tpu.transpose %58, [1, 0] : vector<256x4xf32> -> vector<4x256xf32>
      %60 = arith.truncf %59 : vector<4x256xf32> to vector<4x256xbf16>
      %c0_34 = arith.constant 0 : index
      %c0_35 = arith.constant 0 : index
      %61 = vector.load %arg9[%c0_34, %c0_35] : memref<4x256xbf16, #tpu.memory_space<vmem>>, vector<4x256xbf16>
      tpu.vector_store %arg9[%c0_34, %c0_35], %60 {strides = array<i32>} : memref<4x256xbf16, #tpu.memory_space<vmem>>, vector<4x256xbf16>,
      %c2 = arith.constant 2 : index
      %c0_36 = arith.constant 0 : index
      %62 = vector.load %arg6[%c2, %c0_36] : memref<3x4xf32, #tpu.memory_space<vmem>>, vector<1x4xf32>
      %c0_37 = arith.constant 0 : index
      %c0_38 = arith.constant 0 : index
      %63 = vector.load %arg5[%c0_37, %c0_38] : memref<4x4xf32, #tpu.memory_space<vmem>>, vector<4x4xf32>
      %cst_39 = arith.constant dense<0.000000e+00> : vector<256x4xf32>
      %64 = tpu.matmul %32, %63, %cst_39 {dimension_numbers = #tpu.dot_dimension_numbers<[1], [0], [0], [1], [0, 0, 1, 1], [], []>} : vector<256x4xf32>, vector<4x4xf32>, vector<256x4xf32> -> vector<256x4xf32>
      %65 = vector.broadcast %62 : vector<1x4xf32> to vector<256x4xf32>
      %66 = arith.addf %64, %65 : vector<256x4xf32>
      %67 = arith.truncf %66 : vector<256x4xf32> to vector<256x4xbf16>
      %c0_40 = arith.constant 0 : index
      %c0_41 = arith.constant 0 : index
      %68 = vector.load %arg10[%c0_40, %c0_41] : memref<256x4xbf16, #tpu.memory_space<vmem>>, vector<256x4xbf16>
      tpu.vector_store %arg10[%c0_40, %c0_41], %67 {strides = array<i32>} : memref<256x4xbf16, #tpu.memory_space<vmem>>, vector<256x4xbf16>,
      %69 = arith.truncf %41 : vector<1x4xf32> to vector<1x4xbf16>
      %c0_42 = arith.constant 0 : index
      %c0_43 = arith.constant 0 : index
      %70 = vector.load %arg9[%c0_42, %c0_43] : memref<4x256xbf16, #tpu.memory_space<vmem>>, vector<4x256xbf16>
      %cst_44 = arith.constant dense<0.000000e+00> : vector<1x256xf32>
      %71 = tpu.matmul %69, %70, %cst_44 {dimension_numbers = #tpu.dot_dimension_numbers<[1], [0], [0], [1], [0, 0, 1, 1], [], []>} : vector<1x4xbf16>, vector<4x256xbf16>, vector<1x256xf32> -> vector<1x256xf32>
      %cst_45 = arith.constant dense<0xFF800000> : vector<1xf32>
      %72 = vector.multi_reduction <maximumf>, %71, %cst_45 [1] : vector<1x256xf32> to vector<1xf32>
      %73 = vector.shape_cast %72 : vector<1xf32> to vector<1x1xf32>
      %74 = vector.broadcast %73 : vector<1x1xf32> to vector<1x256xf32>
      %75 = arith.subf %71, %74 : vector<1x256xf32>
      %76 = math.exp %75 : vector<1x256xf32>
      %77 = arith.truncf %76 : vector<1x256xf32> to vector<1x256xbf16>
      %c0_46 = arith.constant 0 : index
      %c0_47 = arith.constant 0 : index
      %78 = vector.load %arg10[%c0_46, %c0_47] : memref<256x4xbf16, #tpu.memory_space<vmem>>, vector<256x4xbf16>
      %cst_48 = arith.constant dense<0.000000e+00> : vector<1x4xf32>
      %79 = tpu.matmul %77, %78, %cst_48 {dimension_numbers = #tpu.dot_dimension_numbers<[1], [0], [0], [1], [0, 0, 1, 1], [], []>} : vector<1x256xbf16>, vector<256x4xbf16>, vector<1x4xf32> -> vector<1x4xf32>
      %cst_49 = arith.constant dense<0.000000e+00> : vector<1xf32>
      %80 = vector.multi_reduction <add>, %76, %cst_49 [1] : vector<1x256xf32> to vector<1xf32>
      %81 = vector.shape_cast %80 : vector<1xf32> to vector<1x1xf32>
      %82 = vector.broadcast %81 : vector<1x1xf32> to vector<1x4xf32>
      %83 = arith.divf %79, %82 : vector<1x4xf32>
      %c0_50 = arith.constant 0 : index
      %c0_51 = arith.constant 0 : index
      %84 = vector.load %arg11[%c0_50, %c0_51] : memref<1x4xf32, #tpu.memory_space<vmem>>, vector<1x4xf32>
      tpu.vector_store %arg11[%c0_50, %c0_51], %83 {strides = array<i32>} : memref<1x4xf32, #tpu.memory_space<vmem>>, vector<1x4xf32>,
    } else {
    }
    %c128_i32 = arith.constant 128 : i32
    %3 = arith.muli %arg1, %c128_i32 : i32
    %4 = tpu.assume_multiple %3, 8 : i32
    %5 = arith.index_cast %4 : i32 to index
    %c0 = arith.constant 0 : index
    %6 = vector.load %arg8[%5, %c0] : memref<256x4xbf16, #tpu.memory_space<vmem>>, vector<128x4xbf16>
    %c0_1 = arith.constant 0 : index
    %c0_2 = arith.constant 0 : index
    %7 = vector.load %arg9[%c0_1, %c0_2] : memref<4x256xbf16, #tpu.memory_space<vmem>>, vector<4x256xbf16>
    %cst = arith.constant dense<0.000000e+00> : vector<128x256xf32>
    %8 = tpu.matmul %6, %7, %cst {dimension_numbers = #tpu.dot_dimension_numbers<[1], [0], [0], [1], [0, 0, 1, 1], [], []>} : vector<128x4xbf16>, vector<4x256xbf16>, vector<128x256xf32> -> vector<128x256xf32>
    %cst_3 = arith.constant dense<0xFF800000> : vector<128xf32>
    %9 = vector.multi_reduction <maximumf>, %8, %cst_3 [1] : vector<128x256xf32> to vector<128xf32>
    %10 = vector.shape_cast %9 : vector<128xf32> to vector<128x1xf32>
    %11 = vector.broadcast %10 : vector<128x1xf32> to vector<128x256xf32>
    %12 = arith.subf %8, %11 : vector<128x256xf32>
    %13 = math.exp %12 : vector<128x256xf32>
    %cst_4 = arith.constant dense<0.000000e+00> : vector<128xf32>
    %14 = vector.multi_reduction <add>, %13, %cst_4 [1] : vector<128x256xf32> to vector<128xf32>
    %15 = vector.shape_cast %14 : vector<128xf32> to vector<128x1xf32>
    %16 = arith.truncf %13 : vector<128x256xf32> to vector<128x256xbf16>
    %c0_5 = arith.constant 0 : index
    %c0_6 = arith.constant 0 : index
    %17 = vector.load %arg10[%c0_5, %c0_6] : memref<256x4xbf16, #tpu.memory_space<vmem>>, vector<256x4xbf16>
    %cst_7 = arith.constant dense<0.000000e+00> : vector<128x4xf32>
    %18 = tpu.matmul %16, %17, %cst_7 {dimension_numbers = #tpu.dot_dimension_numbers<[1], [0], [0], [1], [0, 0, 1, 1], [], []>} : vector<128x256xbf16>, vector<256x4xbf16>, vector<128x4xf32> -> vector<128x4xf32>
    %19 = vector.broadcast %15 : vector<128x1xf32> to vector<128x4xf32>
    %20 = arith.divf %18, %19 : vector<128x4xf32>
    %c0_8 = arith.constant 0 : index
    %21 = arith.index_cast %4 : i32 to index
    %c0_9 = arith.constant 0 : index
    %22 = vector.load %arg2[%c0_8, %21, %c0_9] : memref<1x256x4xf32, #tpu.memory_space<vmem>>, vector<1x128x4xf32>
    %23 = vector.shape_cast %22 : vector<1x128x4xf32> to vector<128x4xf32>
    %24 = arith.addf %23, %20 : vector<128x4xf32>
    %c0_10 = arith.constant 0 : index
    %c0_11 = arith.constant 0 : index
    %25 = vector.load %arg11[%c0_10, %c0_11] : memref<1x4xf32, #tpu.memory_space<vmem>>, vector<1x4xf32>
    %26 = vector.broadcast %25 : vector<1x4xf32> to vector<128x4xf32>
    %27 = arith.addf %24, %26 : vector<128x4xf32>
    %c0_12 = arith.constant 0 : index
    %c0_13 = arith.constant 0 : index
    %c0_14 = arith.constant 0 : index
    %28 = vector.load %arg7[%c0_12, %c0_13, %c0_14] : memref<1x128x4xf32, #tpu.memory_space<vmem>>, vector<1x128x4xf32>
    %29 = vector.shape_cast %28 : vector<1x128x4xf32> to vector<128x4xf32>
    %30 = vector.shape_cast %27 : vector<128x4xf32> to vector<1x128x4xf32>
    tpu.vector_store %arg7[%c0_12, %c0_13, %c0_14], %30 {strides = array<i32>} : memref<1x128x4xf32, #tpu.memory_space<vmem>>, vector<1x128x4xf32>,
    return
  }
  func.func @transform_0(%arg0: i32, %arg1: i32) -> (i32, i32, i32) {
    %c0_i32 = arith.constant 0 : i32
    %c0_i32_0 = arith.constant 0 : i32
    %c0_i32_1 = arith.constant 0 : i32
    return %arg0, %c0_i32, %c0_i32_0 : i32, i32, i32
  }
  func.func @transform_1(%arg0: i32, %arg1: i32) -> (i32, i32) {
    %c0_i32 = arith.constant 0 : i32
    %c0_i32_0 = arith.constant 0 : i32
    %c0_i32_1 = arith.constant 0 : i32
    return %c0_i32, %c0_i32_0 : i32, i32
  }
  func.func @transform_2(%arg0: i32, %arg1: i32) -> (i32, i32) {
    %c0_i32 = arith.constant 0 : i32
    %c0_i32_0 = arith.constant 0 : i32
    %c0_i32_1 = arith.constant 0 : i32
    return %c0_i32, %c0_i32_0 : i32, i32
  }
  func.func @transform_3(%arg0: i32, %arg1: i32) -> (i32, i32) {
    %c0_i32 = arith.constant 0 : i32
    %c0_i32_0 = arith.constant 0 : i32
    %c0_i32_1 = arith.constant 0 : i32
    return %c0_i32, %c0_i32_0 : i32, i32
  }
  func.func @transform_4(%arg0: i32, %arg1: i32) -> (i32, i32) {
    %c0_i32 = arith.constant 0 : i32
    %c0_i32_0 = arith.constant 0 : i32
    %c0_i32_1 = arith.constant 0 : i32
    return %c0_i32, %c0_i32_0 : i32, i32
  }
  func.func @transform_5(%arg0: i32, %arg1: i32) -> (i32, i32, i32) {
    %c0_i32 = arith.constant 0 : i32
    %c0_i32_0 = arith.constant 0 : i32
    return %arg0, %arg1, %c0_i32 : i32, i32, i32
  }
}

</mosaic_0001>

<bundles_post_ra>
// kernel: tpu_custom_call.1
= control target key start
LH: loop header
LB: loop body
LE: loop exit
PB: predicated region body
PF: predicated region fallthrough
CT: control target
= control target key end

     0   :  { %s3025_s18 = smov 0   ;;  %s3027_s19 = smov 0   ;;  %s4449_s0 = inlined_call_operand.vmem [shape: f32[2,256,4], index: 0, kind: input, shape index: {}]   ;;  %s4450_s1 = inlined_call_operand.vmem [shape: f32[4,4], index: 1, kind: input, shape index: {}]   ;;  %s4451_s2 = inlined_call_operand.vmem [shape: f32[4,4], index: 2, kind: input, shape index: {}]   ;;  %s4452_s3 = inlined_call_operand.vmem [shape: f32[4,4], index: 3, kind: input, shape index: {}]   ;;  %s4453_s4 = inlined_call_operand.vmem [shape: f32[3,4], index: 4, kind: input, shape index: {}]   ;;  %s4454_s5 = inlined_call_operand.vmem [shape: f32[2,256,4], index: 5, kind: output, shape index: {}]  }
   0x1   :  { %s3029_s20 = smov 0   ;;  %s3031_s21 = smov 0  }
   0x2   :  { %s3033_s22 = smov 0  }
   0x3 LB: > { %s24_s23 = sadd.s32 1, %s2985_s20  ;;  %s27_s24 = sadd.s32 1, %s2989_s21  ;;  %s2993_s22 = sphi %s3033_s22, %s15_s22   ;;  %s2989_s21 = sphi %s3031_s21, %s4571_s21   ;;  %s2985_s20 = sphi %s3029_s20, %s4570_s20   ;;  %s2981_s19 = sphi %s3027_s19, %s4569_s19   ;;  %s2977_s18 = sphi %s3025_s18, %s4568_s18  }
   0x4   : > { %p25_p0 = scmp.ge.s32.totalorder %s24_s23, 2  ;;  %p2436_p1 = scmp.ge.s32.totalorder %s2993_s22, 1 }
   0x5   : > { %p201_p2 = scmp.lt.s32.totalorder %s2993_s22, 5 }
   0x6   : > { %s4573_s23 = smov (%p25_p0, %s24_s23), 0  ;;  %s4575_s24 = smov (!%p25_p0, %s27_s24), %s2989_s21 }
   0x7   : > { %p202_p3 = pnand %p2436_p1, %p201_p2  ;;  %p29_p4 = scmp.ge.s32.totalorder %s4575_s24, 2 }
   0x8   : > { %p233_p5 = scmp.lt.s32.totalorder (!%p202_p3), %s2981_s19, 1  ;;  %s2439_s25 = sshll.u32 (!%p202_p3), %s2977_s18, 4 }
   0x9   : > { %s4577_s24 = smov (%p29_p4, %s4575_s24), 0  ;;  %205 = sbr.rel (%p202_p3) target bundleno = 1586 (0x632), region = 40 }
   0xa   : > { %p241_p6 = scmp.lt.s32.totalorder (!%p202_p3), %s2439_s25, 31  ;;  %p2442_p7 = scmp.ne.s32.totalorder (!%p202_p3), %s2977_s18, 0 }
   0xe   : > { %s4579_s19 = smov (!%p233_p5, %s2981_s19), 1  ;;  %s4581_s25 = smov (!%p241_p6, %s2439_s25), 31 }
   0xf   : > { %s2724_s26 = sshll.u32 %s4579_s19, 8  ;;  %s2440_s27 = sshll.u32 %s4579_s19, 5 }
  0x10   : > { %s3061_s30 = scalar_lea.vmem %s4449_s0, %s2724_s26  ;;  %s244_s6 = sadd.s32 %s2440_s27, %s4581_s25 }
  0x11   : > { %s2441_s7 = sshll.u32 %s244_s6, 3  ;;  %252 = sbr.rel (%p2442_p7) target bundleno = 1046 (0x416), region = 44 }
  0x12   : > { %s3066_s10 = scalar_lea.vmem %s4454_s5, %s2441_s7 }
  0x16   : > { %v286_v0 = vld [vmem:[%s4450_s1] sm:$0xf]  ;;  %vm385_vm0 = vcmask 1043456   ;;  %vm288_vm1 = vcmask 31744   ;;  %v3087_v3 = vld [vmem:[%s3061_s30 + $0x8] sm:$0xff]  ;;  %v3094_v4 = vld [vmem:[%s3061_s30 + $0x10] sm:$0xff] }
  0x17   : > { %v702_v1 = vld [vmem:[%s4451_s2] sm:$0xf]  ;;  %2443 = vmatpush.msk.msra.mxu0 %vm385_vm0, %v286_v0  ;;  %2765 = vmatpush.msk.msra.mxu3 %vm385_vm0, %v286_v0  ;;  %v3101_v5 = vld [vmem:[%s3061_s30 + $0x18] sm:$0xff]  ;;  %v3115_v7 = vld [vmem:[%s3061_s30 + $0x28] sm:$0xff]  ;;  %vm668_vm2 = vcmask 27648   ;;  %vm989_vm3 = vcmask 1041408  }
  0x18   : > { %v3076_v2 = vld [vmem:[%s3061_s30] sm:$0xff]  ;;  %2476 = vmatpush.msk.msra.mxu1 %vm385_vm0, %v702_v1  ;;  %v3122_v8 = vld [vmem:[%s3061_s30 + $0x30] sm:$0xff]  ;;  %v3129_v9 = vld [vmem:[%s3061_s30 + $0x38] sm:$0xff]  ;;  %vm1217_vm4 = vcmask 1040384   ;;  %vm1405_vm9 = vcmask 24576  }
  0x19   : > { %2444 = vmatmul.msk.f32.vlgmr.msra.gmra.mxu0 %vm288_vm1, %v3076_v2  ;;  %2477 = vmatmul.msk.f32.vlgmr.msra.gmra.mxu1 %vm288_vm1, %v3076_v2  ;;  %v3108_v6 = vld [vmem:[%s3061_s30 + $0x20] sm:$0xff]  ;;  %4492 = vst [vmem:[#allocation7_spill] sm:$0xff] %v3129_v9  ;;  %v3143_v11 = vld [vmem:[%s3061_s30 + $0x48] sm:$0xff]  ;;  %v3150_v12 = vld [vmem:[%s3061_s30 + $0x50] sm:$0xff] }
  0x1a   : > { %2766 = vmatpush.msk.msrb.mxu3 %vm385_vm0, %v702_v1  ;;  %v3136_v10 = vld [vmem:[%s3061_s30 + $0x40] sm:$0xff]  ;;  %4494 = vst [vmem:[#allocation9_spill] sm:$0xff] %v3143_v11  ;;  %v3157_v13 = vld [vmem:[%s3061_s30 + $0x58] sm:$0xff]  ;;  %v3171_v15 = vld [vmem:[%s3061_s30 + $0x68] sm:$0xff] }
  0x1b   : > { %4493 = vst [vmem:[#allocation8_spill] sm:$0xff] %v3136_v10  ;;  %v3164_v14 = vld [vmem:[%s3061_s30 + $0x60] sm:$0xff]  ;;  %v3178_v16 = vld [vmem:[%s3061_s30 + $0xd8] sm:$0xff]  ;;  %v3183_v17 = vld [vmem:[%s3061_s30 + $0x70] sm:$0xff] }
  0x1c   : > { %4495 = vst [vmem:[#allocation10_spill] sm:$0xff] %v3150_v12  ;;  %2471 = vmatmul.msk.f32.vlgmr.msra.gmra.mxu3 %vm288_vm1, %v3178_v16  ;;  %v3190_v18 = vld [vmem:[%s3061_s30 + $0xe0] sm:$0xff]  ;;  %v3195_v19 = vld [vmem:[%s3061_s30 + $0x78] sm:$0xff]  ;;  %v3202_v20 = vld [vmem:[%s3061_s30 + $0xe8] sm:$0xff] }
  0x1d   : > { %4496 = vst [vmem:[#allocation11_spill] sm:$0xff] %v3157_v13  ;;  %v3211_v23 = vld [vmem:[%s3061_s30 + $0x80] sm:$0xff]  ;;  %v3218_v24 = vld [vmem:[%s3061_s30 + $0xf0] sm:$0xff]  ;;  %v3227_v27 = vld [vmem:[%s3061_s30 + $0x88] sm:$0xff] }
  0x1e   : > { %4497 = vst [vmem:[#allocation12_spill] sm:$0xff] %v3164_v14  ;;  %v3234_v28 = vld [vmem:[%s3061_s30 + $0xf8] sm:$0xff]  ;;  %v3241_v31 = vld [vmem:[%s3061_s30 + $0x90] sm:$0xff]  ;;  %v3263_v37 = vld [vmem:[%s3061_s30 + $0xa0] sm:$0xff] }
  0x1f   : > { %4498 = vst [vmem:[#allocation13_spill] sm:$0xff] %v3171_v15  ;;  %v3252_v34 = vld [vmem:[%s3061_s30 + $0x98] sm:$0xff]  ;;  %v3274_v40 = vld [vmem:[%s3061_s30 + $0xa8] sm:$0xff]  ;;  %v275_v43 = vld [vmem:[%s3061_s30 + $0xb0] sm:$0xff] }
  0x20   : > { %4499 = vst [vmem:[#allocation14_spill] sm:$0xff] %v3183_v17  ;;  %v276_v46 = vld [vmem:[%s3061_s30 + $0xb8] sm:$0xff]  ;;  %v277_v49 = vld [vmem:[%s3061_s30 + $0xc0] sm:$0xff]  ;;  %v278_v52 = vld [vmem:[%s3061_s30 + $0xc8] sm:$0xff] }
  0x21   : > { %2445 = vmatmul.msk.f32.gmra.mxu0 %vm288_vm1, %v3087_v3  ;;  %2478 = vmatmul.msk.f32.gmra.mxu1 %vm288_vm1, %v3087_v3  ;;  %4500 = vst [vmem:[#allocation15_spill] sm:$0xff] %v3195_v19  ;;  %v3307_v55 = vld [vmem:[%s3061_s30 + $0xd0] sm:$0xff]  ;;  %v3320_v60 = vld [vmem:[%s4453_s4] ss:$0 sm:$0xff] }
  0x22   : > { %4501 = vst [vmem:[#allocation16_spill] sm:$0xff] %v3211_v23 }
  0x23   : > { %4502 = vst [vmem:[#allocation17_spill] sm:$0xff] %v3227_v27 }
  0x24   : > { %2472 = vmatmul.msk.f32.gmra.mxu3 %vm288_vm1, %v3190_v18  ;;  %4503 = vst [vmem:[#allocation18_spill] sm:$0xff] %v3241_v31 }
  0x25   : > { %4504 = vst [vmem:[#allocation19_spill] sm:$0xff] %v3252_v34 }
  0x26   : > { %4505 = vst [vmem:[#allocation20_spill] sm:$0xff] %v3263_v37 }
  0x27   : > { %4506 = vst [vmem:[#allocation21_spill] sm:$0xff] %v3274_v40 }
  0x28   : > { %4507 = vst [vmem:[#allocation22_spill] sm:$0xff] %v3307_v55 }
  0x29   : > { %2446 = vmatmul.msk.f32.gmra.mxu0 %vm288_vm1, %v3094_v4  ;;  %2479 = vmatmul.msk.f32.gmra.mxu1 %vm288_vm1, %v3094_v4 }
  0x2c   : > { %2473 = vmatmul.msk.f32.gmra.mxu3 %vm288_vm1, %v3202_v20 }
  0x31   : > { %2447 = vmatmul.msk.f32.gmra.mxu0 %vm288_vm1, %v3101_v5  ;;  %2480 = vmatmul.msk.f32.gmra.mxu1 %vm288_vm1, %v3101_v5 }
  0x34   : > { %2474 = vmatmul.msk.f32.gmra.mxu3 %vm288_vm1, %v3218_v24 }
  0x39   : > { %2448 = vmatmul.msk.f32.gmra.mxu0 %vm288_vm1, %v3108_v6  ;;  %2481 = vmatmul.msk.f32.gmra.mxu1 %vm288_vm1, %v3108_v6 }
  0x3c   : > { %2475 = vmatmul.msk.f32.gmra.mxu3 %vm288_vm1, %v3234_v28 }
  0x41   : > { %2449 = vmatmul.msk.f32.gmra.mxu0 %vm288_vm1, %v3115_v7  ;;  %2482 = vmatmul.msk.f32.gmra.mxu1 %vm288_vm1, %v3115_v7 }
  0x44   : > { %2504 = vmatmul.msk.f32.vlgmr.msrb.gmra.mxu3 %vm288_vm1, %v3178_v16 }
  0x49   : > { %2450 = vmatmul.msk.f32.gmra.mxu0 %vm288_vm1, %v3122_v8  ;;  %2483 = vmatmul.msk.f32.gmra.mxu1 %vm288_vm1, %v3122_v8 }
  0x4c   : > { %2505 = vmatmul.msk.f32.gmra.mxu3 %vm288_vm1, %v3190_v18 }
  0x51   : > { %2451 = vmatmul.msk.f32.gmra.mxu0 %vm288_vm1, %v3129_v9  ;;  %2484 = vmatmul.msk.f32.gmra.mxu1 %vm288_vm1, %v3129_v9 }
  0x54   : > { %2506 = vmatmul.msk.f32.gmra.mxu3 %vm288_vm1, %v3202_v20 }
  0x59   : > { %2452 = vmatmul.msk.f32.gmra.mxu0 %vm288_vm1, %v3136_v10  ;;  %2485 = vmatmul.msk.f32.gmra.mxu1 %vm288_vm1, %v3136_v10 }
  0x5c   : > { %2507 = vmatmul.msk.f32.gmra.mxu3 %vm288_vm1, %v3218_v24 }
  0x61   : > { %2453 = vmatmul.msk.f32.gmra.mxu0 %vm288_vm1, %v3143_v11  ;;  %2486 = vmatmul.msk.f32.gmra.mxu1 %vm288_vm1, %v3143_v11 }
  0x64   : > { %2508 = vmatmul.msk.f32.gmra.mxu3 %vm288_vm1, %v3234_v28 }
  0x69   : > { %2454 = vmatmul.msk.f32.gmra.mxu0 %vm288_vm1, %v3150_v12  ;;  %2487 = vmatmul.msk.f32.gmra.mxu1 %vm288_vm1, %v3150_v12 }
  0x71   : > { %2455 = vmatmul.msk.f32.gmra.mxu0 %vm288_vm1, %v3157_v13  ;;  %2488 = vmatmul.msk.f32.gmra.mxu1 %vm288_vm1, %v3157_v13 }
  0x79   : > { %2456 = vmatmul.msk.f32.gmra.mxu0 %vm288_vm1, %v3164_v14  ;;  %2489 = vmatmul.msk.f32.gmra.mxu1 %vm288_vm1, %v3164_v14 }
  0x81   : > { %2457 = vmatmul.msk.f32.gmra.mxu0 %vm288_vm1, %v3171_v15  ;;  %2490 = vmatmul.msk.f32.gmra.mxu1 %vm288_vm1, %v3171_v15 }
  0x89   : > { %2458 = vmatmul.msk.f32.gmra.mxu0 %vm288_vm1, %v3183_v17  ;;  %2491 = vmatmul.msk.f32.gmra.mxu1 %vm288_vm1, %v3183_v17 }
  0x91   : > { %2459 = vmatmul.msk.f32.gmra.mxu0 %vm288_vm1, %v3195_v19  ;;  %2492 = vmatmul.msk.f32.gmra.mxu1 %vm288_vm1, %v3195_v19 }
  0x96   : > { %v3206_v21 = vpop.f32.mrf.mxu0  ;;  %v3208_v22 = vpop.f32.mrf.mxu1 }
  0x97   : > { %v3326_v63 = vadd.f32 %v3320_v60, %v3206_v21 }
  0x99   : > { %2460 = vmatmul.msk.f32.gmra.mxu0 %vm288_vm1, %v3211_v23  ;;  %2493 = vmatmul.msk.f32.gmra.mxu1 %vm288_vm1, %v3211_v23  ;;  %v502_v1 = vsel %vm288_vm1, %v3326_v63, 0.0 }
  0x9e   : > { %v3222_v25 = vpop.f32.mrf.mxu0  ;;  %v3224_v26 = vpop.f32.mrf.mxu1 }
  0x9f   : > { %v3330_v0 = vadd.f32 %v3320_v60, %v3222_v25 }
  0xa1   : > { %2461 = vmatmul.msk.f32.gmra.mxu0 %vm288_vm1, %v3227_v27  ;;  %2494 = vmatmul.msk.f32.gmra.mxu1 %vm288_vm1, %v3227_v27 }
  0xa6   : > { %v412_v29 = vpop.f32.mrf.mxu0  ;;  %v3238_v30 = vpop.f32.mrf.mxu1 }
  0xa9   : > { %2462 = vmatmul.msk.f32.gmra.mxu0 %vm288_vm1, %v3241_v31  ;;  %2495 = vmatmul.msk.f32.gmra.mxu1 %vm288_vm1, %v3241_v31 }
  0xae   : > { %v415_v32 = vpop.f32.mrf.mxu0  ;;  %v3249_v33 = vpop.f32.mrf.mxu1 }
  0xb1   : > { %2463 = vmatmul.msk.f32.gmra.mxu0 %vm288_vm1, %v3252_v34  ;;  %2496 = vmatmul.msk.f32.gmra.mxu1 %vm288_vm1, %v3252_v34 }
  0xb6   : > { %v418_v35 = vpop.f32.mrf.mxu0  ;;  %v3260_v36 = vpop.f32.mrf.mxu1 }
  0xb7   : > { %v3349_v34 = vadd.f32 %v3320_v60, %v418_v35 }
  0xb9   : > { %2464 = vmatmul.msk.f32.gmra.mxu0 %vm288_vm1, %v3263_v37  ;;  %2497 = vmatmul.msk.f32.gmra.mxu1 %vm288_vm1, %v3263_v37 }
  0xbe   : > { %v421_v38 = vpop.f32.mrf.mxu0  ;;  %v3271_v39 = vpop.f32.mrf.mxu1 }
  0xc1   : > { %2465 = vmatmul.msk.f32.gmra.mxu0 %vm288_vm1, %v3274_v40  ;;  %2498 = vmatmul.msk.f32.gmra.mxu1 %vm288_vm1, %v3274_v40  ;;  %v3344_v40 = vadd.f32 %v3320_v60, %v415_v32 }
  0xc3   : > { %v507_v37 = vsel %vm288_vm1, %v3344_v40, 0.0 }
  0xc6   : > { %v424_v41 = vpop.f32.mrf.mxu0  ;;  %v3282_v42 = vpop.f32.mrf.mxu1 }
  0xc9   : > { %2466 = vmatmul.msk.f32.gmra.mxu0 %vm288_vm1, %v275_v43  ;;  %2499 = vmatmul.msk.f32.gmra.mxu1 %vm288_vm1, %v275_v43  ;;  %v503_v43 = vsel %vm288_vm1, %v3330_v0, 0.0 }
  0xce   : > { %v427_v44 = vpop.f32.mrf.mxu0  ;;  %v3289_v45 = vpop.f32.mrf.mxu1 }
  0xd1   : > { %2467 = vmatmul.msk.f32.gmra.mxu0 %vm288_vm1, %v276_v46  ;;  %2500 = vmatmul.msk.f32.gmra.mxu1 %vm288_vm1, %v276_v46  ;;  %v3337_v46 = vadd.f32 %v3320_v60, %v412_v29 }
  0xd3   : > { %v505_v21 = vsel %vm288_vm1, %v3337_v46, 0.0 }
  0xd6   : > { %v430_v47 = vpop.f32.mrf.mxu0  ;;  %v3294_v48 = vpop.f32.mrf.mxu1 }
  0xd9   : > { %2468 = vmatmul.msk.f32.gmra.mxu0 %vm288_vm1, %v277_v49  ;;  %2501 = vmatmul.msk.f32.gmra.mxu1 %vm288_vm1, %v277_v49  ;;  %v504_v49 = vadd.f32 %v503_v43, %v502_v1  ;;  %v509_v1 = vsel %vm288_vm1, %v3349_v34, 0.0  ;;  %v3356_v43 = vadd.f32 %v3320_v60, %v421_v38  ;;  %v3373_v38 = vadd.f32 %v3320_v60, %v430_v47 }
  0xdb   : > { %v506_v25 = vadd.f32 %v505_v21, %v504_v49  ;;  %v511_v32 = vsel %vm288_vm1, %v3356_v43, 0.0  ;;  %v3361_v49 = vadd.f32 %v3320_v60, %v424_v41  ;;  %4508 = vst [vmem:[#allocation23_spill] sm:$0xff] %v3373_v38 }
  0xdd   : > { %v508_v31 = vadd.f32 %v507_v37, %v506_v25  ;;  %v513_v37 = vsel %vm288_vm1, %v3361_v49, 0.0  ;;  %v3368_v25 = vadd.f32 %v3320_v60, %v427_v44 }
  0xde   : > { %v433_v50 = vpop.f32.mrf.mxu0  ;;  %v3299_v51 = vpop.f32.mrf.mxu1 }
  0xdf   : > { %v510_v23 = vadd.f32 %v509_v1, %v508_v31  ;;  %v515_v31 = vsel %vm288_vm1, %v3368_v25, 0.0 }
  0xe1   : > { %2469 = vmatmul.msk.f32.gmra.mxu0 %vm288_vm1, %v278_v52  ;;  %2502 = vmatmul.msk.f32.gmra.mxu1 %vm288_vm1, %v278_v52  ;;  %v512_v21 = vadd.f32 %v511_v32, %v510_v23  ;;  %v517_v23 = vsel %vm288_vm1, %v3373_v38, 0.0  ;;  %v3380_v32 = vadd.f32 %v3320_v60, %v433_v50 }
  0xe3   : > { %v514_v17 = vadd.f32 %v513_v37, %v512_v21  ;;  %4509 = vst [vmem:[#allocation24_spill] sm:$0xff] %v3380_v32  ;;  %v519_v44 = vsel %vm288_vm1, %v3380_v32, 0.0 }
  0xe5   : > { %v516_v1 = vadd.f32 %v515_v31, %v514_v17 }
  0xe6   : > { %v436_v53 = vpop.f32.mrf.mxu0  ;;  %v3304_v54 = vpop.f32.mrf.mxu1 }
  0xe7   : > { %v518_v14 = vadd.f32 %v517_v23, %v516_v1  ;;  %v3385_v21 = vadd.f32 %v3320_v60, %v436_v53  ;;  %v3399_v23 = vpop.f32.mrf.mxu3 }
  0xe9   : > { %2470 = vmatmul.msk.f32.gmra.mxu0 %vm288_vm1, %v3307_v55  ;;  %2503 = vmatmul.msk.f32.gmra.mxu1 %vm288_vm1, %v3307_v55  ;;  %4510 = vst [vmem:[#allocation25_spill] sm:$0xff] %v3385_v21  ;;  %v520_v37 = vadd.f32 %v519_v44, %v518_v14  ;;  %v521_v17 = vsel %vm288_vm1, %v3385_v21, 0.0 }
  0xeb   : > { %v522_v12 = vadd.f32 %v521_v17, %v520_v37 }
  0xee   : > { %v439_v56 = vpop.f32.mrf.mxu0  ;;  %v3313_v57 = vpop.f32.mrf.mxu1 }
  0xef   : > { %v3392_v31 = vadd.f32 %v3320_v60, %v439_v56 }
  0xf1   : > { %4511 = vst [vmem:[#allocation26_spill] sm:$0xff] %v3392_v31  ;;  %v523_v50 = vsel %vm288_vm1, %v3392_v31, 0.0 }
  0xf2   : > { %v524_v53 = vadd.f32 %v523_v50, %v522_v12 }
  0xf6   : > { %v442_v58 = vpop.f32.mrf.mxu0  ;;  %v3315_v59 = vpop.f32.mrf.mxu1 }
  0xf7   : > { %v3397_v1 = vadd.f32 %v3320_v60, %v442_v58  ;;  %v3413_v58 = vpop.f32.mrf.mxu3 }
  0xf9   : > { %4512 = vst [vmem:[#allocation27_spill] sm:$0xff] %v3397_v1  ;;  %v525_v11 = vsel %vm288_vm1, %v3397_v1, 0.0 }
  0xfa   : > { %v526_v56 = vadd.f32 %v525_v11, %v524_v53 }
  0xfe   : > { %v445_v61 = vpop.f32.mrf.mxu0  ;;  %v3322_v62 = vpop.f32.mrf.mxu1 }
  0xff   : > { %v3406_v10 = vadd.f32 %v3320_v60, %v445_v61  ;;  %v3432_v21 = vpop.f32.mrf.mxu3 }
 0x101   : > { %4513 = vst [vmem:[#allocation28_spill] sm:$0xff] %v3406_v10  ;;  %v527_v37 = vsel %vm288_vm1, %v3406_v10, 0.0 }
 0x102   : > { %v528_v31 = vadd.f32 %v527_v37, %v526_v56 }
 0x106   : > { %v448_v52 = vpop.f32.mrf.mxu0  ;;  %v3339_v55 = vpop.f32.mrf.mxu1 }
 0x107   : > { %v3411_v17 = vadd.f32 %v3320_v60, %v448_v52  ;;  %v3477_v38 = vpop.f32.mrf.mxu3 }
 0x109   : > { %4514 = vst [vmem:[#allocation29_spill] sm:$0xff] %v3411_v17  ;;  %v529_v9 = vsel %vm288_vm1, %v3411_v17, 0.0 }
 0x10a   : > { %v530_v61 = vadd.f32 %v529_v9, %v528_v31  ;;  %v3439_v9 = vld [vmem:[%s4453_s4 + $0x1] ss:$0 sm:$0xff] }
 0x10e   : > { %v451_v29 = vpop.f32.mrf.mxu0  ;;  %v3351_v27 = vpop.f32.mrf.mxu1 }
 0x10f   : > { %v3420_v1 = vadd.f32 %v3320_v60, %v451_v29  ;;  %v3443_v29 = vadd.f32 %v3439_v9, %v3224_v26  ;;  %v3462_v26 = vadd.f32 %v3439_v9, %v3249_v33 }
 0x111   : > { %v531_v11 = vsel %vm288_vm1, %v3420_v1, 0.0  ;;  %4516 = vst [vmem:[#allocation31_spill] sm:$0xff] %v3443_v29  ;;  %v821_v32 = vsel %vm288_vm1, %v3443_v29, 0.0  ;;  %v3475_v29 = vadd.f32 %v3439_v9, %v3260_v36 }
 0x112   : > { %v532_v52 = vadd.f32 %v531_v11, %v530_v61  ;;  %v3452_v61 = vadd.f32 %v3439_v9, %v3208_v22  ;;  %v3456_v11 = vadd.f32 %v3439_v9, %v3238_v30  ;;  %4520 = vst [vmem:[#allocation35_spill] sm:$0xff] %v3462_v26 }
 0x113   : > { %4521 = vst [vmem:[#allocation36_spill] sm:$0xff] %v3475_v29 }
 0x114   : > { %4518 = vst [vmem:[#allocation33_spill] sm:$0xff] %v3452_v61  ;;  %v820_v22 = vsel %vm288_vm1, %v3452_v61, 0.0  ;;  %v823_v30 = vsel %vm288_vm1, %v3456_v11, 0.0 }
 0x115   : > { %4519 = vst [vmem:[#allocation34_spill] sm:$0xff] %v3456_v11  ;;  %v822_v33 = vadd.f32 %v821_v32, %v820_v22  ;;  %v827_v32 = vsel %vm288_vm1, %v3475_v29, 0.0  ;;  %v3496_v22 = vadd.f32 %v3439_v9, %v3282_v42 }
 0x116   : > { %v454_v35 = vpop.f32.mrf.mxu0  ;;  %v3363_v19 = vpop.f32.mrf.mxu1 }
 0x117   : > { %v3425_v53 = vadd.f32 %v3320_v60, %v454_v35  ;;  %4522 = vst [vmem:[#allocation37_spill] sm:$0xff] %v3496_v22  ;;  %v831_v42 = vsel %vm288_vm1, %v3496_v22, 0.0  ;;  %v3526_v22 = vpop.f32.mrf.mxu3 }
 0x119   : > { %v533_v56 = vsel %vm288_vm1, %v3425_v53, 0.0 }
 0x11a   : > { %v534_v35 = vadd.f32 %v533_v56, %v532_v52 }
 0x11e   : > { %v457_v41 = vpop.f32.mrf.mxu0  ;;  %v3375_v15 = vpop.f32.mrf.mxu1 }
 0x11f   : > { %v3430_v37 = vadd.f32 %v3320_v60, %v457_v41 }
 0x121   : > { %4515 = vst [vmem:[#allocation30_spill] sm:$0xff] %v3430_v37  ;;  %v535_v31 = vsel %vm288_vm1, %v3430_v37, 0.0 }
 0x122   : > { %v536_v52 = vadd.f32 %v535_v31, %v534_v35  ;;  %v825_v31 = vsel %vm288_vm1, %v3462_v26, 0.0 }
 0x126   : > { %v460_v47 = vpop.f32.mrf.mxu0  ;;  %v3387_v13 = vpop.f32.mrf.mxu1 }
 0x127   : > { %v3448_v41 = vadd.f32 %v3320_v60, %v460_v47 }
 0x129   : > { %4517 = vst [vmem:[#allocation32_spill] sm:$0xff] %v3448_v41  ;;  %v537_v47 = vsel %vm288_vm1, %v3448_v41, 0.0  ;;  %v824_v41 = vadd.f32 %v823_v30, %v822_v33 }
 0x12a   : > { %v538_v61 = vadd.f32 %v537_v47, %v536_v52  ;;  %v3502_v52 = vadd.f32 %v3439_v9, %v3289_v45 }
 0x12b   : > { %v826_v26 = vadd.f32 %v825_v31, %v824_v41  ;;  %v3513_v41 = vadd.f32 %v3439_v9, %v3294_v48 }
 0x12c   : > { %4523 = vst [vmem:[#allocation38_spill] sm:$0xff] %v3502_v52  ;;  %v833_v45 = vsel %vm288_vm1, %v3502_v52, 0.0 }
 0x12d   : > { %v828_v33 = vadd.f32 %v827_v32, %v826_v26  ;;  %4524 = vst [vmem:[#allocation39_spill] sm:$0xff] %v3513_v41 }
 0x12e   : > { %v463_v14 = vpop.f32.mrf.mxu0  ;;  %v3401_v44 = vpop.f32.mrf.mxu1 }
 0x12f   : > { %v3467_v37 = vadd.f32 %v3320_v60, %v463_v14  ;;  %v3485_v14 = vadd.f32 %v3439_v9, %v3271_v39 }
 0x131   : > { %v539_v11 = vsel %vm288_vm1, %v3467_v37, 0.0  ;;  %v829_v39 = vsel %vm288_vm1, %v3485_v14, 0.0 }
 0x132   : > { %v540_v47 = vadd.f32 %v539_v11, %v538_v61  ;;  %v830_v31 = vadd.f32 %v829_v39, %v828_v33  ;;  %v3519_v61 = vadd.f32 %v3439_v9, %v3299_v51  ;;  %v835_v39 = vsel %vm288_vm1, %v3513_v41, 0.0 }
 0x133   : > { %v3534_v33 = vadd.f32 %v3439_v9, %v3304_v54 }
 0x134   : > { %v832_v26 = vadd.f32 %v831_v42, %v830_v31 }
 0x135   : > { %v839_v54 = vsel %vm288_vm1, %v3534_v33, 0.0 }
 0x136   : > { %v466_v12 = vpop.f32.mrf.mxu0  ;;  %v3415_v50 = vpop.f32.mrf.mxu1  ;;  %v834_v51 = vadd.f32 %v833_v45, %v832_v26  ;;  %v3551_v45 = vadd.f32 %v3439_v9, %v3315_v59 }
 0x137   : > { %v3490_v36 = vadd.f32 %v3320_v60, %v466_v12 }
 0x138   : > { %v836_v31 = vadd.f32 %v835_v39, %v834_v51  ;;  %4525 = vst [vmem:[#allocation40_spill] sm:$0xff] %v3551_v45 }
 0x139   : > { %v541_v12 = vsel %vm288_vm1, %v3490_v36, 0.0 }
 0x13a   : > { %v542_v11 = vadd.f32 %v541_v12, %v540_v47  ;;  %v837_v47 = vsel %vm288_vm1, %v3519_v61, 0.0  ;;  %v3540_v12 = vadd.f32 %v3439_v9, %v3313_v57  ;;  %v996_v57 = vld [vmem:[%s4452_s3] sm:$0xf] }
 0x13b   : > { %v838_v26 = vadd.f32 %v837_v47, %v836_v31  ;;  %2509 = vmatpush.msk.msra.mxu2 %vm385_vm0, %v996_v57  ;;  %2767 = vmatpush.msk.msra.mxu3 %vm385_vm0, %v996_v57 }
 0x13c   : > { %2510 = vmatmul.msk.f32.vlgmr.msra.gmra.mxu2 %vm288_vm1, %v3076_v2  ;;  %2537 = vmatmul.msk.f32.vlgmr.msra.gmra.mxu3 %vm288_vm1, %v3178_v16  ;;  %v3585_v2 = vadd.f32 %v3439_v9, %v3351_v27 }
 0x13d   : > { %v840_v39 = vadd.f32 %v839_v54, %v838_v26 }
 0x13e   : > { %v469_v10 = vpop.f32.mrf.mxu0  ;;  %v3434_v17 = vpop.f32.mrf.mxu1  ;;  %v849_v27 = vsel %vm288_vm1, %v3585_v2, 0.0 }
 0x13f   : > { %v3507_v29 = vadd.f32 %v3320_v60, %v469_v10 }
 0x141   : > { %v543_v10 = vsel %vm288_vm1, %v3507_v29, 0.0 }
 0x144   : > { %2511 = vmatmul.msk.f32.gmra.mxu2 %vm288_vm1, %v3087_v3  ;;  %2538 = vmatmul.msk.f32.gmra.mxu3 %vm288_vm1, %v3190_v18  ;;  %v3624_v18 = vadd.f32 %v3320_v60, %v3399_v23 }
 0x146   : > { %v472_v56 = vpop.f32.mrf.mxu0  ;;  %v3479_v35 = vpop.f32.mrf.mxu1 }
 0x147   : > { %v3524_v32 = vadd.f32 %v3320_v60, %v472_v56  ;;  %v544_v56 = vadd.f32 %v543_v10, %v542_v11  ;;  %v841_v11 = vsel %vm288_vm1, %v3540_v12, 0.0  ;;  %v3560_v10 = vadd.f32 %v3439_v9, %v3322_v62 }
 0x148   : > { %v843_v62 = vsel %vm288_vm1, %v3551_v45, 0.0  ;;  %v842_v47 = vadd.f32 %v841_v11, %v840_v39  ;;  %v3596_v39 = vadd.f32 %v3439_v9, %v3363_v19 }
 0x149   : > { %v545_v52 = vsel %vm288_vm1, %v3524_v32, 0.0  ;;  %4526 = vst [vmem:[#allocation41_spill] sm:$0xff] %v3560_v10 }
 0x14a   : > { %v844_v26 = vadd.f32 %v843_v62, %v842_v47  ;;  %v851_v19 = vsel %vm288_vm1, %v3596_v39, 0.0 }
 0x14c   : > { %2512 = vmatmul.msk.f32.gmra.mxu2 %vm288_vm1, %v3094_v4  ;;  %2539 = vmatmul.msk.f32.gmra.mxu3 %vm288_vm1, %v3202_v20 }
 0x14e   : > { %v475_v30 = vpop.f32.mrf.mxu0  ;;  %v3528_v48 = vpop.f32.mrf.mxu1 }
 0x14f   : > { %v3545_v41 = vadd.f32 %v3320_v60, %v475_v30  ;;  %v546_v30 = vadd.f32 %v545_v52, %v544_v56  ;;  %v3577_v52 = vadd.f32 %v3439_v9, %v3339_v55  ;;  %v3579_v56 = vpop.f32.mrf.mxu3  ;;  %v3673_v20 = vadd.f32 %v3439_v9, %v3528_v48 }
 0x151   : > { %v547_v59 = vsel %vm288_vm1, %v3545_v41, 0.0  ;;  %v847_v11 = vsel %vm288_vm1, %v3577_v52, 0.0 }
 0x152   : > { %v548_v54 = vadd.f32 %v547_v59, %v546_v30  ;;  %v3602_v30 = vadd.f32 %v3439_v9, %v3375_v15 }
 0x154   : > { %2513 = vmatmul.msk.f32.gmra.mxu2 %vm288_vm1, %v3101_v5  ;;  %2540 = vmatmul.msk.f32.gmra.mxu3 %vm288_vm1, %v3218_v24  ;;  %v3710_v24 = vadd.f32 %v3439_v9, %v3579_v56 }
 0x156   : > { %v478_v42 = vpop.f32.mrf.mxu0  ;;  %v796_v31 = vpop.f32.mrf.mxu1 }
 0x157   : > { %v3567_v51 = vadd.f32 %v3320_v60, %v478_v42  ;;  %v845_v42 = vsel %vm288_vm1, %v3560_v10, 0.0 }
 0x158   : > { %v846_v10 = vadd.f32 %v845_v42, %v844_v26  ;;  %v3614_v42 = vadd.f32 %v3439_v9, %v3387_v13 }
 0x159   : > { %v549_v57 = vsel %vm288_vm1, %v3567_v51, 0.0 }
 0x15a   : > { %v550_v59 = vadd.f32 %v549_v57, %v548_v54  ;;  %v848_v62 = vadd.f32 %v847_v11, %v846_v10  ;;  %v853_v10 = vsel %vm288_vm1, %v3602_v30, 0.0  ;;  %v3620_v54 = vadd.f32 %v3439_v9, %v3401_v44  ;;  %v808_v57 = vpop.f32.mrf.mxu3 }
 0x15c   : > { %v850_v15 = vadd.f32 %v849_v27, %v848_v62  ;;  %v855_v27 = vsel %vm288_vm1, %v3614_v42, 0.0  ;;  %v3633_v62 = vadd.f32 %v3439_v9, %v3415_v50  ;;  %v555_v50 = vsel %vm288_vm1, %v3624_v18, 0.0  ;;  %2514 = vmatmul.msk.f32.gmra.mxu2 %vm288_vm1, %v3108_v6  ;;  %2541 = vmatmul.msk.f32.gmra.mxu3 %vm288_vm1, %v3234_v28 }
 0x15e   : > { %v481_v16 = vpop.f32.mrf.mxu0  ;;  %v852_v26 = vadd.f32 %v851_v19, %v850_v15  ;;  %v799_v11 = vpop.f32.mrf.mxu1  ;;  %v3645_v19 = vadd.f32 %v3439_v9, %v3434_v17  ;;  %v3661_v17 = vadd.f32 %v3439_v9, %v3479_v35 }
 0x15f   : > { %v3590_v55 = vadd.f32 %v3320_v60, %v481_v16 }
 0x160   : > { %v854_v44 = vadd.f32 %v853_v10, %v852_v26  ;;  %v3651_v10 = vadd.f32 %v3320_v60, %v3432_v21  ;;  %v3667_v21 = vadd.f32 %v3320_v60, %v3477_v38  ;;  %v861_v4 = vsel %vm288_vm1, %v3645_v19, 0.0 }
 0x161   : > { %v551_v47 = vsel %vm288_vm1, %v3590_v55, 0.0  ;;  %v863_v38 = vsel %vm288_vm1, %v3661_v17, 0.0 }
 0x162   : > { %v552_v16 = vadd.f32 %v551_v47, %v550_v59  ;;  %v3637_v59 = vadd.f32 %v3320_v60, %v3413_v58  ;;  %v857_v47 = vsel %vm288_vm1, %v3620_v54, 0.0  ;;  %v859_v58 = vsel %vm288_vm1, %v3633_v62, 0.0 }
 0x163   : > { %v559_v35 = vsel %vm288_vm1, %v3651_v10, 0.0  ;;  %v561_v48 = vsel %vm288_vm1, %v3667_v21, 0.0 }
 0x164   : > { %2515 = vmatmul.msk.f32.gmra.mxu2 %vm288_vm1, %v3115_v7 }
 0x166   : > { %v484_v3 = vpop.f32.mrf.mxu0 }
 0x167   : > { %v3627_v13 = vadd.f32 %v3320_v60, %v484_v3  ;;  %v856_v3 = vadd.f32 %v855_v27, %v854_v44  ;;  %v557_v27 = vsel %vm288_vm1, %v3637_v59, 0.0 }
 0x169   : > { %v553_v23 = vsel %vm288_vm1, %v3627_v13, 0.0  ;;  %v858_v26 = vadd.f32 %v857_v47, %v856_v3  ;;  %v3679_v47 = vadd.f32 %v3320_v60, %v3526_v22 }
 0x16a   : > { %v554_v15 = vadd.f32 %v553_v23, %v552_v16 }
 0x16b   : > { %v860_v23 = vadd.f32 %v859_v58, %v858_v26  ;;  %v802_v58 = vpop.f32.mrf.mxu1  ;;  %v865_v26 = vsel %vm288_vm1, %v3673_v20, 0.0  ;;  %v563_v45 = vsel %vm288_vm1, %v3679_v47, 0.0 }
 0x16c   : > { %v556_v16 = vadd.f32 %v555_v50, %v554_v15  ;;  %v3684_v15 = vadd.f32 %v3439_v9, %v796_v31  ;;  %2516 = vmatmul.msk.f32.gmra.mxu2 %vm288_vm1, %v3122_v8 }
 0x16d   : > { %v862_v50 = vadd.f32 %v861_v4, %v860_v23 }
 0x16e   : > { %v558_v44 = vadd.f32 %v557_v27, %v556_v16  ;;  %v811_v16 = vpop.f32.mrf.mxu3  ;;  %v3691_v27 = vadd.f32 %v3439_v9, %v799_v11  ;;  %v867_v31 = vsel %vm288_vm1, %v3684_v15, 0.0 }
 0x16f   : > { %v864_v22 = vadd.f32 %v863_v38, %v862_v50 }
 0x170   : > { %v560_v3 = vadd.f32 %v559_v35, %v558_v44  ;;  %v3702_v44 = vadd.f32 %v3439_v9, %v802_v58  ;;  %v869_v23 = vsel %vm288_vm1, %v3691_v27, 0.0 }
 0x171   : > { %v866_v11 = vadd.f32 %v865_v26, %v864_v22  ;;  %v873_v26 = vsel %vm288_vm1, %v3710_v24, 0.0  ;;  %v3719_v22 = vadd.f32 %v3439_v9, %v808_v57 }
 0x172   : > { %v562_v60 = vadd.f32 %v561_v48, %v560_v3  ;;  %v871_v5 = vsel %vm288_vm1, %v3702_v44, 0.0 }
 0x173   : > { %v868_v38 = vadd.f32 %v867_v31, %v866_v11  ;;  %4527 = vst [vmem:[#allocation42_spill] sm:$0xff] %v3719_v22  ;;  %v875_v11 = vsel %vm288_vm1, %v3719_v22, 0.0 }
 0x174   : > { %v564_v4 = vadd.f32 %v563_v45, %v562_v60 }
 0x175   : > { %v870_v50 = vadd.f32 %v869_v23, %v868_v38  ;;  %v3724_v23 = vadd.f32 %v3439_v9, %v811_v16 }
 0x176   : > { %v565_v35 = vrot.slane %v564_v4, 4  ;;  %v814_v60 = vpop.f32.mrf.mxu3 }
 0x177   : > { %v872_v45 = vadd.f32 %v871_v5, %v870_v50  ;;  %4528 = vst [vmem:[#allocation43_spill] sm:$0xff] %v3724_v23  ;;  %v877_v57 = vsel %vm288_vm1, %v3724_v23, 0.0  ;;  %v3733_v38 = vadd.f32 %v3439_v9, %v814_v60 }
 0x178   : > { %v566_v3 = vadd.f32 %v565_v35, %v564_v4 }
 0x179   : > { %v874_v4 = vadd.f32 %v873_v26, %v872_v45  ;;  %v879_v7 = vsel %vm288_vm1, %v3733_v38, 0.0 }
 0x17a   : > { %v567_v48 = vrot.slane %v566_v3, 2 }
 0x17b   : > { %v876_v35 = vadd.f32 %v875_v11, %v874_v4 }
 0x17c   : > { %v568_v58 = vadd.f32 %v567_v48, %v566_v3  ;;  %v4534_v3 = vld [vmem:[#allocation27_spill] sm:$0xff] }
 0x17d   : > { %v878_v5 = vadd.f32 %v877_v57, %v876_v35 }
 0x17e   : > { %v569_v31 = vrot.slane %v568_v58, 1  ;;  %v817_v28 = vpop.f32.mrf.mxu3 }
 0x17f   : > { %v3740_v50 = vadd.f32 %v3439_v9, %v817_v28  ;;  %v880_v48 = vadd.f32 %v879_v7, %v878_v5  ;;  %v4529_v28 = vld [vmem:[#allocation23_spill] sm:$0xff] }
 0x180   : > { %v570_v56 = vadd.f32 %v569_v31, %v568_v58 }
 0x181   : > { %v881_v9 = vsel %vm288_vm1, %v3740_v50, 0.0 }
 0x182   : > { %v3726_v6 = vmul.f32 0.00390625, %v570_v56  ;;  %v882_v4 = vadd.f32 %v881_v9, %v880_v48 }
 0x184   : > { %v572_v45 = vsub.f32 %v3326_v63, %v3726_v6  ;;  %v573_v60 = vsub.f32 %v3330_v0, %v3726_v6  ;;  %v574_v58 = vsub.f32 %v3337_v46, %v3726_v6  ;;  %v575_v26 = vsub.f32 %v3344_v40, %v3726_v6 }
 0x185   : > { %v576_v31 = vsub.f32 %v3349_v34, %v3726_v6  ;;  %v577_v8 = vsub.f32 %v3356_v43, %v3726_v6  ;;  %v578_v63 = vsub.f32 %v3361_v49, %v3726_v6  ;;  %v579_v46 = vsub.f32 %v3368_v25, %v3726_v6  ;;  %v4530_v34 = vld [vmem:[#allocation24_spill] sm:$0xff]  ;;  %v4531_v43 = vld [vmem:[#allocation25_spill] sm:$0xff] }
 0x186   : > { %v604_v0 = vmul.f32 0.5, %v572_v45  ;;  %v605_v56 = vmul.f32 0.5, %v573_v60  ;;  %v606_v11 = vmul.f32 0.5, %v574_v58  ;;  %v607_v35 = vmul.f32 0.5, %v575_v26  ;;  %v4532_v45 = vld [vmem:[#allocation7_spill] sm:$0xff]  ;;  %v4533_v26 = vld [vmem:[#allocation26_spill] sm:$0xff] }
 0x187   : > { %v580_v40 = vsub.f32 %v4529_v28, %v3726_v6  ;;  %v608_v57 = vmul.f32 0.5, %v576_v31  ;;  %v581_v5 = vsub.f32 %v4530_v34, %v3726_v6  ;;  %v582_v7 = vsub.f32 %v4531_v43, %v3726_v6  ;;  %2517 = vmatmul.msk.f32.gmra.mxu2 %vm288_vm1, %v4532_v45 }
 0x188   : > { %v609_v48 = vmul.f32 0.5, %v577_v8  ;;  %v883_v49 = vrot.slane %v882_v4, 4  ;;  %v610_v60 = vmul.f32 0.5, %v578_v63  ;;  %v636_v58 = vpack.c.bf16 %v604_v0, %v604_v0  ;;  %v4535_v8 = vld [vmem:[#allocation28_spill] sm:$0xff]  ;;  %v4536_v0 = vld [vmem:[#allocation29_spill] sm:$0xff] }
 0x189   : > { %v637_v25 = vpack.c.bf16 %v605_v56, %v605_v56  ;;  %v638_v9 = vpack.c.bf16 %v606_v11, %v606_v11  ;;  %v583_v28 = vsub.f32 %v4533_v26, %v3726_v6  ;;  %v611_v31 = vmul.f32 0.5, %v579_v46 }
 0x18a   : > { %v639_v16 = vpack.c.bf16 %v607_v35, %v607_v35  ;;  %v584_v34 = vsub.f32 %v4534_v3, %v3726_v6  ;;  %v612_v23 = vmul.f32 0.5, %v580_v40  ;;  %v640_v22 = vpack.c.bf16 %v608_v57, %v608_v57  ;;  %669 = vst.msk [vmem:[#allocation2] sm:$0xf] %vm668_vm2, %v636_v58 }
 0x18b   : > { %v585_v43 = vsub.f32 %v4535_v8, %v3726_v6  ;;  %v613_v45 = vmul.f32 0.5, %v581_v5  ;;  %v641_v63 = vpack.c.bf16 %v609_v48, %v609_v48  ;;  %670 = vst.msk [vmem:[#allocation2 + $0x4] sm:$0xf] %vm668_vm2, %v637_v25  ;;  %v586_v56 = vsub.f32 %v4536_v0, %v3726_v6  ;;  %v4537_v5 = vld [vmem:[#allocation30_spill] sm:$0xff] }
 0x18c   : > { %v614_v11 = vmul.f32 0.5, %v582_v7  ;;  %v642_v46 = vpack.c.bf16 %v610_v60, %v610_v60  ;;  %671 = vst.msk [vmem:[#allocation2 + $0x8] sm:$0xf] %vm668_vm2, %v638_v9  ;;  %v884_v35 = vadd.f32 %v883_v49, %v882_v4  ;;  %v615_v3 = vmul.f32 0.5, %v583_v28  ;;  %v4538_v7 = vld [vmem:[#allocation32_spill] sm:$0xff] }
 0x18d   : > { %v643_v40 = vpack.c.bf16 %v611_v31, %v611_v31  ;;  %672 = vst.msk [vmem:[#allocation2 + $0xc] sm:$0xf] %vm668_vm2, %v639_v16  ;;  %v616_v57 = vmul.f32 0.5, %v584_v34  ;;  %v644_v58 = vpack.c.bf16 %v612_v23, %v612_v23  ;;  %v589_v48 = vsub.f32 %v4537_v5, %v3726_v6  ;;  %v4539_v16 = vld [vmem:[#allocation8_spill] sm:$0xff] }
 0x18e   : > { %673 = vst.msk [vmem:[#allocation2 + $0x10] sm:$0xf] %vm668_vm2, %v640_v22  ;;  %v617_v25 = vmul.f32 0.5, %v585_v43  ;;  %v645_v26 = vpack.c.bf16 %v613_v45, %v613_v45  ;;  %v590_v60 = vsub.f32 %v4538_v7, %v3726_v6  ;;  %v618_v9 = vmul.f32 0.5, %v586_v56  ;;  %v4542_v7 = vld [vmem:[#allocation9_spill] sm:$0xff] }
 0x18f   : > { %674 = vst.msk [vmem:[#allocation2 + $0x14] sm:$0xf] %vm668_vm2, %v641_v63  ;;  %v646_v4 = vpack.c.bf16 %v614_v11, %v614_v11  ;;  %v885_v49 = vrot.slane %v884_v35, 2  ;;  %2518 = vmatmul.msk.f32.gmra.mxu2 %vm288_vm1, %v4539_v16  ;;  %v591_v22 = vsub.f32 %v3467_v37, %v3726_v6  ;;  %v4540_v23 = vsub.f32 %v3420_v1, %v3726_v6 }
 0x190   : > { %675 = vst.msk [vmem:[#allocation2 + $0x18] sm:$0xf] %vm668_vm2, %v642_v46  ;;  %v647_v31 = vpack.c.bf16 %v615_v3, %v615_v3  ;;  %v592_v34 = vsub.f32 %v3490_v36, %v3726_v6  ;;  %v4541_v8 = vsub.f32 %v3425_v53, %v3726_v6  ;;  %v648_v45 = vpack.c.bf16 %v616_v57, %v616_v57 }
 0x191   : > { %v619_v28 = vmul.f32 0.5, %v4540_v23  ;;  %676 = vst.msk [vmem:[#allocation2 + $0x1c] sm:$0xf] %vm668_vm2, %v643_v40  ;;  %v886_v63 = vadd.f32 %v885_v49, %v884_v35  ;;  %v593_v37 = vsub.f32 %v3507_v29, %v3726_v6  ;;  %v621_v0 = vmul.f32 0.5, %v589_v48 }
 0x192   : > { %v620_v43 = vmul.f32 0.5, %v4541_v8  ;;  %677 = vst.msk [vmem:[#allocation2 + $0x20] sm:$0xf] %vm668_vm2, %v644_v58  ;;  %v649_v1 = vpack.c.bf16 %v617_v25, %v617_v25  ;;  %v594_v56 = vsub.f32 %v3524_v32, %v3726_v6  ;;  %v622_v11 = vmul.f32 0.5, %v590_v60 }
 0x193   : > { %678 = vst.msk [vmem:[#allocation2 + $0x24] sm:$0xf] %vm668_vm2, %v645_v26  ;;  %v650_v36 = vpack.c.bf16 %v618_v9, %v618_v9  ;;  %v887_v53 = vrot.slane %v886_v63, 1  ;;  %v595_v46 = vsub.f32 %v3545_v41, %v3726_v6  ;;  %v623_v3 = vmul.f32 0.5, %v591_v22 }
 0x194   : > { %679 = vst.msk [vmem:[#allocation2 + $0x28] sm:$0xf] %vm668_vm2, %v646_v4  ;;  %v651_v35 = vpack.c.bf16 %v619_v28, %v619_v28  ;;  %v596_v29 = vsub.f32 %v3567_v51, %v3726_v6  ;;  %v624_v40 = vmul.f32 0.5, %v592_v34  ;;  %v652_v57 = vpack.c.bf16 %v620_v43, %v620_v43 }
 0x195   : > { %680 = vst.msk [vmem:[#allocation2 + $0x2c] sm:$0xf] %vm668_vm2, %v647_v31  ;;  %v888_v32 = vadd.f32 %v887_v53, %v886_v63  ;;  %v597_v58 = vsub.f32 %v3590_v55, %v3726_v6  ;;  %v625_v5 = vmul.f32 0.5, %v593_v37  ;;  %v653_v48 = vpack.c.bf16 %v621_v0, %v621_v0 }
 0x196   : > { %681 = vst.msk [vmem:[#allocation2 + $0x30] sm:$0xf] %vm668_vm2, %v648_v45  ;;  %v598_v41 = vsub.f32 %v3627_v13, %v3726_v6  ;;  %v626_v25 = vmul.f32 0.5, %v594_v56  ;;  %v654_v26 = vpack.c.bf16 %v622_v11, %v622_v11  ;;  %v599_v60 = vsub.f32 %v3624_v18, %v3726_v6 }
 0x197   : > { %682 = vst.msk [vmem:[#allocation2 + $0x34] sm:$0xf] %vm668_vm2, %v649_v1  ;;  %v3823_v51 = vmul.f32 0.00390625, %v888_v32  ;;  %2519 = vmatmul.msk.f32.gmra.mxu2 %vm288_vm1, %v4542_v7  ;;  %v627_v55 = vmul.f32 0.5, %v595_v46  ;;  %v655_v9 = vpack.c.bf16 %v623_v3, %v623_v3  ;;  %v600_v4 = vsub.f32 %v3637_v59, %v3726_v6 }
 0x198   : > { %683 = vst.msk [vmem:[#allocation2 + $0x38] sm:$0xf] %vm668_vm2, %v650_v36  ;;  %v628_v13 = vmul.f32 0.5, %v596_v29  ;;  %v656_v49 = vpack.c.bf16 %v624_v40, %v624_v40  ;;  %v601_v22 = vsub.f32 %v3651_v10, %v3726_v6  ;;  %v629_v23 = vmul.f32 0.5, %v597_v58  ;;  %v4543_v36 = vld [vmem:[#allocation33_spill] sm:$0xff]  ;;  %v4544_v40 = vld [vmem:[#allocation10_spill] sm:$0xff] }
 0x199   : > { %684 = vst.msk [vmem:[#allocation2 + $0x3c] sm:$0xf] %vm668_vm2, %v651_v35  ;;  %v921_v16 = vsub.f32 %v3740_v50, %v3823_v51  ;;  %v657_v28 = vpack.c.bf16 %v625_v5, %v625_v5  ;;  %v602_v18 = vsub.f32 %v3667_v21, %v3726_v6  ;;  %v630_v31 = vmul.f32 0.5, %v598_v41  ;;  %v4545_v58 = vld [vmem:[#allocation31_spill] sm:$0xff] }
 0x19a   : > { %685 = vst.msk [vmem:[#allocation2 + $0x40] sm:$0xf] %vm668_vm2, %v652_v57  ;;  %v658_v34 = vpack.c.bf16 %v626_v25, %v626_v25  ;;  %v603_v59 = vsub.f32 %v3679_v47, %v3726_v6  ;;  %v631_v8 = vmul.f32 0.5, %v599_v60  ;;  %v659_v43 = vpack.c.bf16 %v627_v55, %v627_v55  ;;  %v4546_v41 = vld [vmem:[#allocation11_spill] sm:$0xff] }
 0x19b   : > { %686 = vst.msk [vmem:[#allocation2 + $0x44] sm:$0xf] %vm668_vm2, %v653_v48  ;;  %v632_v50 = vmul.f32 0.5, %v600_v4  ;;  %v660_v10 = vpack.c.bf16 %v628_v13, %v628_v13  ;;  %v633_v45 = vmul.f32 0.5, %v601_v22  ;;  %v661_v63 = vpack.c.bf16 %v629_v23, %v629_v23  ;;  %v4549_v55 = vld [vmem:[#allocation35_spill] sm:$0xff] }
 0x19c   : > { %687 = vst.msk [vmem:[#allocation2 + $0x48] sm:$0xf] %vm668_vm2, %v654_v26  ;;  %v916_v21 = vsub.f32 %v3702_v44, %v3823_v51  ;;  %v634_v37 = vmul.f32 0.5, %v602_v18  ;;  %v662_v0 = vpack.c.bf16 %v630_v31, %v630_v31  ;;  %v900_v47 = vsub.f32 %v3534_v33, %v3823_v51  ;;  %v4547_v26 = vld [vmem:[#allocation34_spill] sm:$0xff] }
 0x19d   : > { %688 = vst.msk [vmem:[#allocation2 + $0x4c] sm:$0xf] %vm668_vm2, %v655_v9  ;;  %v920_v1 = vsub.f32 %v3733_v38, %v3823_v51  ;;  %v635_v56 = vmul.f32 0.5, %v603_v59  ;;  %v663_v11 = vpack.c.bf16 %v631_v8, %v631_v8  ;;  %v890_v53 = vsub.f32 %v4543_v36, %v3823_v51  ;;  %v4554_v59 = vld [vmem:[#allocation37_spill] sm:$0xff] }
 0x19e   : > { %689 = vst.msk [vmem:[#allocation2 + $0x50] sm:$0xf] %vm668_vm2, %v656_v49  ;;  %v906_v44 = vsub.f32 %v3596_v39, %v3823_v51  ;;  %v664_v46 = vpack.c.bf16 %v632_v50, %v632_v50  ;;  %v904_v3 = vsub.f32 %v3577_v52, %v3823_v51  ;;  %v905_v33 = vsub.f32 %v3585_v2, %v3823_v51  ;;  %v4550_v49 = vld [vmem:[#allocation13_spill] sm:$0xff] }
 0x19f   : > { %690 = vst.msk [vmem:[#allocation2 + $0x54] sm:$0xf] %vm668_vm2, %v657_v28  ;;  %v665_v38 = vpack.c.bf16 %v633_v45, %v633_v45  ;;  %v666_v29 = vpack.c.bf16 %v634_v37, %v634_v37  ;;  %2520 = vmatmul.msk.f32.gmra.mxu2 %vm288_vm1, %v4544_v40  ;;  %v3867_v39 = vpack.i.bf16 %v916_v21, %v900_v47  ;;  %v4552_v28 = vld [vmem:[#allocation14_spill] sm:$0xff]  ;;  %v4557_v37 = vld [vmem:[#allocation17_spill] sm:$0xff] }
 0x1a0   : > { %691 = vst.msk [vmem:[#allocation2 + $0x58] sm:$0xf] %vm668_vm2, %v658_v34  ;;  %v2808_v35 = vpack.i.bf16 %v906_v44, %v890_v53  ;;  %v667_v57 = vpack.c.bf16 %v635_v56, %v635_v56  ;;  %v3871_v52 = vpack.i.bf16 %v920_v1, %v904_v3  ;;  %v3873_v2 = vpack.i.bf16 %v921_v16, %v905_v33  ;;  %v4553_v34 = vld [vmem:[#allocation15_spill] sm:$0xff] }
 0x1a1   : > { %692 = vst.msk [vmem:[#allocation2 + $0x5c] sm:$0xf] %vm668_vm2, %v659_v43  ;;  %v907_v32 = vsub.f32 %v3602_v30, %v3823_v51  ;;  %v891_v5 = vsub.f32 %v4545_v58, %v3823_v51  ;;  %v908_v25 = vsub.f32 %v3614_v42, %v3823_v51  ;;  %v892_v7 = vsub.f32 %v4547_v26, %v3823_v51  ;;  %v4548_v30 = vld [vmem:[#allocation12_spill] sm:$0xff]  ;;  %v4562_v58 = vld [vmem:[#allocation21_spill] sm:$0xff] }
 0x1a2   : > { %693 = vst.msk [vmem:[#allocation2 + $0x60] sm:$0xf] %vm668_vm2, %v660_v10  ;;  %2809 = vxpose.xlu0.b32.start [1/16] (narrow) %v2808_v35, 8  ;;  %v893_v9 = vsub.f32 %v4549_v55, %v3823_v51  ;;  %v909_v4 = vsub.f32 %v3620_v54, %v3823_v51  ;;  %v4551_v42 = vld [vmem:[#allocation36_spill] sm:$0xff]  ;;  %v910_v22 = vsub.f32 %v3633_v62, %v3823_v51 }
 0x1a3   : > { %694 = vst.msk [vmem:[#allocation2 + $0x64] sm:$0xf] %vm668_vm2, %v661_v63  ;;  %v2810_v48 = vpack.i.bf16 %v907_v32, %v891_v5  ;;  %v2812_v60 = vpack.i.bf16 %v908_v25, %v892_v7  ;;  %v894_v16 = vsub.f32 %v4551_v42, %v3823_v51  ;;  %v895_v18 = vsub.f32 %v3485_v14, %v3823_v51  ;;  %v4555_v10 = vld [vmem:[#allocation16_spill] sm:$0xff]  ;;  %v4556_v14 = vld [vmem:[#allocation38_spill] sm:$0xff] }
 0x1a4   : > { %695 = vst.msk [vmem:[#allocation2 + $0x68] sm:$0xf] %vm668_vm2, %v662_v0  ;;  %v2814_v13 = vpack.i.bf16 %v909_v4, %v893_v9  ;;  %v911_v54 = vsub.f32 %v3645_v19, %v3823_v51  ;;  %v896_v8 = vsub.f32 %v4554_v59, %v3823_v51  ;;  %v912_v62 = vsub.f32 %v3661_v17, %v3823_v51  ;;  %v4558_v17 = vld [vmem:[#allocation39_spill] sm:$0xff]  ;;  %v4564_v25 = vld [vmem:[#allocation42_spill] sm:$0xff] }
 0x1a5   : > { %696 = vst.msk [vmem:[#allocation2 + $0x6c] sm:$0xf] %vm668_vm2, %v663_v11  ;;  %v2816_v23 = vpack.i.bf16 %v910_v22, %v894_v16  ;;  %v897_v19 = vsub.f32 %v4556_v14, %v3823_v51  ;;  %v913_v45 = vsub.f32 %v3673_v20, %v3823_v51  ;;  %v898_v0 = vsub.f32 %v4558_v17, %v3823_v51  ;;  %v4559_v11 = vld [vmem:[#allocation18_spill] sm:$0xff]  ;;  %v4565_v16 = vld [vmem:[#allocation41_spill] sm:$0xff] }
 0x1a6   : > { %697 = vst.msk [vmem:[#allocation2 + $0x70] sm:$0xf] %vm668_vm2, %v664_v46  ;;  %v2818_v31 = vpack.i.bf16 %v911_v54, %v895_v18  ;;  %v2820_v50 = vpack.i.bf16 %v912_v62, %v896_v8  ;;  %v914_v47 = vsub.f32 %v3684_v15, %v3823_v51  ;;  %v899_v20 = vsub.f32 %v3519_v61, %v3823_v51  ;;  %v4560_v46 = vld [vmem:[#allocation19_spill] sm:$0xff]  ;;  %v3935_v15 = vld [vmem:[%s4453_s4 + $0x2] ss:$0 sm:$0xff]  ;;  %v4567_v62 = vld [vmem:[#allocation22_spill] sm:$0xff] }
 0x1a7   : > { %698 = vst.msk [vmem:[#allocation2 + $0x74] sm:$0xf] %vm668_vm2, %v665_v38  ;;  %2521 = vmatmul.msk.f32.gmra.mxu2 %vm288_vm1, %v4546_v41  ;;  %v2822_v63 = vpack.i.bf16 %v913_v45, %v897_v19  ;;  %v915_v36 = vsub.f32 %v3691_v27, %v3823_v51  ;;  %v4561_v38 = vld [vmem:[#allocation20_spill] sm:$0xff]  ;;  %v901_v35 = vsub.f32 %v3540_v12, %v3823_v51  ;;  %v2856_v59 = vld [vmem:[%s3061_s30 + $0xc0] sm:$0xff]  ;;  %v2857_v8 = vld [vmem:[%s3061_s30 + $0xc8] sm:$0xff] }
 0x1a8   : > { %699 = vst.msk [vmem:[#allocation2 + $0x78] sm:$0xf] %vm668_vm2, %v666_v29  ;;  %v2824_v1 = vpack.i.bf16 %v914_v47, %v898_v0  ;;  %v917_v29 = vsub.f32 %v3710_v24, %v3823_v51  ;;  %v4563_v24 = vld [vmem:[#allocation40_spill] sm:$0xff]  ;;  %v918_v26 = vsub.f32 %v4564_v25, %v3823_v51  ;;  %v903_v22 = vsub.f32 %v4565_v16, %v3823_v51 }
 0x1a9   : > { %700 = vst.msk [vmem:[#allocation2 + $0x7c] sm:$0xf] %vm668_vm2, %v667_v57  ;;  %v2826_v53 = vpack.i.bf16 %v915_v36, %v899_v20  ;;  %v902_v41 = vsub.f32 %v4563_v24, %v3823_v51 }
 0x1aa   : > { %2811 = vxpose.xlu0.b32.cont [2/16] (narrow) %v2810_v48, 8  ;;  %v2830_v57 = vpack.i.bf16 %v917_v29, %v901_v35 }
 0x1ab   : > { %v2832_v9 = vpack.i.bf16 %v918_v26, %v902_v41 }
 0x1af   : > { %2522 = vmatmul.msk.f32.gmra.mxu2 %vm288_vm1, %v4548_v30 }
 0x1b2   : > { %2813 = vxpose.xlu0.b32.cont [3/16] (narrow) %v2812_v60, 8 }
 0x1b7   : > { %2523 = vmatmul.msk.f32.gmra.mxu2 %vm288_vm1, %v4550_v49 }
 0x1ba   : > { %2815 = vxpose.xlu0.b32.cont [4/16] (narrow) %v2814_v13, 8  ;;  %v2854_v13 = vld [vmem:[%s3061_s30 + $0xb0] sm:$0xff] }
 0x1bf   : > { %2524 = vmatmul.msk.f32.gmra.mxu2 %vm288_vm1, %v4552_v28  ;;  %v1018_v43 = vpop.f32.mrf.mxu2 }
 0x1c0   : > { %v1019_v3 = vadd.f32 %v3935_v15, %v1018_v43 }
 0x1c2   : > { %2817 = vxpose.xlu0.b32.cont [5/16] (narrow) %v2816_v23, 8  ;;  %v1114_v33 = vpack.c.bf16 %v1019_v3, %v1019_v3  ;;  %v4566_v23 = vld [vmem:[#allocation43_spill] sm:$0xff] }
 0x1c3   : > { %v919_v28 = vsub.f32 %v4566_v23, %v3823_v51 }
 0x1c4   : > { %1146 = vst.msk [vmem:[#allocation4] sm:$0xf] %vm668_vm2, %v1114_v33 }
 0x1c5   : > { %v2834_v18 = vpack.i.bf16 %v919_v28, %v903_v22 }
 0x1c7   : > { %2525 = vmatmul.msk.f32.gmra.mxu2 %vm288_vm1, %v4553_v34  ;;  %v1021_v21 = vpop.f32.mrf.mxu2 }
 0x1c8   : > { %v1022_v27 = vadd.f32 %v3935_v15, %v1021_v21 }
 0x1ca   : > { %2819 = vxpose.xlu0.b32.cont [6/16] (narrow) %v2818_v31, 8  ;;  %v1115_v40 = vpack.c.bf16 %v1022_v27, %v1022_v27  ;;  %v2855_v31 = vld [vmem:[%s3061_s30 + $0xb8] sm:$0xff] }
 0x1cc   : > { %1147 = vst.msk [vmem:[#allocation4 + $0x4] sm:$0xf] %vm668_vm2, %v1115_v40 }
 0x1cf   : > { %2526 = vmatmul.msk.f32.gmra.mxu2 %vm288_vm1, %v4555_v10  ;;  %v1024_v56 = vpop.f32.mrf.mxu2 }
 0x1d0   : > { %v1025_v5 = vadd.f32 %v3935_v15, %v1024_v56 }
 0x1d2   : > { %2821 = vxpose.xlu0.b32.cont [7/16] (narrow) %v2820_v50, 8  ;;  %v1116_v7 = vpack.c.bf16 %v1025_v5, %v1025_v5 }
 0x1d4   : > { %1148 = vst.msk [vmem:[#allocation4 + $0x8] sm:$0xf] %vm668_vm2, %v1116_v7  ;;  %v1178_v7 = vpack.c.bf16 %v3726_v6, %v3726_v6 }
 0x1d7   : > { %2527 = vmatmul.msk.f32.gmra.mxu2 %vm288_vm1, %v4557_v37  ;;  %v1027_v44 = vpop.f32.mrf.mxu2 }
 0x1da   : > { %2823 = vxpose.xlu0.b32.cont [8/16] (narrow) %v2822_v63, 8 }
 0x1df   : > { %2528 = vmatmul.msk.f32.gmra.mxu2 %vm288_vm1, %v4559_v11  ;;  %v1030_v61 = vpop.f32.mrf.mxu2 }
 0x1e0   : > { %v1031_v48 = vadd.f32 %v3935_v15, %v1030_v61 }
 0x1e2   : > { %2825 = vxpose.xlu0.b32.cont [9/16] (narrow) %v2824_v1, 8  ;;  %v1118_v30 = vpack.c.bf16 %v1031_v48, %v1031_v48 }
 0x1e4   : > { %1150 = vst.msk [vmem:[#allocation4 + $0x10] sm:$0xf] %vm668_vm2, %v1118_v30  ;;  %v1099_v30 = vpop.f32.mrf.mxu3 }
 0x1e7   : > { %2529 = vmatmul.msk.f32.gmra.mxu2 %vm288_vm1, %v4560_v46  ;;  %v1033_v32 = vpop.f32.mrf.mxu2 }
 0x1e8   : > { %v1034_v12 = vadd.f32 %v3935_v15, %v1033_v32 }
 0x1ea   : > { %2827 = vxpose.xlu0.b32.cont [10/16] (narrow) %v2826_v53, 8  ;;  %v1119_v55 = vpack.c.bf16 %v1034_v12, %v1034_v12 }
 0x1ec   : > { %1151 = vst.msk [vmem:[#allocation4 + $0x14] sm:$0xf] %vm668_vm2, %v1119_v55  ;;  %v1100_v55 = vadd.f32 %v3935_v15, %v1099_v30  ;;  %v1102_v6 = vpop.f32.mrf.mxu3 }
 0x1ed   : > { %v1103_v22 = vadd.f32 %v3935_v15, %v1102_v6 }
 0x1ef   : > { %2530 = vmatmul.msk.f32.gmra.mxu2 %vm288_vm1, %v4561_v38  ;;  %v1036_v4 = vpop.f32.mrf.mxu2 }
 0x1f0   : > { %v1037_v49 = vadd.f32 %v3935_v15, %v1036_v4 }
 0x1f2   : > { %2829 = vxpose.xlu0.b32.cont [11/16] (narrow) %v3867_v39, 8  ;;  %v1028_v39 = vadd.f32 %v3935_v15, %v1027_v44  ;;  %v1120_v42 = vpack.c.bf16 %v1037_v49, %v1037_v49 }
 0x1f4   : > { %v1117_v60 = vpack.c.bf16 %v1028_v39, %v1028_v39  ;;  %1152 = vst.msk [vmem:[#allocation4 + $0x18] sm:$0xf] %vm668_vm2, %v1120_v42 }
 0x1f6   : > { %1149 = vst.msk [vmem:[#allocation4 + $0xc] sm:$0xf] %vm668_vm2, %v1117_v60 }
 0x1f7   : > { %2531 = vmatmul.msk.f32.gmra.mxu2 %vm288_vm1, %v4562_v58 }
 0x1fa   : > { %2831 = vxpose.xlu0.b32.cont [12/16] (narrow) %v2830_v57, 8 }
 0x1ff   : > { %2532 = vmatmul.msk.f32.gmra.mxu2 %vm288_vm1, %v2854_v13  ;;  %v1141_v13 = vpack.c.bf16 %v1100_v55, %v1100_v55 }
 0x201   : > { %1173 = vst.msk [vmem:[#allocation4 + $0x6c] sm:$0xf] %vm668_vm2, %v1141_v13 }
 0x202   : > { %2833 = vxpose.xlu0.b32.cont [13/16] (narrow) %v2832_v9, 8 }
 0x207   : > { %2533 = vmatmul.msk.f32.gmra.mxu2 %vm288_vm1, %v2855_v31 }
 0x20a   : > { %v1039_v54 = vpop.f32.mrf.mxu2  ;;  %2835 = vxpose.xlu0.b32.cont [14/16] (narrow) %v2834_v18, 8  ;;  %v1142_v18 = vpack.c.bf16 %v1103_v22, %v1103_v22 }
 0x20b   : > { %v1040_v50 = vadd.f32 %v3935_v15, %v1039_v54 }
 0x20c   : > { %1174 = vst.msk [vmem:[#allocation4 + $0x70] sm:$0xf] %vm668_vm2, %v1142_v18 }
 0x20d   : > { %v1121_v45 = vpack.c.bf16 %v1040_v50, %v1040_v50 }
 0x20f   : > { %2534 = vmatmul.msk.f32.gmra.mxu2 %vm288_vm1, %v2856_v59  ;;  %1153 = vst.msk [vmem:[#allocation4 + $0x1c] sm:$0xf] %vm668_vm2, %v1121_v45  ;;  %v1105_v59 = vpop.f32.mrf.mxu3 }
 0x212   : > { %v1042_v34 = vpop.f32.mrf.mxu2  ;;  %2837 = vxpose.xlu0.b32.cont [15/16] (narrow) %v3871_v52, 8 }
 0x213   : > { %v1043_v10 = vadd.f32 %v3935_v15, %v1042_v34 }
 0x215   : > { %v1122_v63 = vpack.c.bf16 %v1043_v10, %v1043_v10 }
 0x216   : > { %v2728_v34 = vld [vmem:[#allocation4 + $0x18] sm:$0xff] }
 0x217   : > { %2535 = vmatmul.msk.f32.gmra.mxu2 %vm288_vm1, %v2857_v8  ;;  %1154 = vst.msk [vmem:[#allocation4 + $0x20] sm:$0xf] %vm668_vm2, %v1122_v63  ;;  %v1106_v8 = vadd.f32 %v3935_v15, %v1105_v59  ;;  %v2725_v63 = vld [vmem:[#allocation4] sm:$0xff] }
 0x21a   : > { %2839 = vxpose.xlu0.b32.end [16/16] (narrow) %v3873_v2, 8  ;;  %v1045_v51 = vpop.f32.mrf.mxu2 }
 0x21b   : > { %v1046_v14 = vadd.f32 %v3935_v15, %v1045_v51  ;;  %v2727_v51 = vld [vmem:[#allocation4 + $0x10] sm:$0xff] }
 0x21d   : > { %v1123_v52 = vpack.c.bf16 %v1046_v14, %v1046_v14  ;;  %v2726_v14 = vld [vmem:[#allocation4 + $0x8] sm:$0xff] }
 0x21f   : > { %2536 = vmatmul.msk.f32.gmra.mxu2 %vm288_vm1, %v4567_v62  ;;  %1155 = vst.msk [vmem:[#allocation4 + $0x24] sm:$0xf] %vm668_vm2, %v1123_v52 }
 0x222   : > { %v1048_v43 = vpop.f32.mrf.mxu2 }
 0x223   : > { %v1049_v37 = vadd.f32 %v3935_v15, %v1048_v43  ;;  %v1143_v43 = vpack.c.bf16 %v1106_v8, %v1106_v8 }
 0x225   : > { %v1124_v17 = vpack.c.bf16 %v1049_v37, %v1049_v37  ;;  %1175 = vst.msk [vmem:[#allocation4 + $0x74] sm:$0xf] %vm668_vm2, %v1143_v43 }
 0x226   : > { %v2729_v23 = vld [vmem:[#allocation4 + $0x20] sm:$0xff] }
 0x227   : > { %1156 = vst.msk [vmem:[#allocation4 + $0x28] sm:$0xf] %vm668_vm2, %v1124_v17 }
 0x22a   : > { %v1051_v19 = vpop.f32.mrf.mxu2 }
 0x22b   : > { %v1052_v0 = vadd.f32 %v3935_v15, %v1051_v19  ;;  %v1108_v19 = vpop.f32.mrf.mxu3 }
 0x22c   : > { %v1109_v45 = vadd.f32 %v3935_v15, %v1108_v19 }
 0x22d   : > { %v1125_v1 = vpack.c.bf16 %v1052_v0, %v1052_v0 }
 0x22f   : > { %1157 = vst.msk [vmem:[#allocation4 + $0x2c] sm:$0xf] %vm668_vm2, %v1125_v1 }
 0x232   : > { %v1054_v2 = vpop.f32.mrf.mxu2 }
 0x233   : > { %v1055_v47 = vadd.f32 %v3935_v15, %v1054_v2  ;;  %v1144_v2 = vpack.c.bf16 %v1109_v45, %v1109_v45  ;;  %v1111_v17 = vpop.f32.mrf.mxu3 }
 0x234   : > { %v1112_v0 = vadd.f32 %v3935_v15, %v1111_v17 }
 0x235   : > { %v1126_v56 = vpack.c.bf16 %v1055_v47, %v1055_v47  ;;  %1176 = vst.msk [vmem:[#allocation4 + $0x78] sm:$0xf] %vm668_vm2, %v1144_v2 }
 0x236   : > { %v2730_v16 = vld [vmem:[#allocation4 + $0x28] sm:$0xff]  ;;  %v1145_v1 = vpack.c.bf16 %v1112_v0, %v1112_v0 }
 0x237   : > { %1158 = vst.msk [vmem:[#allocation4 + $0x30] sm:$0xf] %vm668_vm2, %v1126_v56 }
 0x238   : > { %1177 = vst.msk [vmem:[#allocation4 + $0x7c] sm:$0xf] %vm668_vm2, %v1145_v1 }
 0x23a   : > { %v1057_v21 = vpop.f32.mrf.mxu2 }
 0x23b   : > { %v1058_v61 = vadd.f32 %v3935_v15, %v1057_v21 }
 0x23d   : > { %v1127_v35 = vpack.c.bf16 %v1058_v61, %v1058_v61 }
 0x23f   : > { %1159 = vst.msk [vmem:[#allocation4 + $0x34] sm:$0xf] %vm668_vm2, %v1127_v35  ;;  %v2740_v35 = vld [vmem:[#allocation4 + $0x78] sm:$0xff] }
 0x242   : > { %v1060_v11 = vpop.f32.mrf.mxu2 }
 0x243   : > { %v1061_v38 = vadd.f32 %v3935_v15, %v1060_v11 }
 0x245   : > { %v1128_v29 = vpack.c.bf16 %v1061_v38, %v1061_v38 }
 0x246   : > { %v2840_v20 = vpop.trf.xlu0  ;;  %v2731_v9 = vld [vmem:[#allocation4 + $0x30] sm:$0xff] }
 0x247   : > { %v2844_v36 = vunpack.i.h.bf16 %v2840_v20  ;;  %v2841_v53 = vunpack.i.l.bf16 %v2840_v20  ;;  %1160 = vst.msk [vmem:[#allocation4 + $0x38] sm:$0xf] %vm668_vm2, %v1128_v29 }
 0x249   : > { %v986_v44 = vpack.c.bf16 %v2844_v36, %v2841_v53 }
 0x24a   : > { %v1063_v3 = vpop.f32.mrf.mxu2 }
 0x24b   : > { %v988_v46 = vrot.slane %v986_v44, 2  ;;  %v1064_v27 = vadd.f32 %v3935_v15, %v1063_v3 }
 0x24d   : > { %v992_v33 = vsel %vm989_vm3, %v986_v44, %v988_v46  ;;  %v1129_v32 = vpack.c.bf16 %v1064_v27, %v1064_v27 }
 0x24e   : > { %994 = vst [vmem:[#allocation3] sm:$0xf] %v992_v33 }
 0x24f   : > { %1161 = vst.msk [vmem:[#allocation4 + $0x3c] sm:$0xf] %vm668_vm2, %v1129_v32 }
 0x252   : > { %v1066_v40 = vpop.f32.mrf.mxu2 }
 0x253   : > { %v1067_v58 = vadd.f32 %v3935_v15, %v1066_v40 }
 0x255   : > { %v1179_v57 = vld [vmem:[#allocation3] sm:$0xf]  ;;  %v1130_v5 = vpack.c.bf16 %v1067_v58, %v1067_v58 }
 0x256   : > { %1181 = vst [vmem:[#allocation1] ss:$4 sm:$0xff] %v1179_v57  ;;  %v2732_v60 = vld [vmem:[#allocation4 + $0x38] sm:$0xff]  ;;  %v2739_v57 = vld [vmem:[#allocation4 + $0x70] sm:$0xff] }
 0x257   : > { %1162 = vst.msk [vmem:[#allocation4 + $0x40] sm:$0xf] %vm668_vm2, %v1130_v5 }
 0x25a   : > { %v1069_v39 = vpop.f32.mrf.mxu2 }
 0x25b   : > { %v1070_v24 = vadd.f32 %v3935_v15, %v1069_v39 }
 0x25d   : > { %v1182_v48 = vld.sshfl [vmem:[#allocation1] sm:$0xff pattern:$0x73625140]  ;;  %v1183_v12 = vld.sshfl [vmem:[#allocation1 + $0x8] sm:$0xff pattern:$0x73625140]  ;;  %v1131_v26 = vpack.c.bf16 %v1070_v24, %v1070_v24 }
 0x25e   : > { %v1187_v41 = vsel %vm989_vm3, %v1182_v48, 0  ;;  %v1189_v25 = vsel %vm989_vm3, %v1183_v12, 0 }
 0x25f   : > { %1198 = vmatpush.bf16.msrb.mxu3 %v1187_v41  ;;  %1163 = vst.msk [vmem:[#allocation4 + $0x44] sm:$0xf] %vm668_vm2, %v1131_v26 }
 0x262   : > { %2542 = vmatmul.msk.bf16.vlgmr.msrb.gmra.mxu3 %vm288_vm1, %v1178_v7  ;;  %v1072_v4 = vpop.f32.mrf.mxu2 }
 0x263   : > { %1211 = vmatpush.bf16.msra.mxu3 %v1189_v25  ;;  %v1073_v49 = vadd.f32 %v3935_v15, %v1072_v4 }
 0x265   : > { %v1132_v42 = vpack.c.bf16 %v1073_v49, %v1073_v49 }
 0x266   : > { %v2733_v24 = vld [vmem:[#allocation4 + $0x40] sm:$0xff] }
 0x267   : > { %1359 = vmatpush.bf16.msrb.mxu3 %v2732_v60  ;;  %1164 = vst.msk [vmem:[#allocation4 + $0x48] sm:$0xf] %vm668_vm2, %v1132_v42 }
 0x26a   : > { %v1075_v28 = vpop.f32.mrf.mxu2 }
 0x26b   : > { %1360 = vmatpush.bf16.msrb.mxu3 %v2731_v9  ;;  %v1076_v54 = vadd.f32 %v3935_v15, %v1075_v28 }
 0x26d   : > { %v1133_v31 = vpack.c.bf16 %v1076_v54, %v1076_v54 }
 0x26f   : > { %1361 = vmatpush.bf16.msrb.mxu3 %v2730_v16  ;;  %1165 = vst.msk [vmem:[#allocation4 + $0x4c] sm:$0xf] %vm668_vm2, %v1133_v31 }
 0x272   : > { %2543 = vmatmul.msk.bf16.vlgmr.msra.gmra.mxu3 %vm288_vm1, %v1178_v7  ;;  %v1078_v62 = vpop.f32.mrf.mxu2 }
 0x273   : > { %1362 = vmatpush.bf16.msrb.mxu3 %v2729_v23  ;;  %v1079_v50 = vadd.f32 %v3935_v15, %v1078_v62 }
 0x275   : > { %v1134_v10 = vpack.c.bf16 %v1079_v50, %v1079_v50 }
 0x276   : > { %v2734_v12 = vld [vmem:[#allocation4 + $0x48] sm:$0xff] }
 0x277   : > { %1363 = vmatpush.bf16.msrb.mxu3 %v2728_v34  ;;  %1166 = vst.msk [vmem:[#allocation4 + $0x50] sm:$0xf] %vm668_vm2, %v1134_v10 }
 0x27a   : > { %v1081_v52 = vpop.f32.mrf.mxu2 }
 0x27b   : > { %1364 = vmatpush.bf16.msrb.mxu3 %v2727_v51  ;;  %v1082_v21 = vadd.f32 %v3935_v15, %v1081_v52 }
 0x27d   : > { %v1135_v37 = vpack.c.bf16 %v1082_v21, %v1082_v21 }
 0x27f   : > { %1365 = vmatpush.bf16.msrb.mxu3 %v2726_v14  ;;  %1167 = vst.msk [vmem:[#allocation4 + $0x54] sm:$0xf] %vm668_vm2, %v1135_v37 }
 0x282   : > { %v1084_v47 = vpop.f32.mrf.mxu2 }
 0x283   : > { %1366 = vmatpush.bf16.msrb.mxu3 %v2725_v63  ;;  %v1085_v56 = vadd.f32 %v3935_v15, %v1084_v47 }
 0x285   : > { %v1136_v11 = vpack.c.bf16 %v1085_v56, %v1085_v56 }
 0x286   : > { %v2735_v39 = vld [vmem:[#allocation4 + $0x50] sm:$0xff] }
 0x287   : > { %1168 = vst.msk [vmem:[#allocation4 + $0x58] sm:$0xf] %vm668_vm2, %v1136_v11  ;;  %1372 = vmatpush.bf16.msra.mxu3 %v2740_v35 }
 0x28a   : > { %v1087_v20 = vpop.f32.mrf.mxu2 }
 0x28b   : > { %v1088_v36 = vadd.f32 %v3935_v15, %v1087_v20  ;;  %1373 = vmatpush.bf16.msra.mxu3 %v2739_v57 }
 0x28d   : > { %v1137_v53 = vpack.c.bf16 %v1088_v36, %v1088_v36 }
 0x28f   : > { %1169 = vst.msk [vmem:[#allocation4 + $0x5c] sm:$0xf] %vm668_vm2, %v1137_v53 }
 0x292   : > { %v1090_v44 = vpop.f32.mrf.mxu2 }
 0x293   : > { %v1091_v46 = vadd.f32 %v3935_v15, %v1090_v44 }
 0x295   : > { %v1138_v3 = vpack.c.bf16 %v1091_v46, %v1091_v46 }
 0x296   : > { %v2736_v5 = vld [vmem:[#allocation4 + $0x58] sm:$0xff] }
 0x297   : > { %1170 = vst.msk [vmem:[#allocation4 + $0x60] sm:$0xf] %vm668_vm2, %v1138_v3 }
 0x29a   : > { %v1093_v33 = vpop.f32.mrf.mxu2 }
 0x29b   : > { %v1094_v61 = vadd.f32 %v3935_v15, %v1093_v33 }
 0x29d   : > { %v1139_v38 = vpack.c.bf16 %v1094_v61, %v1094_v61 }
 0x29f   : > { %1171 = vst.msk [vmem:[#allocation4 + $0x64] sm:$0xf] %vm668_vm2, %v1139_v38 }
 0x2a2   : > { %v1096_v27 = vpop.f32.mrf.mxu2 }
 0x2a3   : > { %v1097_v29 = vadd.f32 %v3935_v15, %v1096_v27 }
 0x2a5   : > { %v1140_v40 = vpack.c.bf16 %v1097_v29, %v1097_v29 }
 0x2a6   : > { %v2737_v58 = vld [vmem:[#allocation4 + $0x60] sm:$0xff] }
 0x2a7   : > { %1172 = vst.msk [vmem:[#allocation4 + $0x68] sm:$0xf] %vm668_vm2, %v1140_v40 }
 0x2ae   : > { %v2738_v32 = vld [vmem:[#allocation4 + $0x68] sm:$0xff] }
 0x2af   : > { %1374 = vmatpush.bf16.msra.mxu3 %v2738_v32 }
 0x2b3   : > { %1375 = vmatpush.bf16.msra.mxu3 %v2737_v58 }
 0x2b7   : > { %1376 = vmatpush.bf16.msra.mxu3 %v2736_v5 }
 0x2bb   : > { %1377 = vmatpush.bf16.msra.mxu3 %v2735_v39 }
 0x2bf   : > { %1378 = vmatpush.bf16.msra.mxu3 %v2734_v12 }
 0x2c3   : > { %1379 = vmatpush.bf16.msra.mxu3 %v2733_v24 }
 0x2e5   : > { %v1200_v48 = vpop.f32.mrf.mxu3 }
 0x2e6   : > { %v1218_v25 = vsel %vm1217_vm4, %v1200_v48, -inf }
 0x2ed   : > { %v1202_v41 = vpop.f32.mrf.mxu3 }
 0x2f5   : > { %v1213_v15 = vpop.f32.mrf.mxu3 }
 0x2f6   : > { %v1219_v26 = vsel %vm1217_vm4, %v1213_v15, -inf }
 0x2f7   : > { %v1220_v7 = vmax.f32 %v1218_v25, %v1219_v26 }
 0x2f9   : > { %1221 = vmax.xlane.f32.xlu1 %v1220_v7 }
 0x2fd   : > { %v1215_v60 = vpop.f32.mrf.mxu3 }
 0x36c   : > { %v1222_v30 = vpop.xlane.xlu1 %1221 }
 0x36d   : > { %v1223_v55 = vsub.f32 %v1200_v48, %v1222_v30  ;;  %v1224_v9 = vsub.f32 %v1213_v15, %v1222_v30 }
 0x36f   : > { %v1225_v4 = vmul.f32 1.442695, %v1223_v55  ;;  %v1227_v13 = vmul.f32 1.442695, %v1224_v9 }
 0x371   : > { %2848 = vpow2.f32 %v1225_v4 }
 0x372   : > { %2850 = vpow2.f32 %v1227_v13 }
 0x377   : > { %v2849_v49 = vpop.eup %2848 }
 0x378   : > { %v2851_v42 = vpop.eup %2850  ;;  %v1229_v16 = vpack.c.bf16 %v2849_v49, %v2849_v49  ;;  %v1385_v6 = vsel %vm1217_vm4, %v2849_v49, 0.0 }
 0x379   : > { %v1386_v22 = vsel %vm1217_vm4, %v2851_v42, 0.0  ;;  %v1230_v28 = vpack.c.bf16 %v2851_v42, %v2851_v42 }
 0x37a   : > { %1367 = vmatmul.bf16.vlgmr.msrb.gmra.mxu3 %v1229_v16  ;;  %v1387_v23 = vadd.f32 %v1386_v22, %v1385_v6 }
 0x37c   : > { %1388 = vadd.xlane.f32.xlu1 %v1387_v23 }
 0x38a   : > { %1380 = vmatmul.bf16.vlgmr.msra.gmra.mxu3 %v1230_v28 }
 0x3ef   : > { %v1389_v18 = vpop.xlane.xlu1 %1388 }
 0x3f0   : > { %2852 = vrcp.f32 %v1389_v18  ;;  %v1401_v43 = vand.u32 2147483648, %v1389_v18  ;;  %vm1395_vm6 = vweird.f32 %v1389_v18  ;;  %v1399_v50 = vand.u32 2147483647, %v1389_v18 }
 0x3f2   : > { %v1402_v14 = vor.u32 1.1754944e-38, %v1401_v43  ;;  %vm1400_vm8 = vcmp.eq.f32.partialorder %v1399_v50, 8.507059e+37 }
 0x3f6   : > { %v2853_v54 = vpop.eup %2852 }
 0x3f7   : > { %v1391_v31 = vmul.f32 %v2853_v54, %v1389_v18  ;;  %vm1396_vm5 = vweird.f32 %v2853_v54 }
 0x3f8   : > { %vm1397_vm7 = vmor %vm1395_vm6, %vm1396_vm5 }
 0x3f9   : > { %v1392_v59 = vsub.f32 1.0, %v1391_v31 }
 0x3fb   : > { %v1393_v8 = vmul.f32 %v2853_v54, %v1392_v59 }
 0x3fd   : > { %v1368_v34 = vpop.f32.mrf.mxu3  ;;  %v1394_v62 = vadd.f32 %v2853_v54, %v1393_v8 }
 0x3ff   : > { %v1398_v10 = vsel %vm1397_vm7, %v2853_v54, %v1394_v62 }
 0x400   : > { %v1403_v63 = vsel %vm1400_vm8, %v1402_v14, %v1398_v10 }
 0x405   : > { %v1370_v51 = vpop.f32.mrf.mxu3 }
 0x40d   : > { %v1381_v19 = vpop.f32.mrf.mxu3 }
 0x40e   : > { %v1382_v45 = vadd.f32 %v1381_v19, %v1368_v34 }
 0x410   : > { %v1404_v52 = vmul.f32 %v1403_v63, %v1382_v45 }
 0x412   : > { %1406 = vst.msk [vmem:[#allocation5] sm:$0x1] %vm1405_vm9, %v1404_v52 }
 0x415   : > { %v1383_v2 = vpop.f32.mrf.mxu3 }
 0x416 PF: > { %v1428_v21 = vld [vmem:[#allocation3] sm:$0xf]  ;;  %s2608_s29 = sshll.u32 %s2977_s18, 7  ;;  %vm1498_vm10 = vcmask 1041408   ;;  %vm1473_vm11 = vcmask 31744   ;;  %v2755_v23 = vld [vmem:[#allocation4 + $0x30] sm:$0xff] }
 0x417   : > { %1470 = vst [vmem:[#allocation1] ss:$4 sm:$0xff] %v1428_v21  ;;  %s1408_s6 = sshra.s32 %s2608_s29, 3  ;;  %v2756_v6 = vld [vmem:[#allocation4 + $0x38] sm:$0xff]  ;;  %v2763_v28 = vld [vmem:[#allocation4 + $0x70] sm:$0xff]  ;;  %v2754_v34 = vld [vmem:[#allocation4 + $0x28] sm:$0xff]  ;;  %s4196_s9 = scalar_lea.vmem %s3061_s30, %s2608_s29 }
 0x418   : > { %s2609_s7 = sshll.u32 %s1408_s6, 2  ;;  %v2764_v22 = vld [vmem:[#allocation4 + $0x78] sm:$0xff]  ;;  %1937 = vmatpush.bf16.msra.mxu2 %v2756_v6  ;;  %v2762_v59 = vld [vmem:[#allocation4 + $0x68] sm:$0xff]  ;;  %v2753_v62 = vld [vmem:[#allocation4 + $0x20] sm:$0xff] }
 0x419   : > { %s1411_s8 = scalar_lea.vmem [#allocation2], %s2609_s7  ;;  %1986 = vmatpush.bf16.msra.mxu3 %v2764_v22  ;;  %v2761_v43 = vld [vmem:[#allocation4 + $0x60] sm:$0xff]  ;;  %v2752_v10 = vld [vmem:[#allocation4 + $0x18] sm:$0xff]  ;;  %v2751_v63 = vld [vmem:[#allocation4 + $0x10] sm:$0xff] }
 0x41a   : > { %v2741_v1 = vld [vmem:[%s1411_s8] sm:$0xff]  ;;  %v2742_v56 = vld [vmem:[%s1411_s8 + $0x8] sm:$0xff]  ;;  %v2743_v11 = vld [vmem:[%s1411_s8 + $0x10] sm:$0xff] }
 0x41b   : > { %v2744_v20 = vld [vmem:[%s1411_s8 + $0x18] sm:$0xff]  ;;  %v2745_v36 = vld [vmem:[%s1411_s8 + $0x20] sm:$0xff]  ;;  %v2746_v53 = vld [vmem:[%s1411_s8 + $0x28] sm:$0xff] }
 0x41c   : > { %v2747_v44 = vld [vmem:[%s1411_s8 + $0x30] sm:$0xff]  ;;  %v2748_v46 = vld [vmem:[%s1411_s8 + $0x38] sm:$0xff]  ;;  %1938 = vmatpush.bf16.msra.mxu2 %v2755_v23  ;;  %v2760_v14 = vld [vmem:[#allocation4 + $0x58] sm:$0xff] }
 0x41d   : > { %1987 = vmatpush.bf16.msra.mxu3 %v2763_v28  ;;  %v2759_v52 = vld [vmem:[#allocation4 + $0x50] sm:$0xff]  ;;  %v2750_v21 = vld [vmem:[#allocation4 + $0x8] sm:$0xff] }
 0x41e   : > { %v1471_v37 = vld.sshfl [vmem:[#allocation1] sm:$0xff pattern:$0x73625140]  ;;  %v1472_v17 = vld.sshfl [vmem:[#allocation1 + $0x8] sm:$0xff pattern:$0x73625140] }
 0x41f   : > { %v1499_v0 = vsel %vm1498_vm10, %v1471_v37, 0  ;;  %v1501_v47 = vsel %vm1498_vm10, %v1472_v17, 0  ;;  %v2758_v37 = vld [vmem:[#allocation4 + $0x48] sm:$0xff] }
 0x420   : > { %1510 = vmatpush.bf16.msra.mxu0 %v1499_v0  ;;  %1559 = vmatpush.bf16.msra.mxu1 %v1501_v47  ;;  %v2749_v47 = vld [vmem:[#allocation4] sm:$0xff] }
 0x421   : > { %1939 = vmatpush.bf16.msra.mxu2 %v2754_v34  ;;  %1988 = vmatpush.bf16.msra.mxu3 %v2762_v59 }
 0x423   : > { %2642 = vmatmul.msk.bf16.vlgmr.msra.gmra.mxu0 %vm1473_vm11, %v2741_v1  ;;  %2650 = vmatmul.msk.bf16.vlgmr.msra.gmra.mxu1 %vm1473_vm11, %v2741_v1  ;;  %v2757_v1 = vld [vmem:[#allocation4 + $0x40] sm:$0xff] }
 0x425   : > { %1940 = vmatpush.bf16.msra.mxu2 %v2753_v62  ;;  %1989 = vmatpush.bf16.msra.mxu3 %v2761_v43 }
 0x429   : > { %1941 = vmatpush.bf16.msra.mxu2 %v2752_v10  ;;  %1990 = vmatpush.bf16.msra.mxu3 %v2760_v14 }
 0x42d   : > { %1942 = vmatpush.bf16.msra.mxu2 %v2751_v63  ;;  %1991 = vmatpush.bf16.msra.mxu3 %v2759_v52 }
 0x431   : > { %1943 = vmatpush.bf16.msra.mxu2 %v2750_v21  ;;  %1992 = vmatpush.bf16.msra.mxu3 %v2758_v37 }
 0x433   : > { %2643 = vmatmul.msk.bf16.gmra.mxu0 %vm1473_vm11, %v2742_v56  ;;  %2651 = vmatmul.msk.bf16.gmra.mxu1 %vm1473_vm11, %v2742_v56 }
 0x435   : > { %1944 = vmatpush.bf16.msra.mxu2 %v2749_v47  ;;  %1993 = vmatpush.bf16.msra.mxu3 %v2757_v1 }
 0x443   : > { %2644 = vmatmul.msk.bf16.gmra.mxu0 %vm1473_vm11, %v2743_v11  ;;  %2652 = vmatmul.msk.bf16.gmra.mxu1 %vm1473_vm11, %v2743_v11 }
 0x453   : > { %2645 = vmatmul.msk.bf16.gmra.mxu0 %vm1473_vm11, %v2744_v20  ;;  %2653 = vmatmul.msk.bf16.gmra.mxu1 %vm1473_vm11, %v2744_v20 }
 0x463   : > { %2646 = vmatmul.msk.bf16.gmra.mxu0 %vm1473_vm11, %v2745_v36  ;;  %2654 = vmatmul.msk.bf16.gmra.mxu1 %vm1473_vm11, %v2745_v36 }
 0x473   : > { %2647 = vmatmul.msk.bf16.gmra.mxu0 %vm1473_vm11, %v2746_v53  ;;  %2655 = vmatmul.msk.bf16.gmra.mxu1 %vm1473_vm11, %v2746_v53 }
 0x483   : > { %2648 = vmatmul.msk.bf16.gmra.mxu0 %vm1473_vm11, %v2747_v44  ;;  %2656 = vmatmul.msk.bf16.gmra.mxu1 %vm1473_vm11, %v2747_v44 }
 0x493   : > { %2649 = vmatmul.msk.bf16.gmra.mxu0 %vm1473_vm11, %v2748_v46  ;;  %2657 = vmatmul.msk.bf16.gmra.mxu1 %vm1473_vm11, %v2748_v46 }
 0x4a0   : > { %v4060_v3 = vpop.f32.mrf.mxu0  ;;  %v4062_v33 = vpop.f32.mrf.mxu1 }
 0x4a1   : > { %v1601_v61 = vmax.f32 %v4060_v3, %v4062_v33 }
 0x4a3   : > { %1602 = vmax.xlane.f32.xlu0 %v1601_v61 }
 0x4a8   : > { %v4066_v38 = vpop.f32.mrf.mxu0  ;;  %v4068_v27 = vpop.f32.mrf.mxu1 }
 0x4a9   : > { %v1604_v35 = vmax.f32 %v4066_v38, %v4068_v27 }
 0x4ab   : > { %1605 = vmax.xlane.f32.xlu0 %v1604_v35 }
 0x4b0   : > { %v4072_v29 = vpop.f32.mrf.mxu0  ;;  %v4074_v40 = vpop.f32.mrf.mxu1 }
 0x4b1   : > { %v1607_v57 = vmax.f32 %v4072_v29, %v4074_v40 }
 0x4b3   : > { %1608 = vmax.xlane.f32.xlu1 %v1607_v57 }
 0x4b8   : > { %v4078_v32 = vpop.f32.mrf.mxu0  ;;  %v4080_v58 = vpop.f32.mrf.mxu1 }
 0x4b9   : > { %v1610_v5 = vmax.f32 %v4078_v32, %v4080_v58 }
 0x4bb   : > { %1611 = vmax.xlane.f32.xlu1 %v1610_v5 }
 0x4c0   : > { %v4084_v39 = vpop.f32.mrf.mxu0  ;;  %v4086_v48 = vpop.f32.mrf.mxu1 }
 0x4c1   : > { %v1613_v12 = vmax.f32 %v4084_v39, %v4086_v48 }
 0x4c3   : > { %1614 = vmax.xlane.f32.xlu2 %v1613_v12 }
 0x4c8   : > { %v4090_v24 = vpop.f32.mrf.mxu0  ;;  %v4092_v41 = vpop.f32.mrf.mxu1 }
 0x4c9   : > { %v1616_v15 = vmax.f32 %v4090_v24, %v4092_v41 }
 0x4cb   : > { %1617 = vmax.xlane.f32.xlu2 %v1616_v15 }
 0x4d0   : > { %v4096_v25 = vpop.f32.mrf.mxu0  ;;  %v4098_v26 = vpop.f32.mrf.mxu1 }
 0x4d1   : > { %v1619_v7 = vmax.f32 %v4096_v25, %v4098_v26 }
 0x4d3   : > { %1620 = vmax.xlane.f32.xlu0 %v1619_v7 }
 0x4d8   : > { %v4102_v60 = vpop.f32.mrf.mxu0  ;;  %v4104_v30 = vpop.f32.mrf.mxu1 }
 0x4d9   : > { %v1622_v55 = vmax.f32 %v4102_v60, %v4104_v30 }
 0x4db   : > { %1623 = vmax.xlane.f32.xlu1 %v1622_v55 }
 0x4e0   : > { %v4108_v9 = vpop.f32.mrf.mxu0  ;;  %v4110_v4 = vpop.f32.mrf.mxu1 }
 0x4e1   : > { %v1625_v13 = vmax.f32 %v4108_v9, %v4110_v4 }
 0x4e3   : > { %1626 = vmax.xlane.f32.xlu2 %v1625_v13 }
 0x4e8   : > { %v4114_v49 = vpop.f32.mrf.mxu0  ;;  %v4116_v42 = vpop.f32.mrf.mxu1 }
 0x4e9   : > { %v1628_v16 = vmax.f32 %v4114_v49, %v4116_v42 }
 0x4eb   : > { %1629 = vmax.xlane.f32.xlu0 %v1628_v16 }
 0x4f0   : > { %v4120_v18 = vpop.f32.mrf.mxu0  ;;  %v4122_v54 = vpop.f32.mrf.mxu1 }
 0x4f1   : > { %v1631_v31 = vmax.f32 %v4120_v18, %v4122_v54 }
 0x4f3   : > { %1632 = vmax.xlane.f32.xlu1 %v1631_v31 }
 0x4f8   : > { %v4126_v8 = vpop.f32.mrf.mxu0  ;;  %v4128_v51 = vpop.f32.mrf.mxu1 }
 0x4f9   : > { %v1634_v50 = vmax.f32 %v4126_v8, %v4128_v51 }
 0x4fb   : > { %1635 = vmax.xlane.f32.xlu2 %v1634_v50 }
 0x500   : > { %v4132_v19 = vpop.f32.mrf.mxu0  ;;  %v4134_v45 = vpop.f32.mrf.mxu1 }
 0x501   : > { %v1637_v2 = vmax.f32 %v4132_v19, %v4134_v45 }
 0x503   : > { %1638 = vmax.xlane.f32.xlu0 %v1637_v2 }
 0x508   : > { %v4138_v17 = vpop.f32.mrf.mxu0  ;;  %v4140_v0 = vpop.f32.mrf.mxu1 }
 0x509   : > { %v1640_v56 = vmax.f32 %v4138_v17, %v4140_v0 }
 0x50b   : > { %1641 = vmax.xlane.f32.xlu1 %v1640_v56 }
 0x510   : > { %v4144_v11 = vpop.f32.mrf.mxu0  ;;  %v4146_v20 = vpop.f32.mrf.mxu1 }
 0x511   : > { %v1643_v36 = vmax.f32 %v4144_v11, %v4146_v20 }
 0x513   : > { %1644 = vmax.xlane.f32.xlu2 %v1643_v36 }
 0x516   : > { %v1603_v53 = vpop.xlane.xlu0 %1602 }
 0x517   : > { %v1649_v44 = vsub.f32 %v4060_v3, %v1603_v53  ;;  %v1650_v46 = vsub.f32 %v4062_v33, %v1603_v53 }
 0x518   : > { %v4152_v61 = vpop.f32.mrf.mxu0  ;;  %v4154_v35 = vpop.f32.mrf.mxu1 }
 0x519   : > { %v1681_v57 = vmul.f32 1.442695, %v1649_v44  ;;  %v1683_v5 = vmul.f32 1.442695, %v1650_v46  ;;  %v1646_v12 = vmax.f32 %v4152_v61, %v4154_v35 }
 0x51b   : > { %2859 = vpow2.f32 %v1681_v57  ;;  %1647 = vmax.xlane.f32.xlu0 %v1646_v12 }
 0x51c   : > { %2861 = vpow2.f32 %v1683_v5 }
 0x51e   : > { %v1606_v15 = vpop.xlane.xlu0 %1605 }
 0x51f   : > { %v1651_v7 = vsub.f32 %v4066_v38, %v1606_v15  ;;  %v1652_v55 = vsub.f32 %v4068_v27, %v1606_v15 }
 0x521   : > { %v2860_v3 = vpop.eup %2859  ;;  %v1685_v13 = vmul.f32 1.442695, %v1651_v7  ;;  %v1687_v33 = vmul.f32 1.442695, %v1652_v55 }
 0x522   : > { %v2862_v16 = vpop.eup %2861 }
 0x523   : > { %2863 = vpow2.f32 %v1685_v13  ;;  %v1745_v6 = vadd.f32 %v2862_v16, %v2860_v3 }
 0x524   : > { %2865 = vpow2.f32 %v1687_v33 }
 0x525   : > { %1746 = vadd.xlane.f32.xlu1 %v1745_v6 }
 0x526   : > { %v1609_v22 = vpop.xlane.xlu1 %1608 }
 0x527   : > { %v1653_v23 = vsub.f32 %v4072_v29, %v1609_v22  ;;  %v1654_v28 = vsub.f32 %v4074_v40, %v1609_v22 }
 0x529   : > { %v2864_v31 = vpop.eup %2863  ;;  %v1689_v34 = vmul.f32 1.442695, %v1653_v23  ;;  %v1691_v59 = vmul.f32 1.442695, %v1654_v28 }
 0x52a   : > { %v2866_v62 = vpop.eup %2865  ;;  %v1793_v38 = vpack.c.bf16 %v2864_v31, %v2860_v3 }
 0x52b   : > { %2867 = vpow2.f32 %v1689_v34  ;;  %v1794_v27 = vpack.c.bf16 %v2866_v62, %v2862_v16  ;;  %v1748_v43 = vadd.f32 %v2866_v62, %v2864_v31 }
 0x52c   : > { %2869 = vpow2.f32 %v1691_v59  ;;  %1945 = vmatmul.bf16.vlgmr.msra.gmra.mxu2 %v1793_v38 }
 0x52d   : > { %1994 = vmatmul.bf16.vlgmr.msra.gmra.mxu3 %v1794_v27  ;;  %1749 = vadd.xlane.f32.xlu2 %v1748_v43 }
 0x52e   : > { %v1612_v50 = vpop.xlane.xlu1 %1611 }
 0x52f   : > { %v1655_v10 = vsub.f32 %v4078_v32, %v1612_v50  ;;  %v1656_v14 = vsub.f32 %v4080_v58, %v1612_v50 }
 0x531   : > { %v2868_v29 = vpop.eup %2867  ;;  %v1693_v63 = vmul.f32 1.442695, %v1655_v10  ;;  %v1695_v40 = vmul.f32 1.442695, %v1656_v14 }
 0x532   : > { %v2870_v52 = vpop.eup %2869 }
 0x533   : > { %2871 = vpow2.f32 %v1693_v63  ;;  %v1751_v2 = vadd.f32 %v2870_v52, %v2868_v29 }
 0x534   : > { %2873 = vpow2.f32 %v1695_v40 }
 0x535   : > { %1752 = vadd.xlane.f32.xlu0 %v1751_v2 }
 0x536   : > { %v1615_v21 = vpop.xlane.xlu2 %1614 }
 0x537   : > { %v1657_v37 = vsub.f32 %v4084_v39, %v1615_v21  ;;  %v1658_v47 = vsub.f32 %v4086_v48, %v1615_v21 }
 0x539   : > { %v2872_v1 = vpop.eup %2871  ;;  %v1697_v56 = vmul.f32 1.442695, %v1657_v37  ;;  %v1699_v36 = vmul.f32 1.442695, %v1658_v47 }
 0x53a   : > { %v2874_v53 = vpop.eup %2873  ;;  %v1795_v32 = vpack.c.bf16 %v2872_v1, %v2868_v29 }
 0x53b   : > { %2875 = vpow2.f32 %v1697_v56  ;;  %v1796_v58 = vpack.c.bf16 %v2874_v53, %v2870_v52  ;;  %v1754_v44 = vadd.f32 %v2874_v53, %v2872_v1 }
 0x53c   : > { %2877 = vpow2.f32 %v1699_v36  ;;  %1950 = vmatmul.bf16.gmra.mxu2 %v1795_v32 }
 0x53d   : > { %1999 = vmatmul.bf16.gmra.mxu3 %v1796_v58  ;;  %1755 = vadd.xlane.f32.xlu1 %v1754_v44 }
 0x53e   : > { %v1618_v46 = vpop.xlane.xlu2 %1617 }
 0x53f   : > { %v1659_v57 = vsub.f32 %v4090_v24, %v1618_v46  ;;  %v1660_v5 = vsub.f32 %v4092_v41, %v1618_v46 }
 0x541   : > { %v2876_v39 = vpop.eup %2875  ;;  %v1701_v12 = vmul.f32 1.442695, %v1659_v57  ;;  %v1703_v48 = vmul.f32 1.442695, %v1660_v5 }
 0x542   : > { %v2878_v15 = vpop.eup %2877 }
 0x543   : > { %2879 = vpow2.f32 %v1701_v12  ;;  %v1757_v7 = vadd.f32 %v2878_v15, %v2876_v39 }
 0x544   : > { %2881 = vpow2.f32 %v1703_v48 }
 0x545   : > { %1758 = vadd.xlane.f32.xlu2 %v1757_v7 }
 0x546   : > { %v1621_v55 = vpop.xlane.xlu0 %1620 }
 0x547   : > { %v1661_v3 = vsub.f32 %v4096_v25, %v1621_v55  ;;  %v1662_v13 = vsub.f32 %v4098_v26, %v1621_v55 }
 0x549   : > { %v2880_v33 = vpop.eup %2879  ;;  %v1705_v16 = vmul.f32 1.442695, %v1661_v3  ;;  %v1707_v6 = vmul.f32 1.442695, %v1662_v13 }
 0x54a   : > { %v2882_v22 = vpop.eup %2881  ;;  %v1797_v24 = vpack.c.bf16 %v2880_v33, %v2876_v39 }
 0x54b   : > { %2883 = vpow2.f32 %v1705_v16  ;;  %v1798_v41 = vpack.c.bf16 %v2882_v22, %v2878_v15  ;;  %v1760_v23 = vadd.f32 %v2882_v22, %v2880_v33 }
 0x54c   : > { %2885 = vpow2.f32 %v1707_v6  ;;  %1955 = vmatmul.bf16.gmra.mxu2 %v1797_v24 }
 0x54d   : > { %2004 = vmatmul.bf16.gmra.mxu3 %v1798_v41  ;;  %1761 = vadd.xlane.f32.xlu0 %v1760_v23 }
 0x54e   : > { %v1624_v28 = vpop.xlane.xlu1 %1623 }
 0x54f   : > { %v1663_v31 = vsub.f32 %v4102_v60, %v1624_v28  ;;  %v1664_v34 = vsub.f32 %v4104_v30, %v1624_v28 }
 0x551   : > { %v2884_v25 = vpop.eup %2883  ;;  %v1709_v59 = vmul.f32 1.442695, %v1663_v31  ;;  %v1711_v26 = vmul.f32 1.442695, %v1664_v34 }
 0x552   : > { %v2886_v62 = vpop.eup %2885 }
 0x553   : > { %2887 = vpow2.f32 %v1709_v59  ;;  %v1763_v38 = vadd.f32 %v2886_v62, %v2884_v25 }
 0x554   : > { %2889 = vpow2.f32 %v1711_v26 }
 0x555   : > { %1764 = vadd.xlane.f32.xlu1 %v1763_v38 }
 0x556   : > { %v1627_v27 = vpop.xlane.xlu2 %1626 }
 0x557   : > { %v1665_v43 = vsub.f32 %v4108_v9, %v1627_v27  ;;  %v1666_v50 = vsub.f32 %v4110_v4, %v1627_v27 }
 0x559   : > { %v2888_v10 = vpop.eup %2887  ;;  %v1713_v14 = vmul.f32 1.442695, %v1665_v43  ;;  %v1715_v29 = vmul.f32 1.442695, %v1666_v50 }
 0x55a   : > { %v2890_v63 = vpop.eup %2889  ;;  %v1799_v60 = vpack.c.bf16 %v2888_v10, %v2884_v25 }
 0x55b   : > { %2891 = vpow2.f32 %v1713_v14  ;;  %v1800_v30 = vpack.c.bf16 %v2890_v63, %v2886_v62  ;;  %v1766_v40 = vadd.f32 %v2890_v63, %v2888_v10 }
 0x55c   : > { %2893 = vpow2.f32 %v1715_v29  ;;  %1960 = vmatmul.bf16.gmra.mxu2 %v1799_v60 }
 0x55d   : > { %2009 = vmatmul.bf16.gmra.mxu3 %v1800_v30  ;;  %1767 = vadd.xlane.f32.xlu2 %v1766_v40 }
 0x55e   : > { %v1630_v52 = vpop.xlane.xlu0 %1629 }
 0x55f   : > { %v1667_v2 = vsub.f32 %v4114_v49, %v1630_v52  ;;  %v1668_v21 = vsub.f32 %v4116_v42, %v1630_v52 }
 0x561   : > { %v2892_v9 = vpop.eup %2891  ;;  %v1717_v37 = vmul.f32 1.442695, %v1667_v2  ;;  %v1719_v4 = vmul.f32 1.442695, %v1668_v21 }
 0x562   : > { %v2894_v47 = vpop.eup %2893 }
 0x563   : > { %2895 = vpow2.f32 %v1717_v37  ;;  %v1769_v1 = vadd.f32 %v2894_v47, %v2892_v9 }
 0x564   : > { %2897 = vpow2.f32 %v1719_v4 }
 0x565   : > { %1770 = vadd.xlane.f32.xlu0 %v1769_v1 }
 0x566   : > { %v1633_v56 = vpop.xlane.xlu1 %1632 }
 0x567   : > { %v1669_v36 = vsub.f32 %v4120_v18, %v1633_v56  ;;  %v1670_v53 = vsub.f32 %v4122_v54, %v1633_v56 }
 0x569   : > { %v2896_v32 = vpop.eup %2895  ;;  %v1721_v58 = vmul.f32 1.442695, %v1669_v36  ;;  %v1723_v44 = vmul.f32 1.442695, %v1670_v53 }
 0x56a   : > { %v2898_v46 = vpop.eup %2897  ;;  %v1801_v49 = vpack.c.bf16 %v2896_v32, %v2892_v9 }
 0x56b   : > { %2899 = vpow2.f32 %v1721_v58  ;;  %v1802_v42 = vpack.c.bf16 %v2898_v46, %v2894_v47  ;;  %v1772_v57 = vadd.f32 %v2898_v46, %v2896_v32 }
 0x56c   : > { %2901 = vpow2.f32 %v1723_v44  ;;  %1965 = vmatmul.bf16.gmra.mxu2 %v1801_v49 }
 0x56d   : > { %2014 = vmatmul.bf16.gmra.mxu3 %v1802_v42  ;;  %1773 = vadd.xlane.f32.xlu1 %v1772_v57 }
 0x56e   : > { %v1636_v5 = vpop.xlane.xlu2 %1635 }
 0x56f   : > { %v1671_v39 = vsub.f32 %v4126_v8, %v1636_v5  ;;  %v1672_v12 = vsub.f32 %v4128_v51, %v1636_v5 }
 0x571   : > { %v2900_v18 = vpop.eup %2899  ;;  %v1725_v48 = vmul.f32 1.442695, %v1671_v39  ;;  %v1727_v54 = vmul.f32 1.442695, %v1672_v12 }
 0x572   : > { %v2902_v15 = vpop.eup %2901 }
 0x573   : > { %2903 = vpow2.f32 %v1725_v48  ;;  %v1775_v7 = vadd.f32 %v2902_v15, %v2900_v18 }
 0x574   : > { %2905 = vpow2.f32 %v1727_v54 }
 0x575   : > { %1776 = vadd.xlane.f32.xlu2 %v1775_v7 }
 0x576   : > { %v1639_v55 = vpop.xlane.xlu0 %1638 }
 0x577   : > { %v1673_v3 = vsub.f32 %v4132_v19, %v1639_v55  ;;  %v1674_v13 = vsub.f32 %v4134_v45, %v1639_v55  ;;  %v2276_v55 = vld [vmem:[%s4196_s9] sm:$0xff] }
 0x579   : > { %v2904_v33 = vpop.eup %2903  ;;  %v1729_v16 = vmul.f32 1.442695, %v1673_v3  ;;  %v1731_v6 = vmul.f32 1.442695, %v1674_v13 }
 0x57a   : > { %v2906_v22 = vpop.eup %2905  ;;  %v1803_v8 = vpack.c.bf16 %v2904_v33, %v2900_v18 }
 0x57b   : > { %2907 = vpow2.f32 %v1729_v16  ;;  %v1804_v51 = vpack.c.bf16 %v2906_v22, %v2902_v15  ;;  %v1778_v24 = vadd.f32 %v2906_v22, %v2904_v33  ;;  %v4204_v33 = vld [vmem:[#allocation5] ss:$0 sm:$0xff] }
 0x57c   : > { %2909 = vpow2.f32 %v1731_v6  ;;  %1970 = vmatmul.bf16.gmra.mxu2 %v1803_v8 }
 0x57d   : > { %2019 = vmatmul.bf16.gmra.mxu3 %v1804_v51  ;;  %1779 = vadd.xlane.f32.xlu0 %v1778_v24 }
 0x57e   : > { %v1642_v41 = vpop.xlane.xlu1 %1641 }
 0x57f   : > { %v1675_v23 = vsub.f32 %v4138_v17, %v1642_v41  ;;  %v1676_v28 = vsub.f32 %v4140_v0, %v1642_v41 }
 0x581   : > { %v2908_v19 = vpop.eup %2907  ;;  %v1733_v31 = vmul.f32 1.442695, %v1675_v23  ;;  %v1735_v45 = vmul.f32 1.442695, %v1676_v28 }
 0x582   : > { %v2910_v34 = vpop.eup %2909 }
 0x583   : > { %2911 = vpow2.f32 %v1733_v31  ;;  %v1781_v25 = vadd.f32 %v2910_v34, %v2908_v19 }
 0x584   : > { %2913 = vpow2.f32 %v1735_v45 }
 0x585   : > { %1782 = vadd.xlane.f32.xlu1 %v1781_v25 }
 0x586   : > { %v1645_v59 = vpop.xlane.xlu2 %1644 }
 0x587   : > { %v1677_v26 = vsub.f32 %v4144_v11, %v1645_v59  ;;  %v1678_v62 = vsub.f32 %v4146_v20, %v1645_v59 }
 0x589   : > { %v2912_v38 = vpop.eup %2911  ;;  %v1737_v27 = vmul.f32 1.442695, %v1677_v26  ;;  %v1739_v43 = vmul.f32 1.442695, %v1678_v62  ;;  %v2277_v26 = vld [vmem:[%s4196_s9 + $0x8] sm:$0xff] }
 0x58a   : > { %v2914_v50 = vpop.eup %2913  ;;  %v1805_v17 = vpack.c.bf16 %v2912_v38, %v2908_v19 }
 0x58b   : > { %2915 = vpow2.f32 %v1737_v27  ;;  %v1806_v0 = vpack.c.bf16 %v2914_v50, %v2910_v34  ;;  %v1784_v10 = vadd.f32 %v2914_v50, %v2912_v38 }
 0x58c   : > { %2917 = vpow2.f32 %v1739_v43  ;;  %1975 = vmatmul.bf16.gmra.mxu2 %v1805_v17 }
 0x58d   : > { %2024 = vmatmul.bf16.gmra.mxu3 %v1806_v0  ;;  %1785 = vadd.xlane.f32.xlu2 %v1784_v10 }
 0x58e   : > { %v1648_v14 = vpop.xlane.xlu0 %1647 }
 0x58f   : > { %v1679_v29 = vsub.f32 %v4152_v61, %v1648_v14  ;;  %v1680_v63 = vsub.f32 %v4154_v35, %v1648_v14 }
 0x591   : > { %v2916_v11 = vpop.eup %2915  ;;  %v1741_v60 = vmul.f32 1.442695, %v1679_v29  ;;  %v1743_v20 = vmul.f32 1.442695, %v1680_v63 }
 0x592   : > { %v2918_v30 = vpop.eup %2917 }
 0x593   : > { %2919 = vpow2.f32 %v1741_v60  ;;  %v1787_v40 = vadd.f32 %v2918_v30, %v2916_v11 }
 0x594   : > { %2921 = vpow2.f32 %v1743_v20 }
 0x595   : > { %1788 = vadd.xlane.f32.xlu0 %v1787_v40 }
 0x598   : > { %v1747_v52 = vpop.xlane.xlu1 %1746 }
 0x599   : > { %v2920_v2 = vpop.eup %2919  ;;  %2923 = vrcp.f32 %v1747_v52  ;;  %v2046_v46 = vand.u32 2147483648, %v1747_v52  ;;  %vm2040_vm13 = vweird.f32 %v1747_v52  ;;  %v2044_v49 = vand.u32 2147483647, %v1747_v52 }
 0x59a   : > { %v2922_v21 = vpop.eup %2921  ;;  %v1807_v9 = vpack.c.bf16 %v2920_v2, %v2916_v11 }
 0x59b   : > { %v1808_v37 = vpack.c.bf16 %v2922_v21, %v2918_v30  ;;  %v1790_v4 = vadd.f32 %v2922_v21, %v2920_v2  ;;  %v2047_v48 = vor.u32 1.1754944e-38, %v2046_v46  ;;  %vm2045_vm15 = vcmp.eq.f32.partialorder %v2044_v49, 8.507059e+37  ;;  %v2278_v2 = vld [vmem:[%s4196_s9 + $0x10] sm:$0xff] }
 0x59c   : > { %1980 = vmatmul.bf16.gmra.mxu2 %v1807_v9 }
 0x59d   : > { %2029 = vmatmul.bf16.gmra.mxu3 %v1808_v37  ;;  %1791 = vadd.xlane.f32.xlu1 %v1790_v4 }
 0x59f   : > { %v2924_v61 = vpop.eup %2923 }
 0x5a0   : > { %v2036_v35 = vmul.f32 %v2924_v61, %v1747_v52  ;;  %v1750_v47 = vpop.xlane.xlu2 %1749  ;;  %vm2041_vm12 = vweird.f32 %v2924_v61 }
 0x5a1   : > { %2925 = vrcp.f32 %v1750_v47  ;;  %vm2042_vm14 = vmor %vm2040_vm13, %vm2041_vm12  ;;  %v2061_v6 = vand.u32 2147483648, %v1750_v47  ;;  %vm2055_vm1 = vweird.f32 %v1750_v47  ;;  %v2059_v8 = vand.u32 2147483647, %v1750_v47 }
 0x5a2   : > { %v2037_v1 = vsub.f32 1.0, %v2036_v35 }
 0x5a3   : > { %v2062_v45 = vor.u32 1.1754944e-38, %v2061_v6  ;;  %vm2060_vm3 = vcmp.eq.f32.partialorder %v2059_v8, 8.507059e+37 }
 0x5a4   : > { %v2038_v36 = vmul.f32 %v2924_v61, %v2037_v1 }
 0x5a6   : > { %v2039_v44 = vadd.f32 %v2924_v61, %v2038_v36 }
 0x5a7   : > { %v2926_v56 = vpop.eup %2925 }
 0x5a8   : > { %v2051_v53 = vmul.f32 %v2926_v56, %v1750_v47  ;;  %v4188_v32 = vpop.xlane.xlu0 %1752  ;;  %v2043_v39 = vsel %vm2042_vm14, %v2924_v61, %v2039_v44  ;;  %vm2056_vm0 = vweird.f32 %v2926_v56 }
 0x5a9   : > { %2927 = vrcp.f32 %v4188_v32  ;;  %v2048_v7 = vsel %vm2045_vm15, %v2047_v48, %v2043_v39  ;;  %vm2057_vm2 = vmor %vm2055_vm1, %vm2056_vm0  ;;  %v2076_v43 = vand.u32 2147483648, %v4188_v32  ;;  %vm2070_vm5 = vweird.f32 %v4188_v32 }
 0x5aa   : > { %v2052_v58 = vsub.f32 1.0, %v2051_v53  ;;  %v2074_v17 = vand.u32 2147483647, %v4188_v32 }
 0x5ab   : > { %v2077_v20 = vor.u32 1.1754944e-38, %v2076_v43 }
 0x5ac   : > { %v2053_v57 = vmul.f32 %v2926_v56, %v2052_v58  ;;  %vm2075_vm7 = vcmp.eq.f32.partialorder %v2074_v17, 8.507059e+37 }
 0x5ae   : > { %v2054_v16 = vadd.f32 %v2926_v56, %v2053_v57  ;;  %v2279_v57 = vld [vmem:[%s4196_s9 + $0x18] sm:$0xff] }
 0x5af   : > { %v4191_v42 = vpop.eup %2927  ;;  %v1946_v5 = vpop.f32.mrf.mxu2 }
 0x5b0   : > { %v2066_v12 = vmul.f32 %v4191_v42, %v4188_v32  ;;  %v1995_v18 = vpop.f32.mrf.mxu3  ;;  %v4200_v54 = vpop.xlane.xlu1 %1755  ;;  %v2058_v28 = vsel %vm2057_vm2, %v2926_v56, %v2054_v16  ;;  %vm2071_vm4 = vweird.f32 %v4191_v42 }
 0x5b1   : > { %v1996_v15 = vadd.f32 %v1995_v18, %v1946_v5  ;;  %2929 = vrcp.f32 %v4200_v54  ;;  %v2063_v59 = vsel %vm2060_vm3, %v2062_v45, %v2058_v28  ;;  %vm2072_vm6 = vmor %vm2070_vm5, %vm2071_vm4  ;;  %v2091_v4 = vand.u32 2147483648, %v4200_v54 }
 0x5b2   : > { %v2067_v3 = vsub.f32 1.0, %v2066_v12  ;;  %vm2085_vm9 = vweird.f32 %v4200_v54  ;;  %v2089_v35 = vand.u32 2147483647, %v4200_v54 }
 0x5b3   : > { %v2049_v13 = vmul.f32 %v2048_v7, %v1996_v15  ;;  %v2092_v44 = vor.u32 1.1754944e-38, %v2091_v4 }
 0x5b4   : > { %v2068_v24 = vmul.f32 %v4191_v42, %v2067_v3  ;;  %vm2090_vm12 = vcmp.eq.f32.partialorder %v2089_v35, 8.507059e+37 }
 0x5b5   : > { %v2292_v22 = vadd.f32 %v2276_v55, %v2049_v13 }
 0x5b6   : > { %v2069_v27 = vadd.f32 %v4191_v42, %v2068_v24 }
 0x5b7   : > { %v4206_v51 = vpop.eup %2929  ;;  %v2312_v41 = vadd.f32 %v4204_v33, %v2292_v22  ;;  %v1948_v23 = vpop.f32.mrf.mxu2 }
 0x5b8   : > { %v2081_v19 = vmul.f32 %v4206_v51, %v4200_v54  ;;  %v1997_v31 = vpop.f32.mrf.mxu3  ;;  %v4212_v34 = vpop.xlane.xlu2 %1758  ;;  %v2073_v63 = vsel %vm2072_vm6, %v4191_v42, %v2069_v27  ;;  %vm2086_vm8 = vweird.f32 %v4206_v51 }
 0x5b9   : > { %2328 = vst.msk [vmem:[%s3066_s10] sm:$0xff] %vm1473_vm11, %v2312_v41  ;;  %v1998_v25 = vadd.f32 %v1997_v31, %v1948_v23  ;;  %2931 = vrcp.f32 %v4212_v34  ;;  %v2078_v52 = vsel %vm2075_vm7, %v2077_v20, %v2073_v63  ;;  %vm2087_vm10 = vmor %vm2085_vm9, %vm2086_vm8  ;;  %v2106_v18 = vand.u32 2147483648, %v4212_v34  ;;  %v2280_v41 = vld [vmem:[%s4196_s9 + $0x20] sm:$0xff] }
 0x5ba   : > { %v2082_v62 = vsub.f32 1.0, %v2081_v19  ;;  %vm2100_vm14 = vweird.f32 %v4212_v34  ;;  %v2104_v54 = vand.u32 2147483647, %v4212_v34 }
 0x5bb   : > { %v2064_v38 = vmul.f32 %v2063_v59, %v1998_v25  ;;  %v2107_v22 = vor.u32 1.1754944e-38, %v2106_v18 }
 0x5bc   : > { %v2083_v10 = vmul.f32 %v4206_v51, %v2082_v62  ;;  %vm2105_vm0 = vcmp.eq.f32.partialorder %v2104_v54, 8.507059e+37 }
 0x5bd   : > { %v2293_v50 = vadd.f32 %v2277_v26, %v2064_v38 }
 0x5be   : > { %v2084_v37 = vadd.f32 %v4206_v51, %v2083_v10 }
 0x5bf   : > { %v4223_v0 = vpop.eup %2931  ;;  %v2313_v14 = vadd.f32 %v4204_v33, %v2293_v50  ;;  %v1951_v29 = vpop.f32.mrf.mxu2 }
 0x5c0   : > { %v2096_v11 = vmul.f32 %v4223_v0, %v4212_v34  ;;  %v2000_v60 = vpop.f32.mrf.mxu3  ;;  %v4230_v30 = vpop.xlane.xlu0 %1761  ;;  %v2088_v53 = vsel %vm2087_vm10, %v4206_v51, %v2084_v37  ;;  %vm2101_vm13 = vweird.f32 %v4223_v0 }
 0x5c1   : > { %2329 = vst.msk [vmem:[%s3066_s10 + $0x8] sm:$0xff] %vm1473_vm11, %v2313_v14  ;;  %v2001_v40 = vadd.f32 %v2000_v60, %v1951_v29  ;;  %2933 = vrcp.f32 %v4230_v30  ;;  %v2093_v42 = vsel %vm2090_vm12, %v2092_v44, %v2088_v53  ;;  %vm2102_vm15 = vmor %vm2100_vm14, %vm2101_vm13  ;;  %v2121_v31 = vand.u32 2147483648, %v4230_v30  ;;  %v2281_v14 = vld [vmem:[%s4196_s9 + $0x28] sm:$0xff] }
 0x5c2   : > { %v2097_v21 = vsub.f32 1.0, %v2096_v11  ;;  %vm2115_vm2 = vweird.f32 %v4230_v30  ;;  %v2119_v34 = vand.u32 2147483647, %v4230_v30 }
 0x5c3   : > { %v2079_v9 = vmul.f32 %v2078_v52, %v2001_v40  ;;  %v2122_v50 = vor.u32 1.1754944e-38, %v2121_v31 }
 0x5c4   : > { %v2098_v1 = vmul.f32 %v4223_v0, %v2097_v21  ;;  %vm2120_vm4 = vcmp.eq.f32.partialorder %v2119_v34, 8.507059e+37 }
 0x5c5   : > { %v2294_v61 = vadd.f32 %v2278_v2, %v2079_v9 }
 0x5c6   : > { %v2099_v12 = vadd.f32 %v4223_v0, %v2098_v1 }
 0x5c7   : > { %v4241_v47 = vpop.eup %2933  ;;  %v2314_v56 = vadd.f32 %v4204_v33, %v2294_v61  ;;  %v1953_v36 = vpop.f32.mrf.mxu2 }
 0x5c8   : > { %v2111_v32 = vmul.f32 %v4241_v47, %v4230_v30  ;;  %v2002_v58 = vpop.f32.mrf.mxu3  ;;  %v4248_v46 = vpop.xlane.xlu1 %1764  ;;  %v2103_v13 = vsel %vm2102_vm15, %v4223_v0, %v2099_v12  ;;  %vm2116_vm1 = vweird.f32 %v4241_v47 }
 0x5c9   : > { %2330 = vst.msk [vmem:[%s3066_s10 + $0x10] sm:$0xff] %vm1473_vm11, %v2314_v56  ;;  %v2003_v49 = vadd.f32 %v2002_v58, %v1953_v36  ;;  %2935 = vrcp.f32 %v4248_v46  ;;  %v2108_v24 = vsel %vm2105_vm0, %v2107_v22, %v2103_v13  ;;  %vm2117_vm3 = vmor %vm2115_vm2, %vm2116_vm1  ;;  %v2136_v60 = vand.u32 2147483648, %v4248_v46  ;;  %v2282_v56 = vld [vmem:[%s4196_s9 + $0x30] sm:$0xff] }
 0x5ca   : > { %v2112_v5 = vsub.f32 1.0, %v2111_v32  ;;  %vm2130_vm6 = vweird.f32 %v4248_v46  ;;  %v2134_v30 = vand.u32 2147483647, %v4248_v46 }
 0x5cb   : > { %v2094_v39 = vmul.f32 %v2093_v42, %v2003_v49  ;;  %v2137_v61 = vor.u32 1.1754944e-38, %v2136_v60 }
 0x5cc   : > { %v2113_v7 = vmul.f32 %v4241_v47, %v2112_v5  ;;  %vm2135_vm8 = vcmp.eq.f32.partialorder %v2134_v30, 8.507059e+37 }
 0x5cd   : > { %v2295_v48 = vadd.f32 %v2279_v57, %v2094_v39 }
 0x5ce   : > { %v2114_v19 = vadd.f32 %v4241_v47, %v2113_v7 }
 0x5cf   : > { %v4259_v15 = vpop.eup %2935  ;;  %v2315_v55 = vadd.f32 %v4204_v33, %v2295_v48  ;;  %v1956_v3 = vpop.f32.mrf.mxu2 }
 0x5d0   : > { %v2126_v16 = vmul.f32 %v4259_v15, %v4248_v46  ;;  %v2005_v6 = vpop.f32.mrf.mxu3  ;;  %v4266_v8 = vpop.xlane.xlu2 %1767  ;;  %v2118_v38 = vsel %vm2117_vm3, %v4241_v47, %v2114_v19  ;;  %vm2131_vm5 = vweird.f32 %v4259_v15 }
 0x5d1   : > { %2331 = vst.msk [vmem:[%s3066_s10 + $0x18] sm:$0xff] %vm1473_vm11, %v2315_v55  ;;  %v2006_v51 = vadd.f32 %v2005_v6, %v1956_v3  ;;  %2937 = vrcp.f32 %v4266_v8  ;;  %v2123_v10 = vsel %vm2120_vm4, %v2122_v50, %v2118_v38  ;;  %vm2132_vm7 = vmor %vm2130_vm6, %vm2131_vm5  ;;  %v2151_v58 = vand.u32 2147483648, %v4266_v8  ;;  %v2283_v55 = vld [vmem:[%s4196_s9 + $0x38] sm:$0xff] }
 0x5d2   : > { %v2127_v23 = vsub.f32 1.0, %v2126_v16  ;;  %vm2145_vm10 = vweird.f32 %v4266_v8  ;;  %v2149_v46 = vand.u32 2147483647, %v4266_v8 }
 0x5d3   : > { %v2109_v28 = vmul.f32 %v2108_v24, %v2006_v51  ;;  %v2152_v48 = vor.u32 1.1754944e-38, %v2151_v58 }
 0x5d4   : > { %v2128_v59 = vmul.f32 %v4259_v15, %v2127_v23  ;;  %vm2150_vm13 = vcmp.eq.f32.partialorder %v2149_v46, 8.507059e+37 }
 0x5d5   : > { %v2296_v45 = vadd.f32 %v2280_v41, %v2109_v28 }
 0x5d6   : > { %v2129_v11 = vadd.f32 %v4259_v15, %v2128_v59 }
 0x5d7   : > { %v4277_v25 = vpop.eup %2937  ;;  %v2316_v26 = vadd.f32 %v4204_v33, %v2296_v45  ;;  %v1958_v62 = vpop.f32.mrf.mxu2 }
 0x5d8   : > { %v2141_v27 = vmul.f32 %v4277_v25, %v4266_v8  ;;  %v2007_v43 = vpop.f32.mrf.mxu3  ;;  %v4284_v17 = vpop.xlane.xlu0 %1770  ;;  %v2133_v9 = vsel %vm2132_vm7, %v4259_v15, %v2129_v11  ;;  %vm2146_vm9 = vweird.f32 %v4277_v25 }
 0x5d9   : > { %2332 = vst.msk [vmem:[%s3066_s10 + $0x20] sm:$0xff] %vm1473_vm11, %v2316_v26  ;;  %v2008_v0 = vadd.f32 %v2007_v43, %v1958_v62  ;;  %2939 = vrcp.f32 %v4284_v17  ;;  %v2138_v1 = vsel %vm2135_vm8, %v2137_v61, %v2133_v9  ;;  %vm2147_vm12 = vmor %vm2145_vm10, %vm2146_vm9  ;;  %v2166_v6 = vand.u32 2147483648, %v4284_v17  ;;  %v2284_v26 = vld [vmem:[%s4196_s9 + $0x40] sm:$0xff] }
 0x5da   : > { %v2142_v29 = vsub.f32 1.0, %v2141_v27  ;;  %vm2160_vm15 = vweird.f32 %v4284_v17  ;;  %v2164_v8 = vand.u32 2147483647, %v4284_v17 }
 0x5db   : > { %v2124_v63 = vmul.f32 %v2123_v10, %v2008_v0  ;;  %v2167_v45 = vor.u32 1.1754944e-38, %v2166_v6 }
 0x5dc   : > { %v2143_v52 = vmul.f32 %v4277_v25, %v2142_v29  ;;  %vm2165_vm1 = vcmp.eq.f32.partialorder %v2164_v8, 8.507059e+37 }
 0x5dd   : > { %v2297_v20 = vadd.f32 %v2281_v14, %v2124_v63 }
 0x5de   : > { %v2144_v32 = vadd.f32 %v4277_v25, %v2143_v52 }
 0x5df   : > { %v4295_v40 = vpop.eup %2939  ;;  %v2317_v2 = vadd.f32 %v4204_v33, %v2297_v20  ;;  %v1961_v21 = vpop.f32.mrf.mxu2 }
 0x5e0   : > { %v2156_v37 = vmul.f32 %v4295_v40, %v4284_v17  ;;  %v2010_v4 = vpop.f32.mrf.mxu3  ;;  %v4302_v35 = vpop.xlane.xlu1 %1773  ;;  %v2148_v39 = vsel %vm2147_vm12, %v4277_v25, %v2144_v32  ;;  %vm2161_vm14 = vweird.f32 %v4295_v40 }
 0x5e1   : > { %2333 = vst.msk [vmem:[%s3066_s10 + $0x28] sm:$0xff] %vm1473_vm11, %v2317_v2  ;;  %v2011_v47 = vadd.f32 %v2010_v4, %v1961_v21  ;;  %2941 = vrcp.f32 %v4302_v35  ;;  %v2153_v7 = vsel %vm2150_vm13, %v2152_v48, %v2148_v39  ;;  %vm2162_vm0 = vmor %vm2160_vm15, %vm2161_vm14  ;;  %v2181_v43 = vand.u32 2147483648, %v4302_v35  ;;  %v2285_v2 = vld [vmem:[%s4196_s9 + $0x48] sm:$0xff] }
 0x5e2   : > { %v2157_v36 = vsub.f32 1.0, %v2156_v37  ;;  %vm2175_vm3 = vweird.f32 %v4302_v35  ;;  %v2179_v17 = vand.u32 2147483647, %v4302_v35 }
 0x5e3   : > { %v2139_v53 = vmul.f32 %v2138_v1, %v2011_v47  ;;  %v2182_v20 = vor.u32 1.1754944e-38, %v2181_v43 }
 0x5e4   : > { %v2158_v42 = vmul.f32 %v4295_v40, %v2157_v36  ;;  %vm2180_vm5 = vcmp.eq.f32.partialorder %v2179_v17, 8.507059e+37 }
 0x5e5   : > { %v2298_v44 = vadd.f32 %v2282_v56, %v2139_v53 }
 0x5e6   : > { %v2159_v16 = vadd.f32 %v4295_v40, %v2158_v42 }
 0x5e7   : > { %v4313_v49 = vpop.eup %2941  ;;  %v2318_v57 = vadd.f32 %v4204_v33, %v2298_v44  ;;  %v1963_v5 = vpop.f32.mrf.mxu2 }
 0x5e8   : > { %v2171_v12 = vmul.f32 %v4313_v49, %v4302_v35  ;;  %v2012_v18 = vpop.f32.mrf.mxu3  ;;  %v4320_v54 = vpop.xlane.xlu2 %1776  ;;  %v2163_v28 = vsel %vm2162_vm0, %v4295_v40, %v2159_v16  ;;  %vm2176_vm2 = vweird.f32 %v4313_v49 }
 0x5e9   : > { %2334 = vst.msk [vmem:[%s3066_s10 + $0x30] sm:$0xff] %vm1473_vm11, %v2318_v57  ;;  %v2013_v15 = vadd.f32 %v2012_v18, %v1963_v5  ;;  %2943 = vrcp.f32 %v4320_v54  ;;  %v2168_v59 = vsel %vm2165_vm1, %v2167_v45, %v2163_v28  ;;  %vm2177_vm4 = vmor %vm2175_vm3, %vm2176_vm2  ;;  %v2196_v4 = vand.u32 2147483648, %v4320_v54  ;;  %v2286_v57 = vld [vmem:[%s4196_s9 + $0x50] sm:$0xff] }
 0x5ea   : > { %v2172_v3 = vsub.f32 1.0, %v2171_v12  ;;  %vm2190_vm7 = vweird.f32 %v4320_v54  ;;  %v2194_v35 = vand.u32 2147483647, %v4320_v54 }
 0x5eb   : > { %v2154_v13 = vmul.f32 %v2153_v7, %v2013_v15  ;;  %v2197_v44 = vor.u32 1.1754944e-38, %v2196_v4 }
 0x5ec   : > { %v2173_v24 = vmul.f32 %v4313_v49, %v2172_v3  ;;  %vm2195_vm9 = vcmp.eq.f32.partialorder %v2194_v35, 8.507059e+37 }
 0x5ed   : > { %v2299_v22 = vadd.f32 %v2283_v55, %v2154_v13 }
 0x5ee   : > { %v2174_v27 = vadd.f32 %v4313_v49, %v2173_v24 }
 0x5ef   : > { %v4331_v51 = vpop.eup %2943  ;;  %v2319_v41 = vadd.f32 %v4204_v33, %v2299_v22  ;;  %v1966_v23 = vpop.f32.mrf.mxu2 }
 0x5f0   : > { %v2186_v19 = vmul.f32 %v4331_v51, %v4320_v54  ;;  %v2015_v31 = vpop.f32.mrf.mxu3  ;;  %v4338_v34 = vpop.xlane.xlu0 %1779  ;;  %v2178_v63 = vsel %vm2177_vm4, %v4313_v49, %v2174_v27  ;;  %vm2191_vm6 = vweird.f32 %v4331_v51 }
 0x5f1   : > { %2335 = vst.msk [vmem:[%s3066_s10 + $0x38] sm:$0xff] %vm1473_vm11, %v2319_v41  ;;  %v2016_v25 = vadd.f32 %v2015_v31, %v1966_v23  ;;  %2945 = vrcp.f32 %v4338_v34  ;;  %v2183_v52 = vsel %vm2180_vm5, %v2182_v20, %v2178_v63  ;;  %vm2192_vm8 = vmor %vm2190_vm7, %vm2191_vm6  ;;  %v2211_v18 = vand.u32 2147483648, %v4338_v34  ;;  %v2287_v41 = vld [vmem:[%s4196_s9 + $0x58] sm:$0xff] }
 0x5f2   : > { %v2187_v62 = vsub.f32 1.0, %v2186_v19  ;;  %vm2205_vm12 = vweird.f32 %v4338_v34  ;;  %v2209_v54 = vand.u32 2147483647, %v4338_v34 }
 0x5f3   : > { %v2169_v38 = vmul.f32 %v2168_v59, %v2016_v25  ;;  %v2212_v22 = vor.u32 1.1754944e-38, %v2211_v18 }
 0x5f4   : > { %v2188_v10 = vmul.f32 %v4331_v51, %v2187_v62  ;;  %vm2210_vm14 = vcmp.eq.f32.partialorder %v2209_v54, 8.507059e+37 }
 0x5f5   : > { %v2300_v50 = vadd.f32 %v2284_v26, %v2169_v38 }
 0x5f6   : > { %v2189_v37 = vadd.f32 %v4331_v51, %v2188_v10 }
 0x5f7   : > { %v4349_v0 = vpop.eup %2945  ;;  %v2320_v14 = vadd.f32 %v4204_v33, %v2300_v50  ;;  %v1968_v29 = vpop.f32.mrf.mxu2 }
 0x5f8   : > { %v2201_v11 = vmul.f32 %v4349_v0, %v4338_v34  ;;  %v2017_v60 = vpop.f32.mrf.mxu3  ;;  %v4356_v30 = vpop.xlane.xlu1 %1782  ;;  %v2193_v53 = vsel %vm2192_vm8, %v4331_v51, %v2189_v37  ;;  %vm2206_vm10 = vweird.f32 %v4349_v0 }
 0x5f9   : > { %2336 = vst.msk [vmem:[%s3066_s10 + $0x40] sm:$0xff] %vm1473_vm11, %v2320_v14  ;;  %v2018_v40 = vadd.f32 %v2017_v60, %v1968_v29  ;;  %2947 = vrcp.f32 %v4356_v30  ;;  %v2198_v42 = vsel %vm2195_vm9, %v2197_v44, %v2193_v53  ;;  %vm2207_vm13 = vmor %vm2205_vm12, %vm2206_vm10  ;;  %v2226_v31 = vand.u32 2147483648, %v4356_v30  ;;  %v2288_v14 = vld [vmem:[%s4196_s9 + $0x60] sm:$0xff] }
 0x5fa   : > { %v2202_v21 = vsub.f32 1.0, %v2201_v11  ;;  %vm2220_vm0 = vweird.f32 %v4356_v30  ;;  %v2224_v34 = vand.u32 2147483647, %v4356_v30 }
 0x5fb   : > { %v2184_v9 = vmul.f32 %v2183_v52, %v2018_v40  ;;  %v2227_v50 = vor.u32 1.1754944e-38, %v2226_v31 }
 0x5fc   : > { %v2203_v1 = vmul.f32 %v4349_v0, %v2202_v21  ;;  %vm2225_vm2 = vcmp.eq.f32.partialorder %v2224_v34, 8.507059e+37 }
 0x5fd   : > { %v2301_v61 = vadd.f32 %v2285_v2, %v2184_v9 }
 0x5fe   : > { %v2204_v12 = vadd.f32 %v4349_v0, %v2203_v1  ;;  %v2289_v1 = vld [vmem:[%s4196_s9 + $0x68] sm:$0xff] }
 0x5ff   : > { %v4367_v47 = vpop.eup %2947  ;;  %v2321_v56 = vadd.f32 %v4204_v33, %v2301_v61  ;;  %v1971_v36 = vpop.f32.mrf.mxu2 }
 0x600   : > { %v2216_v32 = vmul.f32 %v4367_v47, %v4356_v30  ;;  %v2020_v58 = vpop.f32.mrf.mxu3  ;;  %v4374_v46 = vpop.xlane.xlu2 %1785  ;;  %v2208_v13 = vsel %vm2207_vm13, %v4349_v0, %v2204_v12  ;;  %vm2221_vm15 = vweird.f32 %v4367_v47 }
 0x601   : > { %2337 = vst.msk [vmem:[%s3066_s10 + $0x48] sm:$0xff] %vm1473_vm11, %v2321_v56  ;;  %v2021_v49 = vadd.f32 %v2020_v58, %v1971_v36  ;;  %2949 = vrcp.f32 %v4374_v46  ;;  %v2213_v24 = vsel %vm2210_vm14, %v2212_v22, %v2208_v13  ;;  %vm2222_vm1 = vmor %vm2220_vm0, %vm2221_vm15  ;;  %v2241_v60 = vand.u32 2147483648, %v4374_v46 }
 0x602   : > { %v2217_v5 = vsub.f32 1.0, %v2216_v32  ;;  %vm2235_vm4 = vweird.f32 %v4374_v46  ;;  %v2239_v20 = vand.u32 2147483647, %v4374_v46 }
 0x603   : > { %v2199_v39 = vmul.f32 %v2198_v42, %v2021_v49  ;;  %v2242_v37 = vor.u32 1.1754944e-38, %v2241_v60 }
 0x604   : > { %v2218_v7 = vmul.f32 %v4367_v47, %v2217_v5  ;;  %vm2240_vm6 = vcmp.eq.f32.partialorder %v2239_v20, 8.507059e+37 }
 0x605   : > { %v2302_v48 = vadd.f32 %v2286_v57, %v2199_v39 }
 0x606   : > { %v2219_v19 = vadd.f32 %v4367_v47, %v2218_v7 }
 0x607   : > { %v2950_v15 = vpop.eup %2949  ;;  %v2322_v55 = vadd.f32 %v4204_v33, %v2302_v48  ;;  %v1973_v3 = vpop.f32.mrf.mxu2  ;;  %v2290_v48 = vld [vmem:[%s4196_s9 + $0x70] sm:$0xff] }
 0x608   : > { %v2231_v16 = vmul.f32 %v2950_v15, %v4374_v46  ;;  %v2022_v6 = vpop.f32.mrf.mxu3  ;;  %v4389_v8 = vpop.xlane.xlu0 %1788  ;;  %v2223_v38 = vsel %vm2222_vm1, %v4367_v47, %v2219_v19  ;;  %vm2236_vm3 = vweird.f32 %v2950_v15 }
 0x609   : > { %2338 = vst.msk [vmem:[%s3066_s10 + $0x50] sm:$0xff] %vm1473_vm11, %v2322_v55  ;;  %v2023_v51 = vadd.f32 %v2022_v6, %v1973_v3  ;;  %2951 = vrcp.f32 %v4389_v8  ;;  %v2228_v10 = vsel %vm2225_vm2, %v2227_v50, %v2223_v38  ;;  %vm2237_vm5 = vmor %vm2235_vm4, %vm2236_vm3  ;;  %v2256_v32 = vand.u32 2147483648, %v4389_v8 }
 0x60a   : > { %v2232_v23 = vsub.f32 1.0, %v2231_v16  ;;  %vm2250_vm8 = vweird.f32 %v4389_v8  ;;  %v2254_v58 = vand.u32 2147483647, %v4389_v8 }
 0x60b   : > { %v2214_v28 = vmul.f32 %v2213_v24, %v2023_v51  ;;  %v2257_v5 = vor.u32 1.1754944e-38, %v2256_v32 }
 0x60c   : > { %v2233_v59 = vmul.f32 %v2950_v15, %v2232_v23  ;;  %vm2255_vm10 = vcmp.eq.f32.partialorder %v2254_v58, 8.507059e+37 }
 0x60d   : > { %v2303_v45 = vadd.f32 %v2287_v41, %v2214_v28  ;;  %v2291_v41 = vld [vmem:[%s4196_s9 + $0x78] sm:$0xff] }
 0x60e   : > { %v2234_v11 = vadd.f32 %v2950_v15, %v2233_v59 }
 0x60f   : > { %v2952_v25 = vpop.eup %2951  ;;  %v2323_v26 = vadd.f32 %v4204_v33, %v2303_v45  ;;  %v1976_v62 = vpop.f32.mrf.mxu2 }
 0x610   : > { %v2246_v27 = vmul.f32 %v2952_v25, %v4389_v8  ;;  %v2025_v43 = vpop.f32.mrf.mxu3  ;;  %v4403_v17 = vpop.xlane.xlu1 %1791  ;;  %v2238_v9 = vsel %vm2237_vm5, %v2950_v15, %v2234_v11  ;;  %vm2251_vm7 = vweird.f32 %v2952_v25 }
 0x611   : > { %2339 = vst.msk [vmem:[%s3066_s10 + $0x58] sm:$0xff] %vm1473_vm11, %v2323_v26  ;;  %v2026_v0 = vadd.f32 %v2025_v43, %v1976_v62  ;;  %2953 = vrcp.f32 %v4403_v17  ;;  %v2243_v47 = vsel %vm2240_vm6, %v2242_v37, %v2238_v9  ;;  %vm2252_vm9 = vmor %vm2250_vm8, %vm2251_vm7  ;;  %v2271_v7 = vand.u32 2147483648, %v4403_v17 }
 0x612   : > { %v2247_v29 = vsub.f32 1.0, %v2246_v27  ;;  %vm2265_vm13 = vweird.f32 %v4403_v17  ;;  %v2269_v55 = vand.u32 2147483647, %v4403_v17 }
 0x613   : > { %v2229_v63 = vmul.f32 %v2228_v10, %v2026_v0  ;;  %v2272_v22 = vor.u32 1.1754944e-38, %v2271_v7 }
 0x614   : > { %v2248_v52 = vmul.f32 %v2952_v25, %v2247_v29  ;;  %vm2270_vm15 = vcmp.eq.f32.partialorder %v2269_v55, 8.507059e+37 }
 0x615   : > { %v2304_v30 = vadd.f32 %v2288_v14, %v2229_v63 }
 0x616   : > { %v2249_v53 = vadd.f32 %v2952_v25, %v2248_v52 }
 0x617   : > { %v2954_v40 = vpop.eup %2953  ;;  %v2324_v2 = vadd.f32 %v4204_v33, %v2304_v30  ;;  %v1978_v21 = vpop.f32.mrf.mxu2 }
 0x618   : > { %v2261_v4 = vmul.f32 %v2954_v40, %v4403_v17  ;;  %v2027_v61 = vpop.f32.mrf.mxu3  ;;  %v2253_v57 = vsel %vm2252_vm9, %v2952_v25, %v2249_v53  ;;  %vm2266_vm12 = vweird.f32 %v2954_v40 }
 0x619   : > { %2340 = vst.msk [vmem:[%s3066_s10 + $0x60] sm:$0xff] %vm1473_vm11, %v2324_v2  ;;  %v2028_v35 = vadd.f32 %v2027_v61, %v1978_v21  ;;  %v2258_v18 = vsel %vm2255_vm10, %v2257_v5, %v2253_v57  ;;  %vm2267_vm14 = vmor %vm2265_vm13, %vm2266_vm12 }
 0x61a   : > { %v2262_v56 = vsub.f32 1.0, %v2261_v4 }
 0x61b   : > { %v2244_v36 = vmul.f32 %v2243_v47, %v2028_v35 }
 0x61c   : > { %v2263_v46 = vmul.f32 %v2954_v40, %v2262_v56 }
 0x61d   : > { %v2305_v44 = vadd.f32 %v2289_v1, %v2244_v36 }
 0x61e   : > { %v2264_v15 = vadd.f32 %v2954_v40, %v2263_v46 }
 0x61f   : > { %v2325_v49 = vadd.f32 %v4204_v33, %v2305_v44  ;;  %v1981_v42 = vpop.f32.mrf.mxu2 }
 0x620   : > { %v2030_v39 = vpop.f32.mrf.mxu3  ;;  %v2268_v6 = vsel %vm2267_vm14, %v2954_v40, %v2264_v15 }
 0x621   : > { %2341 = vst.msk [vmem:[%s3066_s10 + $0x68] sm:$0xff] %vm1473_vm11, %v2325_v49  ;;  %v2031_v12 = vadd.f32 %v2030_v39, %v1981_v42  ;;  %v2273_v24 = vsel %vm2270_vm15, %v2272_v22, %v2268_v6 }
 0x623   : > { %v2259_v54 = vmul.f32 %v2258_v18, %v2031_v12 }
 0x625   : > { %v2306_v3 = vadd.f32 %v2290_v48, %v2259_v54 }
 0x627   : > { %v2326_v13 = vadd.f32 %v4204_v33, %v2306_v3  ;;  %v1983_v16 = vpop.f32.mrf.mxu2 }
 0x628   : > { %v2032_v8 = vpop.f32.mrf.mxu3 }
 0x629   : > { %2342 = vst.msk [vmem:[%s3066_s10 + $0x70] sm:$0xff] %vm1473_vm11, %v2326_v13  ;;  %v2033_v51 = vadd.f32 %v2032_v8, %v1983_v16 }
 0x62b   : > { %v2274_v23 = vmul.f32 %v2273_v24, %v2033_v51 }
 0x62d   : > { %v2307_v28 = vadd.f32 %v2291_v41, %v2274_v23 }
 0x62f   : > { %v2327_v19 = vadd.f32 %v4204_v33, %v2307_v28 }
 0x631   : > { %2343 = vst.msk [vmem:[%s3066_s10 + $0x78] sm:$0xff] %vm1473_vm11, %v2327_v19 }
 0x632 PF: > { %s15_s22 = sadd.s32 1, %s2993_s22   ;;  %s4568_s18 = smov %s2985_s20 }
 0x633   : > { %p12_p8 = scmp.ge.s32.totalorder %s15_s22, 6   ;;  %s4569_s19 = smov %s2989_s21 }
 0x634   : > { %s4570_s20 = smov %s4573_s23  ;;  %s4571_s21 = smov %s4577_s24 }
 0x635   :  { %14 = sbr.rel (!%p12_p8) target bundleno = 3 (0x3), region = 76 }

// kernel: tpu_custom_call.1
= control target key start
LH: loop header
LB: loop body
LE: loop exit
PB: predicated region body
PF: predicated region fallthrough
CT: control target
= control target key end

     0   :  { %s3025_s18 = smov 0   ;;  %s3027_s19 = smov 0   ;;  %s4449_s0 = inlined_call_operand.vmem [shape: f32[2,256,4], index: 0, kind: input, shape index: {}]   ;;  %s4450_s1 = inlined_call_operand.vmem [shape: f32[4,4], index: 1, kind: input, shape index: {}]   ;;  %s4451_s2 = inlined_call_operand.vmem [shape: f32[4,4], index: 2, kind: input, shape index: {}]   ;;  %s4452_s3 = inlined_call_operand.vmem [shape: f32[4,4], index: 3, kind: input, shape index: {}]   ;;  %s4453_s4 = inlined_call_operand.vmem [shape: f32[3,4], index: 4, kind: input, shape index: {}]   ;;  %s4454_s5 = inlined_call_operand.vmem [shape: f32[2,256,4], index: 5, kind: output, shape index: {}]  }
   0x1   :  { %s3029_s20 = smov 0   ;;  %s3031_s21 = smov 0  }
   0x2   :  { %s3033_s22 = smov 0  }
   0x3 LB: > { %s24_s23 = sadd.s32 1, %s2985_s20  ;;  %s27_s24 = sadd.s32 1, %s2989_s21  ;;  %s2993_s22 = sphi %s3033_s22, %s15_s22   ;;  %s2989_s21 = sphi %s3031_s21, %s4571_s21   ;;  %s2985_s20 = sphi %s3029_s20, %s4570_s20   ;;  %s2981_s19 = sphi %s3027_s19, %s4569_s19   ;;  %s2977_s18 = sphi %s3025_s18, %s4568_s18  }
   0x4   : > { %p25_p0 = scmp.ge.s32.totalorder %s24_s23, 2  ;;  %p2436_p1 = scmp.ge.s32.totalorder %s2993_s22, 1 }
   0x5   : > { %p201_p2 = scmp.lt.s32.totalorder %s2993_s22, 5 }
   0x6   : > { %s4573_s23 = smov (%p25_p0, %s24_s23), 0  ;;  %s4575_s24 = smov (!%p25_p0, %s27_s24), %s2989_s21 }
   0x7   : > { %p202_p3 = pnand %p2436_p1, %p201_p2  ;;  %p29_p4 = scmp.ge.s32.totalorder %s4575_s24, 2 }
   0x8   : > { %p233_p5 = scmp.lt.s32.totalorder (!%p202_p3), %s2981_s19, 1  ;;  %s2439_s25 = sshll.u32 (!%p202_p3), %s2977_s18, 4 }
   0x9   : > { %s4577_s24 = smov (%p29_p4, %s4575_s24), 0  ;;  %205 = sbr.rel (%p202_p3) target bundleno = 1586 (0x632), region = 40 }
   0xa   : > { %p241_p6 = scmp.lt.s32.totalorder (!%p202_p3), %s2439_s25, 31  ;;  %p2442_p7 = scmp.ne.s32.totalorder (!%p202_p3), %s2977_s18, 0 }
   0xe   : > { %s4579_s19 = smov (!%p233_p5, %s2981_s19), 1  ;;  %s4581_s25 = smov (!%p241_p6, %s2439_s25), 31 }
   0xf   : > { %s2724_s26 = sshll.u32 %s4579_s19, 8  ;;  %s2440_s27 = sshll.u32 %s4579_s19, 5 }
  0x10   : > { %s3061_s30 = scalar_lea.vmem %s4449_s0, %s2724_s26  ;;  %s244_s6 = sadd.s32 %s2440_s27, %s4581_s25 }
  0x11   : > { %s2441_s7 = sshll.u32 %s244_s6, 3  ;;  %252 = sbr.rel (%p2442_p7) target bundleno = 1046 (0x416), region = 44 }
  0x12   : > { %s3066_s10 = scalar_lea.vmem %s4454_s5, %s2441_s7 }
  0x16   : > { %v286_v0 = vld [vmem:[%s4450_s1] sm:$0xf]  ;;  %vm385_vm0 = vcmask 1043456   ;;  %vm288_vm1 = vcmask 31744   ;;  %v3087_v3 = vld [vmem:[%s3061_s30 + $0x8] sm:$0xff]  ;;  %v3094_v4 = vld [vmem:[%s3061_s30 + $0x10] sm:$0xff] }
  0x17   : > { %v702_v1 = vld [vmem:[%s4451_s2] sm:$0xf]  ;;  %2443 = vmatpush.msk.msra.mxu0 %vm385_vm0, %v286_v0  ;;  %2765 = vmatpush.msk.msra.mxu3 %vm385_vm0, %v286_v0  ;;  %v3101_v5 = vld [vmem:[%s3061_s30 + $0x18] sm:$0xff]  ;;  %v3115_v7 = vld [vmem:[%s3061_s30 + $0x28] sm:$0xff]  ;;  %vm668_vm2 = vcmask 27648   ;;  %vm989_vm3 = vcmask 1041408  }
  0x18   : > { %v3076_v2 = vld [vmem:[%s3061_s30] sm:$0xff]  ;;  %2476 = vmatpush.msk.msra.mxu1 %vm385_vm0, %v702_v1  ;;  %v3122_v8 = vld [vmem:[%s3061_s30 + $0x30] sm:$0xff]  ;;  %v3129_v9 = vld [vmem:[%s3061_s30 + $0x38] sm:$0xff]  ;;  %vm1217_vm4 = vcmask 1040384   ;;  %vm1405_vm9 = vcmask 24576  }
  0x19   : > { %2444 = vmatmul.msk.f32.vlgmr.msra.gmra.mxu0 %vm288_vm1, %v3076_v2  ;;  %2477 = vmatmul.msk.f32.vlgmr.msra.gmra.mxu1 %vm288_vm1, %v3076_v2  ;;  %v3108_v6 = vld [vmem:[%s3061_s30 + $0x20] sm:$0xff]  ;;  %4492 = vst [vmem:[#allocation7_spill] sm:$0xff] %v3129_v9  ;;  %v3143_v11 = vld [vmem:[%s3061_s30 + $0x48] sm:$0xff]  ;;  %v3150_v12 = vld [vmem:[%s3061_s30 + $0x50] sm:$0xff] }
  0x1a   : > { %2766 = vmatpush.msk.msrb.mxu3 %vm385_vm0, %v702_v1  ;;  %v3136_v10 = vld [vmem:[%s3061_s30 + $0x40] sm:$0xff]  ;;  %4494 = vst [vmem:[#allocation9_spill] sm:$0xff] %v3143_v11  ;;  %v3157_v13 = vld [vmem:[%s3061_s30 + $0x58] sm:$0xff]  ;;  %v3171_v15 = vld [vmem:[%s3061_s30 + $0x68] sm:$0xff] }
  0x1b   : > { %4493 = vst [vmem:[#allocation8_spill] sm:$0xff] %v3136_v10  ;;  %v3164_v14 = vld [vmem:[%s3061_s30 + $0x60] sm:$0xff]  ;;  %v3178_v16 = vld [vmem:[%s3061_s30 + $0xd8] sm:$0xff]  ;;  %v3183_v17 = vld [vmem:[%s3061_s30 + $0x70] sm:$0xff] }
  0x1c   : > { %4495 = vst [vmem:[#allocation10_spill] sm:$0xff] %v3150_v12  ;;  %2471 = vmatmul.msk.f32.vlgmr.msra.gmra.mxu3 %vm288_vm1, %v3178_v16  ;;  %v3190_v18 = vld [vmem:[%s3061_s30 + $0xe0] sm:$0xff]  ;;  %v3195_v19 = vld [vmem:[%s3061_s30 + $0x78] sm:$0xff]  ;;  %v3202_v20 = vld [vmem:[%s3061_s30 + $0xe8] sm:$0xff] }
  0x1d   : > { %4496 = vst [vmem:[#allocation11_spill] sm:$0xff] %v3157_v13  ;;  %v3211_v23 = vld [vmem:[%s3061_s30 + $0x80] sm:$0xff]  ;;  %v3218_v24 = vld [vmem:[%s3061_s30 + $0xf0] sm:$0xff]  ;;  %v3227_v27 = vld [vmem:[%s3061_s30 + $0x88] sm:$0xff] }
  0x1e   : > { %4497 = vst [vmem:[#allocation12_spill] sm:$0xff] %v3164_v14  ;;  %v3234_v28 = vld [vmem:[%s3061_s30 + $0xf8] sm:$0xff]  ;;  %v3241_v31 = vld [vmem:[%s3061_s30 + $0x90] sm:$0xff]  ;;  %v3263_v37 = vld [vmem:[%s3061_s30 + $0xa0] sm:$0xff] }
  0x1f   : > { %4498 = vst [vmem:[#allocation13_spill] sm:$0xff] %v3171_v15  ;;  %v3252_v34 = vld [vmem:[%s3061_s30 + $0x98] sm:$0xff]  ;;  %v3274_v40 = vld [vmem:[%s3061_s30 + $0xa8] sm:$0xff]  ;;  %v275_v43 = vld [vmem:[%s3061_s30 + $0xb0] sm:$0xff] }
  0x20   : > { %4499 = vst [vmem:[#allocation14_spill] sm:$0xff] %v3183_v17  ;;  %v276_v46 = vld [vmem:[%s3061_s30 + $0xb8] sm:$0xff]  ;;  %v277_v49 = vld [vmem:[%s3061_s30 + $0xc0] sm:$0xff]  ;;  %v278_v52 = vld [vmem:[%s3061_s30 + $0xc8] sm:$0xff] }
  0x21   : > { %2445 = vmatmul.msk.f32.gmra.mxu0 %vm288_vm1, %v3087_v3  ;;  %2478 = vmatmul.msk.f32.gmra.mxu1 %vm288_vm1, %v3087_v3  ;;  %4500 = vst [vmem:[#allocation15_spill] sm:$0xff] %v3195_v19  ;;  %v3307_v55 = vld [vmem:[%s3061_s30 + $0xd0] sm:$0xff]  ;;  %v3320_v60 = vld [vmem:[%s4453_s4] ss:$0 sm:$0xff] }
  0x22   : > { %4501 = vst [vmem:[#allocation16_spill] sm:$0xff] %v3211_v23 }
  0x23   : > { %4502 = vst [vmem:[#allocation17_spill] sm:$0xff] %v3227_v27 }
  0x24   : > { %2472 = vmatmul.msk.f32.gmra.mxu3 %vm288_vm1, %v3190_v18  ;;  %4503 = vst [vmem:[#allocation18_spill] sm:$0xff] %v3241_v31 }
  0x25   : > { %4504 = vst [vmem:[#allocation19_spill] sm:$0xff] %v3252_v34 }
  0x26   : > { %4505 = vst [vmem:[#allocation20_spill] sm:$0xff] %v3263_v37 }
  0x27   : > { %4506 = vst [vmem:[#allocation21_spill] sm:$0xff] %v3274_v40 }
  0x28   : > { %4507 = vst [vmem:[#allocation22_spill] sm:$0xff] %v3307_v55 }
  0x29   : > { %2446 = vmatmul.msk.f32.gmra.mxu0 %vm288_vm1, %v3094_v4  ;;  %2479 = vmatmul.msk.f32.gmra.mxu1 %vm288_vm1, %v3094_v4 }
  0x2c   : > { %2473 = vmatmul.msk.f32.gmra.mxu3 %vm288_vm1, %v3202_v20 }
  0x31   : > { %2447 = vmatmul.msk.f32.gmra.mxu0 %vm288_vm1, %v3101_v5  ;;  %2480 = vmatmul.msk.f32.gmra.mxu1 %vm288_vm1, %v3101_v5 }
  0x34   : > { %2474 = vmatmul.msk.f32.gmra.mxu3 %vm288_vm1, %v3218_v24 }
  0x39   : > { %2448 = vmatmul.msk.f32.gmra.mxu0 %vm288_vm1, %v3108_v6  ;;  %2481 = vmatmul.msk.f32.gmra.mxu1 %vm288_vm1, %v3108_v6 }
  0x3c   : > { %2475 = vmatmul.msk.f32.gmra.mxu3 %vm288_vm1, %v3234_v28 }
  0x41   : > { %2449 = vmatmul.msk.f32.gmra.mxu0 %vm288_vm1, %v3115_v7  ;;  %2482 = vmatmul.msk.f32.gmra.mxu1 %vm288_vm1, %v3115_v7 }
  0x44   : > { %2504 = vmatmul.msk.f32.vlgmr.msrb.gmra.mxu3 %vm288_vm1, %v3178_v16 }
  0x49   : > { %2450 = vmatmul.msk.f32.gmra.mxu0 %vm288_vm1, %v3122_v8  ;;  %2483 = vmatmul.msk.f32.gmra.mxu1 %vm288_vm1, %v3122_v8 }
  0x4c   : > { %2505 = vmatmul.msk.f32.gmra.mxu3 %vm288_vm1, %v3190_v18 }
  0x51   : > { %2451 = vmatmul.msk.f32.gmra.mxu0 %vm288_vm1, %v3129_v9  ;;  %2484 = vmatmul.msk.f32.gmra.mxu1 %vm288_vm1, %v3129_v9 }
  0x54   : > { %2506 = vmatmul.msk.f32.gmra.mxu3 %vm288_vm1, %v3202_v20 }
  0x59   : > { %2452 = vmatmul.msk.f32.gmra.mxu0 %vm288_vm1, %v3136_v10  ;;  %2485 = vmatmul.msk.f32.gmra.mxu1 %vm288_vm1, %v3136_v10 }
  0x5c   : > { %2507 = vmatmul.msk.f32.gmra.mxu3 %vm288_vm1, %v3218_v24 }
  0x61   : > { %2453 = vmatmul.msk.f32.gmra.mxu0 %vm288_vm1, %v3143_v11  ;;  %2486 = vmatmul.msk.f32.gmra.mxu1 %vm288_vm1, %v3143_v11 }
  0x64   : > { %2508 = vmatmul.msk.f32.gmra.mxu3 %vm288_vm1, %v3234_v28 }
  0x69   : > { %2454 = vmatmul.msk.f32.gmra.mxu0 %vm288_vm1, %v3150_v12  ;;  %2487 = vmatmul.msk.f32.gmra.mxu1 %vm288_vm1, %v3150_v12 }
  0x71   : > { %2455 = vmatmul.msk.f32.gmra.mxu0 %vm288_vm1, %v3157_v13  ;;  %2488 = vmatmul.msk.f32.gmra.mxu1 %vm288_vm1, %v3157_v13 }
  0x79   : > { %2456 = vmatmul.msk.f32.gmra.mxu0 %vm288_vm1, %v3164_v14  ;;  %2489 = vmatmul.msk.f32.gmra.mxu1 %vm288_vm1, %v3164_v14 }
  0x81   : > { %2457 = vmatmul.msk.f32.gmra.mxu0 %vm288_vm1, %v3171_v15  ;;  %2490 = vmatmul.msk.f32.gmra.mxu1 %vm288_vm1, %v3171_v15 }
  0x89   : > { %2458 = vmatmul.msk.f32.gmra.mxu0 %vm288_vm1, %v3183_v17  ;;  %2491 = vmatmul.msk.f32.gmra.mxu1 %vm288_vm1, %v3183_v17 }
  0x91   : > { %2459 = vmatmul.msk.f32.gmra.mxu0 %vm288_vm1, %v3195_v19  ;;  %2492 = vmatmul.msk.f32.gmra.mxu1 %vm288_vm1, %v3195_v19 }
  0x96   : > { %v3206_v21 = vpop.f32.mrf.mxu0  ;;  %v3208_v22 = vpop.f32.mrf.mxu1 }
  0x97   : > { %v3326_v63 = vadd.f32 %v3320_v60, %v3206_v21 }
  0x99   : > { %2460 = vmatmul.msk.f32.gmra.mxu0 %vm288_vm1, %v3211_v23  ;;  %2493 = vmatmul.msk.f32.gmra.mxu1 %vm288_vm1, %v3211_v23  ;;  %v502_v1 = vsel %vm288_vm1, %v3326_v63, 0.0 }
  0x9e   : > { %v3222_v25 = vpop.f32.mrf.mxu0  ;;  %v3224_v26 = vpop.f32.mrf.mxu1 }
  0x9f   : > { %v3330_v0 = vadd.f32 %v3320_v60, %v3222_v25 }
  0xa1   : > { %2461 = vmatmul.msk.f32.gmra.mxu0 %vm288_vm1, %v3227_v27  ;;  %2494 = vmatmul.msk.f32.gmra.mxu1 %vm288_vm1, %v3227_v27 }
  0xa6   : > { %v412_v29 = vpop.f32.mrf.mxu0  ;;  %v3238_v30 = vpop.f32.mrf.mxu1 }
  0xa9   : > { %2462 = vmatmul.msk.f32.gmra.mxu0 %vm288_vm1, %v3241_v31  ;;  %2495 = vmatmul.msk.f32.gmra.mxu1 %vm288_vm1, %v3241_v31 }
  0xae   : > { %v415_v32 = vpop.f32.mrf.mxu0  ;;  %v3249_v33 = vpop.f32.mrf.mxu1 }
  0xb1   : > { %2463 = vmatmul.msk.f32.gmra.mxu0 %vm288_vm1, %v3252_v34  ;;  %2496 = vmatmul.msk.f32.gmra.mxu1 %vm288_vm1, %v3252_v34 }
  0xb6   : > { %v418_v35 = vpop.f32.mrf.mxu0  ;;  %v3260_v36 = vpop.f32.mrf.mxu1 }
  0xb7   : > { %v3349_v34 = vadd.f32 %v3320_v60, %v418_v35 }
  0xb9   : > { %2464 = vmatmul.msk.f32.gmra.mxu0 %vm288_vm1, %v3263_v37  ;;  %2497 = vmatmul.msk.f32.gmra.mxu1 %vm288_vm1, %v3263_v37 }
  0xbe   : > { %v421_v38 = vpop.f32.mrf.mxu0  ;;  %v3271_v39 = vpop.f32.mrf.mxu1 }
  0xc1   : > { %2465 = vmatmul.msk.f32.gmra.mxu0 %vm288_vm1, %v3274_v40  ;;  %2498 = vmatmul.msk.f32.gmra.mxu1 %vm288_vm1, %v3274_v40  ;;  %v3344_v40 = vadd.f32 %v3320_v60, %v415_v32 }
  0xc3   : > { %v507_v37 = vsel %vm288_vm1, %v3344_v40, 0.0 }
  0xc6   : > { %v424_v41 = vpop.f32.mrf.mxu0  ;;  %v3282_v42 = vpop.f32.mrf.mxu1 }
  0xc9   : > { %2466 = vmatmul.msk.f32.gmra.mxu0 %vm288_vm1, %v275_v43  ;;  %2499 = vmatmul.msk.f32.gmra.mxu1 %vm288_vm1, %v275_v43  ;;  %v503_v43 = vsel %vm288_vm1, %v3330_v0, 0.0 }
  0xce   : > { %v427_v44 = vpop.f32.mrf.mxu0  ;;  %v3289_v45 = vpop.f32.mrf.mxu1 }
  0xd1   : > { %2467 = vmatmul.msk.f32.gmra.mxu0 %vm288_vm1, %v276_v46  ;;  %2500 = vmatmul.msk.f32.gmra.mxu1 %vm288_vm1, %v276_v46  ;;  %v3337_v46 = vadd.f32 %v3320_v60, %v412_v29 }
  0xd3   : > { %v505_v21 = vsel %vm288_vm1, %v3337_v46, 0.0 }
  0xd6   : > { %v430_v47 = vpop.f32.mrf.mxu0  ;;  %v3294_v48 = vpop.f32.mrf.mxu1 }
  0xd9   : > { %2468 = vmatmul.msk.f32.gmra.mxu0 %vm288_vm1, %v277_v49  ;;  %2501 = vmatmul.msk.f32.gmra.mxu1 %vm288_vm1, %v277_v49  ;;  %v504_v49 = vadd.f32 %v503_v43, %v502_v1  ;;  %v509_v1 = vsel %vm288_vm1, %v3349_v34, 0.0  ;;  %v3356_v43 = vadd.f32 %v3320_v60, %v421_v38  ;;  %v3373_v38 = vadd.f32 %v3320_v60, %v430_v47 }
  0xdb   : > { %v506_v25 = vadd.f32 %v505_v21, %v504_v49  ;;  %v511_v32 = vsel %vm288_vm1, %v3356_v43, 0.0  ;;  %v3361_v49 = vadd.f32 %v3320_v60, %v424_v41  ;;  %4508 = vst [vmem:[#allocation23_spill] sm:$0xff] %v3373_v38 }
  0xdd   : > { %v508_v31 = vadd.f32 %v507_v37, %v506_v25  ;;  %v513_v37 = vsel %vm288_vm1, %v3361_v49, 0.0  ;;  %v3368_v25 = vadd.f32 %v3320_v60, %v427_v44 }
  0xde   : > { %v433_v50 = vpop.f32.mrf.mxu0  ;;  %v3299_v51 = vpop.f32.mrf.mxu1 }
  0xdf   : > { %v510_v23 = vadd.f32 %v509_v1, %v508_v31  ;;  %v515_v31 = vsel %vm288_vm1, %v3368_v25, 0.0 }
  0xe1   : > { %2469 = vmatmul.msk.f32.gmra.mxu0 %vm288_vm1, %v278_v52  ;;  %2502 = vmatmul.msk.f32.gmra.mxu1 %vm288_vm1, %v278_v52  ;;  %v512_v21 = vadd.f32 %v511_v32, %v510_v23  ;;  %v517_v23 = vsel %vm288_vm1, %v3373_v38, 0.0  ;;  %v3380_v32 = vadd.f32 %v3320_v60, %v433_v50 }
  0xe3   : > { %v514_v17 = vadd.f32 %v513_v37, %v512_v21  ;;  %4509 = vst [vmem:[#allocation24_spill] sm:$0xff] %v3380_v32  ;;  %v519_v44 = vsel %vm288_vm1, %v3380_v32, 0.0 }
  0xe5   : > { %v516_v1 = vadd.f32 %v515_v31, %v514_v17 }
  0xe6   : > { %v436_v53 = vpop.f32.mrf.mxu0  ;;  %v3304_v54 = vpop.f32.mrf.mxu1 }
  0xe7   : > { %v518_v14 = vadd.f32 %v517_v23, %v516_v1  ;;  %v3385_v21 = vadd.f32 %v3320_v60, %v436_v53  ;;  %v3399_v23 = vpop.f32.mrf.mxu3 }
  0xe9   : > { %2470 = vmatmul.msk.f32.gmra.mxu0 %vm288_vm1, %v3307_v55  ;;  %2503 = vmatmul.msk.f32.gmra.mxu1 %vm288_vm1, %v3307_v55  ;;  %4510 = vst [vmem:[#allocation25_spill] sm:$0xff] %v3385_v21  ;;  %v520_v37 = vadd.f32 %v519_v44, %v518_v14  ;;  %v521_v17 = vsel %vm288_vm1, %v3385_v21, 0.0 }
  0xeb   : > { %v522_v12 = vadd.f32 %v521_v17, %v520_v37 }
  0xee   : > { %v439_v56 = vpop.f32.mrf.mxu0  ;;  %v3313_v57 = vpop.f32.mrf.mxu1 }
  0xef   : > { %v3392_v31 = vadd.f32 %v3320_v60, %v439_v56 }
  0xf1   : > { %4511 = vst [vmem:[#allocation26_spill] sm:$0xff] %v3392_v31  ;;  %v523_v50 = vsel %vm288_vm1, %v3392_v31, 0.0 }
  0xf2   : > { %v524_v53 = vadd.f32 %v523_v50, %v522_v12 }
  0xf6   : > { %v442_v58 = vpop.f32.mrf.mxu0  ;;  %v3315_v59 = vpop.f32.mrf.mxu1 }
  0xf7   : > { %v3397_v1 = vadd.f32 %v3320_v60, %v442_v58  ;;  %v3413_v58 = vpop.f32.mrf.mxu3 }
  0xf9   : > { %4512 = vst [vmem:[#allocation27_spill] sm:$0xff] %v3397_v1  ;;  %v525_v11 = vsel %vm288_vm1, %v3397_v1, 0.0 }
  0xfa   : > { %v526_v56 = vadd.f32 %v525_v11, %v524_v53 }
  0xfe   : > { %v445_v61 = vpop.f32.mrf.mxu0  ;;  %v3322_v62 = vpop.f32.mrf.mxu1 }
  0xff   : > { %v3406_v10 = vadd.f32 %v3320_v60, %v445_v61  ;;  %v3432_v21 = vpop.f32.mrf.mxu3 }
 0x101   : > { %4513 = vst [vmem:[#allocation28_spill] sm:$0xff] %v3406_v10  ;;  %v527_v37 = vsel %vm288_vm1, %v3406_v10, 0.0 }
 0x102   : > { %v528_v31 = vadd.f32 %v527_v37, %v526_v56 }
 0x106   : > { %v448_v52 = vpop.f32.mrf.mxu0  ;;  %v3339_v55 = vpop.f32.mrf.mxu1 }
 0x107   : > { %v3411_v17 = vadd.f32 %v3320_v60, %v448_v52  ;;  %v3477_v38 = vpop.f32.mrf.mxu3 }
 0x109   : > { %4514 = vst [vmem:[#allocation29_spill] sm:$0xff] %v3411_v17  ;;  %v529_v9 = vsel %vm288_vm1, %v3411_v17, 0.0 }
 0x10a   : > { %v530_v61 = vadd.f32 %v529_v9, %v528_v31  ;;  %v3439_v9 = vld [vmem:[%s4453_s4 + $0x1] ss:$0 sm:$0xff] }
 0x10e   : > { %v451_v29 = vpop.f32.mrf.mxu0  ;;  %v3351_v27 = vpop.f32.mrf.mxu1 }
 0x10f   : > { %v3420_v1 = vadd.f32 %v3320_v60, %v451_v29  ;;  %v3443_v29 = vadd.f32 %v3439_v9, %v3224_v26  ;;  %v3462_v26 = vadd.f32 %v3439_v9, %v3249_v33 }
 0x111   : > { %v531_v11 = vsel %vm288_vm1, %v3420_v1, 0.0  ;;  %4516 = vst [vmem:[#allocation31_spill] sm:$0xff] %v3443_v29  ;;  %v821_v32 = vsel %vm288_vm1, %v3443_v29, 0.0  ;;  %v3475_v29 = vadd.f32 %v3439_v9, %v3260_v36 }
 0x112   : > { %v532_v52 = vadd.f32 %v531_v11, %v530_v61  ;;  %v3452_v61 = vadd.f32 %v3439_v9, %v3208_v22  ;;  %v3456_v11 = vadd.f32 %v3439_v9, %v3238_v30  ;;  %4520 = vst [vmem:[#allocation35_spill] sm:$0xff] %v3462_v26 }
 0x113   : > { %4521 = vst [vmem:[#allocation36_spill] sm:$0xff] %v3475_v29 }
 0x114   : > { %4518 = vst [vmem:[#allocation33_spill] sm:$0xff] %v3452_v61  ;;  %v820_v22 = vsel %vm288_vm1, %v3452_v61, 0.0  ;;  %v823_v30 = vsel %vm288_vm1, %v3456_v11, 0.0 }
 0x115   : > { %4519 = vst [vmem:[#allocation34_spill] sm:$0xff] %v3456_v11  ;;  %v822_v33 = vadd.f32 %v821_v32, %v820_v22  ;;  %v827_v32 = vsel %vm288_vm1, %v3475_v29, 0.0  ;;  %v3496_v22 = vadd.f32 %v3439_v9, %v3282_v42 }
 0x116   : > { %v454_v35 = vpop.f32.mrf.mxu0  ;;  %v3363_v19 = vpop.f32.mrf.mxu1 }
 0x117   : > { %v3425_v53 = vadd.f32 %v3320_v60, %v454_v35  ;;  %4522 = vst [vmem:[#allocation37_spill] sm:$0xff] %v3496_v22  ;;  %v831_v42 = vsel %vm288_vm1, %v3496_v22, 0.0  ;;  %v3526_v22 = vpop.f32.mrf.mxu3 }
 0x119   : > { %v533_v56 = vsel %vm288_vm1, %v3425_v53, 0.0 }
 0x11a   : > { %v534_v35 = vadd.f32 %v533_v56, %v532_v52 }
 0x11e   : > { %v457_v41 = vpop.f32.mrf.mxu0  ;;  %v3375_v15 = vpop.f32.mrf.mxu1 }
 0x11f   : > { %v3430_v37 = vadd.f32 %v3320_v60, %v457_v41 }
 0x121   : > { %4515 = vst [vmem:[#allocation30_spill] sm:$0xff] %v3430_v37  ;;  %v535_v31 = vsel %vm288_vm1, %v3430_v37, 0.0 }
 0x122   : > { %v536_v52 = vadd.f32 %v535_v31, %v534_v35  ;;  %v825_v31 = vsel %vm288_vm1, %v3462_v26, 0.0 }
 0x126   : > { %v460_v47 = vpop.f32.mrf.mxu0  ;;  %v3387_v13 = vpop.f32.mrf.mxu1 }
 0x127   : > { %v3448_v41 = vadd.f32 %v3320_v60, %v460_v47 }
 0x129   : > { %4517 = vst [vmem:[#allocation32_spill] sm:$0xff] %v3448_v41  ;;  %v537_v47 = vsel %vm288_vm1, %v3448_v41, 0.0  ;;  %v824_v41 = vadd.f32 %v823_v30, %v822_v33 }
 0x12a   : > { %v538_v61 = vadd.f32 %v537_v47, %v536_v52  ;;  %v3502_v52 = vadd.f32 %v3439_v9, %v3289_v45 }
 0x12b   : > { %v826_v26 = vadd.f32 %v825_v31, %v824_v41  ;;  %v3513_v41 = vadd.f32 %v3439_v9, %v3294_v48 }
 0x12c   : > { %4523 = vst [vmem:[#allocation38_spill] sm:$0xff] %v3502_v52  ;;  %v833_v45 = vsel %vm288_vm1, %v3502_v52, 0.0 }
 0x12d   : > { %v828_v33 = vadd.f32 %v827_v32, %v826_v26  ;;  %4524 = vst [vmem:[#allocation39_spill] sm:$0xff] %v3513_v41 }
 0x12e   : > { %v463_v14 = vpop.f32.mrf.mxu0  ;;  %v3401_v44 = vpop.f32.mrf.mxu1 }
 0x12f   : > { %v3467_v37 = vadd.f32 %v3320_v60, %v463_v14  ;;  %v3485_v14 = vadd.f32 %v3439_v9, %v3271_v39 }
 0x131   : > { %v539_v11 = vsel %vm288_vm1, %v3467_v37, 0.0  ;;  %v829_v39 = vsel %vm288_vm1, %v3485_v14, 0.0 }
 0x132   : > { %v540_v47 = vadd.f32 %v539_v11, %v538_v61  ;;  %v830_v31 = vadd.f32 %v829_v39, %v828_v33  ;;  %v3519_v61 = vadd.f32 %v3439_v9, %v3299_v51  ;;  %v835_v39 = vsel %vm288_vm1, %v3513_v41, 0.0 }
 0x133   : > { %v3534_v33 = vadd.f32 %v3439_v9, %v3304_v54 }
 0x134   : > { %v832_v26 = vadd.f32 %v831_v42, %v830_v31 }
 0x135   : > { %v839_v54 = vsel %vm288_vm1, %v3534_v33, 0.0 }
 0x136   : > { %v466_v12 = vpop.f32.mrf.mxu0  ;;  %v3415_v50 = vpop.f32.mrf.mxu1  ;;  %v834_v51 = vadd.f32 %v833_v45, %v832_v26  ;;  %v3551_v45 = vadd.f32 %v3439_v9, %v3315_v59 }
 0x137   : > { %v3490_v36 = vadd.f32 %v3320_v60, %v466_v12 }
 0x138   : > { %v836_v31 = vadd.f32 %v835_v39, %v834_v51  ;;  %4525 = vst [vmem:[#allocation40_spill] sm:$0xff] %v3551_v45 }
 0x139   : > { %v541_v12 = vsel %vm288_vm1, %v3490_v36, 0.0 }
 0x13a   : > { %v542_v11 = vadd.f32 %v541_v12, %v540_v47  ;;  %v837_v47 = vsel %vm288_vm1, %v3519_v61, 0.0  ;;  %v3540_v12 = vadd.f32 %v3439_v9, %v3313_v57  ;;  %v996_v57 = vld [vmem:[%s4452_s3] sm:$0xf] }
 0x13b   : > { %v838_v26 = vadd.f32 %v837_v47, %v836_v31  ;;  %2509 = vmatpush.msk.msra.mxu2 %vm385_vm0, %v996_v57  ;;  %2767 = vmatpush.msk.msra.mxu3 %vm385_vm0, %v996_v57 }
 0x13c   : > { %2510 = vmatmul.msk.f32.vlgmr.msra.gmra.mxu2 %vm288_vm1, %v3076_v2  ;;  %2537 = vmatmul.msk.f32.vlgmr.msra.gmra.mxu3 %vm288_vm1, %v3178_v16  ;;  %v3585_v2 = vadd.f32 %v3439_v9, %v3351_v27 }
 0x13d   : > { %v840_v39 = vadd.f32 %v839_v54, %v838_v26 }
 0x13e   : > { %v469_v10 = vpop.f32.mrf.mxu0  ;;  %v3434_v17 = vpop.f32.mrf.mxu1  ;;  %v849_v27 = vsel %vm288_vm1, %v3585_v2, 0.0 }
 0x13f   : > { %v3507_v29 = vadd.f32 %v3320_v60, %v469_v10 }
 0x141   : > { %v543_v10 = vsel %vm288_vm1, %v3507_v29, 0.0 }
 0x144   : > { %2511 = vmatmul.msk.f32.gmra.mxu2 %vm288_vm1, %v3087_v3  ;;  %2538 = vmatmul.msk.f32.gmra.mxu3 %vm288_vm1, %v3190_v18  ;;  %v3624_v18 = vadd.f32 %v3320_v60, %v3399_v23 }
 0x146   : > { %v472_v56 = vpop.f32.mrf.mxu0  ;;  %v3479_v35 = vpop.f32.mrf.mxu1 }
 0x147   : > { %v3524_v32 = vadd.f32 %v3320_v60, %v472_v56  ;;  %v544_v56 = vadd.f32 %v543_v10, %v542_v11  ;;  %v841_v11 = vsel %vm288_vm1, %v3540_v12, 0.0  ;;  %v3560_v10 = vadd.f32 %v3439_v9, %v3322_v62 }
 0x148   : > { %v843_v62 = vsel %vm288_vm1, %v3551_v45, 0.0  ;;  %v842_v47 = vadd.f32 %v841_v11, %v840_v39  ;;  %v3596_v39 = vadd.f32 %v3439_v9, %v3363_v19 }
 0x149   : > { %v545_v52 = vsel %vm288_vm1, %v3524_v32, 0.0  ;;  %4526 = vst [vmem:[#allocation41_spill] sm:$0xff] %v3560_v10 }
 0x14a   : > { %v844_v26 = vadd.f32 %v843_v62, %v842_v47  ;;  %v851_v19 = vsel %vm288_vm1, %v3596_v39, 0.0 }
 0x14c   : > { %2512 = vmatmul.msk.f32.gmra.mxu2 %vm288_vm1, %v3094_v4  ;;  %2539 = vmatmul.msk.f32.gmra.mxu3 %vm288_vm1, %v3202_v20 }
 0x14e   : > { %v475_v30 = vpop.f32.mrf.mxu0  ;;  %v3528_v48 = vpop.f32.mrf.mxu1 }
 0x14f   : > { %v3545_v41 = vadd.f32 %v3320_v60, %v475_v30  ;;  %v546_v30 = vadd.f32 %v545_v52, %v544_v56  ;;  %v3577_v52 = vadd.f32 %v3439_v9, %v3339_v55  ;;  %v3579_v56 = vpop.f32.mrf.mxu3  ;;  %v3673_v20 = vadd.f32 %v3439_v9, %v3528_v48 }
 0x151   : > { %v547_v59 = vsel %vm288_vm1, %v3545_v41, 0.0  ;;  %v847_v11 = vsel %vm288_vm1, %v3577_v52, 0.0 }
 0x152   : > { %v548_v54 = vadd.f32 %v547_v59, %v546_v30  ;;  %v3602_v30 = vadd.f32 %v3439_v9, %v3375_v15 }
 0x154   : > { %2513 = vmatmul.msk.f32.gmra.mxu2 %vm288_vm1, %v3101_v5  ;;  %2540 = vmatmul.msk.f32.gmra.mxu3 %vm288_vm1, %v3218_v24  ;;  %v3710_v24 = vadd.f32 %v3439_v9, %v3579_v56 }
 0x156   : > { %v478_v42 = vpop.f32.mrf.mxu0  ;;  %v796_v31 = vpop.f32.mrf.mxu1 }
 0x157   : > { %v3567_v51 = vadd.f32 %v3320_v60, %v478_v42  ;;  %v845_v42 = vsel %vm288_vm1, %v3560_v10, 0.0 }
 0x158   : > { %v846_v10 = vadd.f32 %v845_v42, %v844_v26  ;;  %v3614_v42 = vadd.f32 %v3439_v9, %v3387_v13 }
 0x159   : > { %v549_v57 = vsel %vm288_vm1, %v3567_v51, 0.0 }
 0x15a   : > { %v550_v59 = vadd.f32 %v549_v57, %v548_v54  ;;  %v848_v62 = vadd.f32 %v847_v11, %v846_v10  ;;  %v853_v10 = vsel %vm288_vm1, %v3602_v30, 0.0  ;;  %v3620_v54 = vadd.f32 %v3439_v9, %v3401_v44  ;;  %v808_v57 = vpop.f32.mrf.mxu3 }
 0x15c   : > { %v850_v15 = vadd.f32 %v849_v27, %v848_v62  ;;  %v855_v27 = vsel %vm288_vm1, %v3614_v42, 0.0  ;;  %v3633_v62 = vadd.f32 %v3439_v9, %v3415_v50  ;;  %v555_v50 = vsel %vm288_vm1, %v3624_v18, 0.0  ;;  %2514 = vmatmul.msk.f32.gmra.mxu2 %vm288_vm1, %v3108_v6  ;;  %2541 = vmatmul.msk.f32.gmra.mxu3 %vm288_vm1, %v3234_v28 }
 0x15e   : > { %v481_v16 = vpop.f32.mrf.mxu0  ;;  %v852_v26 = vadd.f32 %v851_v19, %v850_v15  ;;  %v799_v11 = vpop.f32.mrf.mxu1  ;;  %v3645_v19 = vadd.f32 %v3439_v9, %v3434_v17  ;;  %v3661_v17 = vadd.f32 %v3439_v9, %v3479_v35 }
 0x15f   : > { %v3590_v55 = vadd.f32 %v3320_v60, %v481_v16 }
 0x160   : > { %v854_v44 = vadd.f32 %v853_v10, %v852_v26  ;;  %v3651_v10 = vadd.f32 %v3320_v60, %v3432_v21  ;;  %v3667_v21 = vadd.f32 %v3320_v60, %v3477_v38  ;;  %v861_v4 = vsel %vm288_vm1, %v3645_v19, 0.0 }
 0x161   : > { %v551_v47 = vsel %vm288_vm1, %v3590_v55, 0.0  ;;  %v863_v38 = vsel %vm288_vm1, %v3661_v17, 0.0 }
 0x162   : > { %v552_v16 = vadd.f32 %v551_v47, %v550_v59  ;;  %v3637_v59 = vadd.f32 %v3320_v60, %v3413_v58  ;;  %v857_v47 = vsel %vm288_vm1, %v3620_v54, 0.0  ;;  %v859_v58 = vsel %vm288_vm1, %v3633_v62, 0.0 }
 0x163   : > { %v559_v35 = vsel %vm288_vm1, %v3651_v10, 0.0  ;;  %v561_v48 = vsel %vm288_vm1, %v3667_v21, 0.0 }
 0x164   : > { %2515 = vmatmul.msk.f32.gmra.mxu2 %vm288_vm1, %v3115_v7 }
 0x166   : > { %v484_v3 = vpop.f32.mrf.mxu0 }
 0x167   : > { %v3627_v13 = vadd.f32 %v3320_v60, %v484_v3  ;;  %v856_v3 = vadd.f32 %v855_v27, %v854_v44  ;;  %v557_v27 = vsel %vm288_vm1, %v3637_v59, 0.0 }
 0x169   : > { %v553_v23 = vsel %vm288_vm1, %v3627_v13, 0.0  ;;  %v858_v26 = vadd.f32 %v857_v47, %v856_v3  ;;  %v3679_v47 = vadd.f32 %v3320_v60, %v3526_v22 }
 0x16a   : > { %v554_v15 = vadd.f32 %v553_v23, %v552_v16 }
 0x16b   : > { %v860_v23 = vadd.f32 %v859_v58, %v858_v26  ;;  %v802_v58 = vpop.f32.mrf.mxu1  ;;  %v865_v26 = vsel %vm288_vm1, %v3673_v20, 0.0  ;;  %v563_v45 = vsel %vm288_vm1, %v3679_v47, 0.0 }
 0x16c   : > { %v556_v16 = vadd.f32 %v555_v50, %v554_v15  ;;  %v3684_v15 = vadd.f32 %v3439_v9, %v796_v31  ;;  %2516 = vmatmul.msk.f32.gmra.mxu2 %vm288_vm1, %v3122_v8 }
 0x16d   : > { %v862_v50 = vadd.f32 %v861_v4, %v860_v23 }
 0x16e   : > { %v558_v44 = vadd.f32 %v557_v27, %v556_v16  ;;  %v811_v16 = vpop.f32.mrf.mxu3  ;;  %v3691_v27 = vadd.f32 %v3439_v9, %v799_v11  ;;  %v867_v31 = vsel %vm288_vm1, %v3684_v15, 0.0 }
 0x16f   : > { %v864_v22 = vadd.f32 %v863_v38, %v862_v50 }
 0x170   : > { %v560_v3 = vadd.f32 %v559_v35, %v558_v44  ;;  %v3702_v44 = vadd.f32 %v3439_v9, %v802_v58  ;;  %v869_v23 = vsel %vm288_vm1, %v3691_v27, 0.0 }
 0x171   : > { %v866_v11 = vadd.f32 %v865_v26, %v864_v22  ;;  %v873_v26 = vsel %vm288_vm1, %v3710_v24, 0.0  ;;  %v3719_v22 = vadd.f32 %v3439_v9, %v808_v57 }
 0x172   : > { %v562_v60 = vadd.f32 %v561_v48, %v560_v3  ;;  %v871_v5 = vsel %vm288_vm1, %v3702_v44, 0.0 }
 0x173   : > { %v868_v38 = vadd.f32 %v867_v31, %v866_v11  ;;  %4527 = vst [vmem:[#allocation42_spill] sm:$0xff] %v3719_v22  ;;  %v875_v11 = vsel %vm288_vm1, %v3719_v22, 0.0 }
 0x174   : > { %v564_v4 = vadd.f32 %v563_v45, %v562_v60 }
 0x175   : > { %v870_v50 = vadd.f32 %v869_v23, %v868_v38  ;;  %v3724_v23 = vadd.f32 %v3439_v9, %v811_v16 }
 0x176   : > { %v565_v35 = vrot.slane %v564_v4, 4  ;;  %v814_v60 = vpop.f32.mrf.mxu3 }
 0x177   : > { %v872_v45 = vadd.f32 %v871_v5, %v870_v50  ;;  %4528 = vst [vmem:[#allocation43_spill] sm:$0xff] %v3724_v23  ;;  %v877_v57 = vsel %vm288_vm1, %v3724_v23, 0.0  ;;  %v3733_v38 = vadd.f32 %v3439_v9, %v814_v60 }
 0x178   : > { %v566_v3 = vadd.f32 %v565_v35, %v564_v4 }
 0x179   : > { %v874_v4 = vadd.f32 %v873_v26, %v872_v45  ;;  %v879_v7 = vsel %vm288_vm1, %v3733_v38, 0.0 }
 0x17a   : > { %v567_v48 = vrot.slane %v566_v3, 2 }
 0x17b   : > { %v876_v35 = vadd.f32 %v875_v11, %v874_v4 }
 0x17c   : > { %v568_v58 = vadd.f32 %v567_v48, %v566_v3  ;;  %v4534_v3 = vld [vmem:[#allocation27_spill] sm:$0xff] }
 0x17d   : > { %v878_v5 = vadd.f32 %v877_v57, %v876_v35 }
 0x17e   : > { %v569_v31 = vrot.slane %v568_v58, 1  ;;  %v817_v28 = vpop.f32.mrf.mxu3 }
 0x17f   : > { %v3740_v50 = vadd.f32 %v3439_v9, %v817_v28  ;;  %v880_v48 = vadd.f32 %v879_v7, %v878_v5  ;;  %v4529_v28 = vld [vmem:[#allocation23_spill] sm:$0xff] }
 0x180   : > { %v570_v56 = vadd.f32 %v569_v31, %v568_v58 }
 0x181   : > { %v881_v9 = vsel %vm288_vm1, %v3740_v50, 0.0 }
 0x182   : > { %v3726_v6 = vmul.f32 0.00390625, %v570_v56  ;;  %v882_v4 = vadd.f32 %v881_v9, %v880_v48 }
 0x184   : > { %v572_v45 = vsub.f32 %v3326_v63, %v3726_v6  ;;  %v573_v60 = vsub.f32 %v3330_v0, %v3726_v6  ;;  %v574_v58 = vsub.f32 %v3337_v46, %v3726_v6  ;;  %v575_v26 = vsub.f32 %v3344_v40, %v3726_v6 }
 0x185   : > { %v576_v31 = vsub.f32 %v3349_v34, %v3726_v6  ;;  %v577_v8 = vsub.f32 %v3356_v43, %v3726_v6  ;;  %v578_v63 = vsub.f32 %v3361_v49, %v3726_v6  ;;  %v579_v46 = vsub.f32 %v3368_v25, %v3726_v6  ;;  %v4530_v34 = vld [vmem:[#allocation24_spill] sm:$0xff]  ;;  %v4531_v43 = vld [vmem:[#allocation25_spill] sm:$0xff] }
 0x186   : > { %v604_v0 = vmul.f32 0.5, %v572_v45  ;;  %v605_v56 = vmul.f32 0.5, %v573_v60  ;;  %v606_v11 = vmul.f32 0.5, %v574_v58  ;;  %v607_v35 = vmul.f32 0.5, %v575_v26  ;;  %v4532_v45 = vld [vmem:[#allocation7_spill] sm:$0xff]  ;;  %v4533_v26 = vld [vmem:[#allocation26_spill] sm:$0xff] }
 0x187   : > { %v580_v40 = vsub.f32 %v4529_v28, %v3726_v6  ;;  %v608_v57 = vmul.f32 0.5, %v576_v31  ;;  %v581_v5 = vsub.f32 %v4530_v34, %v3726_v6  ;;  %v582_v7 = vsub.f32 %v4531_v43, %v3726_v6  ;;  %2517 = vmatmul.msk.f32.gmra.mxu2 %vm288_vm1, %v4532_v45 }
 0x188   : > { %v609_v48 = vmul.f32 0.5, %v577_v8  ;;  %v883_v49 = vrot.slane %v882_v4, 4  ;;  %v610_v60 = vmul.f32 0.5, %v578_v63  ;;  %v636_v58 = vpack.c.bf16 %v604_v0, %v604_v0  ;;  %v4535_v8 = vld [vmem:[#allocation28_spill] sm:$0xff]  ;;  %v4536_v0 = vld [vmem:[#allocation29_spill] sm:$0xff] }
 0x189   : > { %v637_v25 = vpack.c.bf16 %v605_v56, %v605_v56  ;;  %v638_v9 = vpack.c.bf16 %v606_v11, %v606_v11  ;;  %v583_v28 = vsub.f32 %v4533_v26, %v3726_v6  ;;  %v611_v31 = vmul.f32 0.5, %v579_v46 }
 0x18a   : > { %v639_v16 = vpack.c.bf16 %v607_v35, %v607_v35  ;;  %v584_v34 = vsub.f32 %v4534_v3, %v3726_v6  ;;  %v612_v23 = vmul.f32 0.5, %v580_v40  ;;  %v640_v22 = vpack.c.bf16 %v608_v57, %v608_v57  ;;  %669 = vst.msk [vmem:[#allocation2] sm:$0xf] %vm668_vm2, %v636_v58 }
 0x18b   : > { %v585_v43 = vsub.f32 %v4535_v8, %v3726_v6  ;;  %v613_v45 = vmul.f32 0.5, %v581_v5  ;;  %v641_v63 = vpack.c.bf16 %v609_v48, %v609_v48  ;;  %670 = vst.msk [vmem:[#allocation2 + $0x4] sm:$0xf] %vm668_vm2, %v637_v25  ;;  %v586_v56 = vsub.f32 %v4536_v0, %v3726_v6  ;;  %v4537_v5 = vld [vmem:[#allocation30_spill] sm:$0xff] }
 0x18c   : > { %v614_v11 = vmul.f32 0.5, %v582_v7  ;;  %v642_v46 = vpack.c.bf16 %v610_v60, %v610_v60  ;;  %671 = vst.msk [vmem:[#allocation2 + $0x8] sm:$0xf] %vm668_vm2, %v638_v9  ;;  %v884_v35 = vadd.f32 %v883_v49, %v882_v4  ;;  %v615_v3 = vmul.f32 0.5, %v583_v28  ;;  %v4538_v7 = vld [vmem:[#allocation32_spill] sm:$0xff] }
 0x18d   : > { %v643_v40 = vpack.c.bf16 %v611_v31, %v611_v31  ;;  %672 = vst.msk [vmem:[#allocation2 + $0xc] sm:$0xf] %vm668_vm2, %v639_v16  ;;  %v616_v57 = vmul.f32 0.5, %v584_v34  ;;  %v644_v58 = vpack.c.bf16 %v612_v23, %v612_v23  ;;  %v589_v48 = vsub.f32 %v4537_v5, %v3726_v6  ;;  %v4539_v16 = vld [vmem:[#allocation8_spill] sm:$0xff] }
 0x18e   : > { %673 = vst.msk [vmem:[#allocation2 + $0x10] sm:$0xf] %vm668_vm2, %v640_v22  ;;  %v617_v25 = vmul.f32 0.5, %v585_v43  ;;  %v645_v26 = vpack.c.bf16 %v613_v45, %v613_v45  ;;  %v590_v60 = vsub.f32 %v4538_v7, %v3726_v6  ;;  %v618_v9 = vmul.f32 0.5, %v586_v56  ;;  %v4542_v7 = vld [vmem:[#allocation9_spill] sm:$0xff] }
 0x18f   : > { %674 = vst.msk [vmem:[#allocation2 + $0x14] sm:$0xf] %vm668_vm2, %v641_v63  ;;  %v646_v4 = vpack.c.bf16 %v614_v11, %v614_v11  ;;  %v885_v49 = vrot.slane %v884_v35, 2  ;;  %2518 = vmatmul.msk.f32.gmra.mxu2 %vm288_vm1, %v4539_v16  ;;  %v591_v22 = vsub.f32 %v3467_v37, %v3726_v6  ;;  %v4540_v23 = vsub.f32 %v3420_v1, %v3726_v6 }
 0x190   : > { %675 = vst.msk [vmem:[#allocation2 + $0x18] sm:$0xf] %vm668_vm2, %v642_v46  ;;  %v647_v31 = vpack.c.bf16 %v615_v3, %v615_v3  ;;  %v592_v34 = vsub.f32 %v3490_v36, %v3726_v6  ;;  %v4541_v8 = vsub.f32 %v3425_v53, %v3726_v6  ;;  %v648_v45 = vpack.c.bf16 %v616_v57, %v616_v57 }
 0x191   : > { %v619_v28 = vmul.f32 0.5, %v4540_v23  ;;  %676 = vst.msk [vmem:[#allocation2 + $0x1c] sm:$0xf] %vm668_vm2, %v643_v40  ;;  %v886_v63 = vadd.f32 %v885_v49, %v884_v35  ;;  %v593_v37 = vsub.f32 %v3507_v29, %v3726_v6  ;;  %v621_v0 = vmul.f32 0.5, %v589_v48 }
 0x192   : > { %v620_v43 = vmul.f32 0.5, %v4541_v8  ;;  %677 = vst.msk [vmem:[#allocation2 + $0x20] sm:$0xf] %vm668_vm2, %v644_v58  ;;  %v649_v1 = vpack.c.bf16 %v617_v25, %v617_v25  ;;  %v594_v56 = vsub.f32 %v3524_v32, %v3726_v6  ;;  %v622_v11 = vmul.f32 0.5, %v590_v60 }
 0x193   : > { %678 = vst.msk [vmem:[#allocation2 + $0x24] sm:$0xf] %vm668_vm2, %v645_v26  ;;  %v650_v36 = vpack.c.bf16 %v618_v9, %v618_v9  ;;  %v887_v53 = vrot.slane %v886_v63, 1  ;;  %v595_v46 = vsub.f32 %v3545_v41, %v3726_v6  ;;  %v623_v3 = vmul.f32 0.5, %v591_v22 }
 0x194   : > { %679 = vst.msk [vmem:[#allocation2 + $0x28] sm:$0xf] %vm668_vm2, %v646_v4  ;;  %v651_v35 = vpack.c.bf16 %v619_v28, %v619_v28  ;;  %v596_v29 = vsub.f32 %v3567_v51, %v3726_v6  ;;  %v624_v40 = vmul.f32 0.5, %v592_v34  ;;  %v652_v57 = vpack.c.bf16 %v620_v43, %v620_v43 }
 0x195   : > { %680 = vst.msk [vmem:[#allocation2 + $0x2c] sm:$0xf] %vm668_vm2, %v647_v31  ;;  %v888_v32 = vadd.f32 %v887_v53, %v886_v63  ;;  %v597_v58 = vsub.f32 %v3590_v55, %v3726_v6  ;;  %v625_v5 = vmul.f32 0.5, %v593_v37  ;;  %v653_v48 = vpack.c.bf16 %v621_v0, %v621_v0 }
 0x196   : > { %681 = vst.msk [vmem:[#allocation2 + $0x30] sm:$0xf] %vm668_vm2, %v648_v45  ;;  %v598_v41 = vsub.f32 %v3627_v13, %v3726_v6  ;;  %v626_v25 = vmul.f32 0.5, %v594_v56  ;;  %v654_v26 = vpack.c.bf16 %v622_v11, %v622_v11  ;;  %v599_v60 = vsub.f32 %v3624_v18, %v3726_v6 }
 0x197   : > { %682 = vst.msk [vmem:[#allocation2 + $0x34] sm:$0xf] %vm668_vm2, %v649_v1  ;;  %v3823_v51 = vmul.f32 0.00390625, %v888_v32  ;;  %2519 = vmatmul.msk.f32.gmra.mxu2 %vm288_vm1, %v4542_v7  ;;  %v627_v55 = vmul.f32 0.5, %v595_v46  ;;  %v655_v9 = vpack.c.bf16 %v623_v3, %v623_v3  ;;  %v600_v4 = vsub.f32 %v3637_v59, %v3726_v6 }
 0x198   : > { %683 = vst.msk [vmem:[#allocation2 + $0x38] sm:$0xf] %vm668_vm2, %v650_v36  ;;  %v628_v13 = vmul.f32 0.5, %v596_v29  ;;  %v656_v49 = vpack.c.bf16 %v624_v40, %v624_v40  ;;  %v601_v22 = vsub.f32 %v3651_v10, %v3726_v6  ;;  %v629_v23 = vmul.f32 0.5, %v597_v58  ;;  %v4543_v36 = vld [vmem:[#allocation33_spill] sm:$0xff]  ;;  %v4544_v40 = vld [vmem:[#allocation10_spill] sm:$0xff] }
 0x199   : > { %684 = vst.msk [vmem:[#allocation2 + $0x3c] sm:$0xf] %vm668_vm2, %v651_v35  ;;  %v921_v16 = vsub.f32 %v3740_v50, %v3823_v51  ;;  %v657_v28 = vpack.c.bf16 %v625_v5, %v625_v5  ;;  %v602_v18 = vsub.f32 %v3667_v21, %v3726_v6  ;;  %v630_v31 = vmul.f32 0.5, %v598_v41  ;;  %v4545_v58 = vld [vmem:[#allocation31_spill] sm:$0xff] }
 0x19a   : > { %685 = vst.msk [vmem:[#allocation2 + $0x40] sm:$0xf] %vm668_vm2, %v652_v57  ;;  %v658_v34 = vpack.c.bf16 %v626_v25, %v626_v25  ;;  %v603_v59 = vsub.f32 %v3679_v47, %v3726_v6  ;;  %v631_v8 = vmul.f32 0.5, %v599_v60  ;;  %v659_v43 = vpack.c.bf16 %v627_v55, %v627_v55  ;;  %v4546_v41 = vld [vmem:[#allocation11_spill] sm:$0xff] }
 0x19b   : > { %686 = vst.msk [vmem:[#allocation2 + $0x44] sm:$0xf] %vm668_vm2, %v653_v48  ;;  %v632_v50 = vmul.f32 0.5, %v600_v4  ;;  %v660_v10 = vpack.c.bf16 %v628_v13, %v628_v13  ;;  %v633_v45 = vmul.f32 0.5, %v601_v22  ;;  %v661_v63 = vpack.c.bf16 %v629_v23, %v629_v23  ;;  %v4549_v55 = vld [vmem:[#allocation35_spill] sm:$0xff] }
 0x19c   : > { %687 = vst.msk [vmem:[#allocation2 + $0x48] sm:$0xf] %vm668_vm2, %v654_v26  ;;  %v916_v21 = vsub.f32 %v3702_v44, %v3823_v51  ;;  %v634_v37 = vmul.f32 0.5, %v602_v18  ;;  %v662_v0 = vpack.c.bf16 %v630_v31, %v630_v31  ;;  %v900_v47 = vsub.f32 %v3534_v33, %v3823_v51  ;;  %v4547_v26 = vld [vmem:[#allocation34_spill] sm:$0xff] }
 0x19d   : > { %688 = vst.msk [vmem:[#allocation2 + $0x4c] sm:$0xf] %vm668_vm2, %v655_v9  ;;  %v920_v1 = vsub.f32 %v3733_v38, %v3823_v51  ;;  %v635_v56 = vmul.f32 0.5, %v603_v59  ;;  %v663_v11 = vpack.c.bf16 %v631_v8, %v631_v8  ;;  %v890_v53 = vsub.f32 %v4543_v36, %v3823_v51  ;;  %v4554_v59 = vld [vmem:[#allocation37_spill] sm:$0xff] }
 0x19e   : > { %689 = vst.msk [vmem:[#allocation2 + $0x50] sm:$0xf] %vm668_vm2, %v656_v49  ;;  %v906_v44 = vsub.f32 %v3596_v39, %v3823_v51  ;;  %v664_v46 = vpack.c.bf16 %v632_v50, %v632_v50  ;;  %v904_v3 = vsub.f32 %v3577_v52, %v3823_v51  ;;  %v905_v33 = vsub.f32 %v3585_v2, %v3823_v51  ;;  %v4550_v49 = vld [vmem:[#allocation13_spill] sm:$0xff] }
 0x19f   : > { %690 = vst.msk [vmem:[#allocation2 + $0x54] sm:$0xf] %vm668_vm2, %v657_v28  ;;  %v665_v38 = vpack.c.bf16 %v633_v45, %v633_v45  ;;  %v666_v29 = vpack.c.bf16 %v634_v37, %v634_v37  ;;  %2520 = vmatmul.msk.f32.gmra.mxu2 %vm288_vm1, %v4544_v40  ;;  %v3867_v39 = vpack.i.bf16 %v916_v21, %v900_v47  ;;  %v4552_v28 = vld [vmem:[#allocation14_spill] sm:$0xff]  ;;  %v4557_v37 = vld [vmem:[#allocation17_spill] sm:$0xff] }
 0x1a0   : > { %691 = vst.msk [vmem:[#allocation2 + $0x58] sm:$0xf] %vm668_vm2, %v658_v34  ;;  %v2808_v35 = vpack.i.bf16 %v906_v44, %v890_v53  ;;  %v667_v57 = vpack.c.bf16 %v635_v56, %v635_v56  ;;  %v3871_v52 = vpack.i.bf16 %v920_v1, %v904_v3  ;;  %v3873_v2 = vpack.i.bf16 %v921_v16, %v905_v33  ;;  %v4553_v34 = vld [vmem:[#allocation15_spill] sm:$0xff] }
 0x1a1   : > { %692 = vst.msk [vmem:[#allocation2 + $0x5c] sm:$0xf] %vm668_vm2, %v659_v43  ;;  %v907_v32 = vsub.f32 %v3602_v30, %v3823_v51  ;;  %v891_v5 = vsub.f32 %v4545_v58, %v3823_v51  ;;  %v908_v25 = vsub.f32 %v3614_v42, %v3823_v51  ;;  %v892_v7 = vsub.f32 %v4547_v26, %v3823_v51  ;;  %v4548_v30 = vld [vmem:[#allocation12_spill] sm:$0xff]  ;;  %v4562_v58 = vld [vmem:[#allocation21_spill] sm:$0xff] }
 0x1a2   : > { %693 = vst.msk [vmem:[#allocation2 + $0x60] sm:$0xf] %vm668_vm2, %v660_v10  ;;  %2809 = vxpose.xlu0.b32.start [1/16] (narrow) %v2808_v35, 8  ;;  %v893_v9 = vsub.f32 %v4549_v55, %v3823_v51  ;;  %v909_v4 = vsub.f32 %v3620_v54, %v3823_v51  ;;  %v4551_v42 = vld [vmem:[#allocation36_spill] sm:$0xff]  ;;  %v910_v22 = vsub.f32 %v3633_v62, %v3823_v51 }
 0x1a3   : > { %694 = vst.msk [vmem:[#allocation2 + $0x64] sm:$0xf] %vm668_vm2, %v661_v63  ;;  %v2810_v48 = vpack.i.bf16 %v907_v32, %v891_v5  ;;  %v2812_v60 = vpack.i.bf16 %v908_v25, %v892_v7  ;;  %v894_v16 = vsub.f32 %v4551_v42, %v3823_v51  ;;  %v895_v18 = vsub.f32 %v3485_v14, %v3823_v51  ;;  %v4555_v10 = vld [vmem:[#allocation16_spill] sm:$0xff]  ;;  %v4556_v14 = vld [vmem:[#allocation38_spill] sm:$0xff] }
 0x1a4   : > { %695 = vst.msk [vmem:[#allocation2 + $0x68] sm:$0xf] %vm668_vm2, %v662_v0  ;;  %v2814_v13 = vpack.i.bf16 %v909_v4, %v893_v9  ;;  %v911_v54 = vsub.f32 %v3645_v19, %v3823_v51  ;;  %v896_v8 = vsub.f32 %v4554_v59, %v3823_v51  ;;  %v912_v62 = vsub.f32 %v3661_v17, %v3823_v51  ;;  %v4558_v17 = vld [vmem:[#allocation39_spill] sm:$0xff]  ;;  %v4564_v25 = vld [vmem:[#allocation42_spill] sm:$0xff] }
 0x1a5   : > { %696 = vst.msk [vmem:[#allocation2 + $0x6c] sm:$0xf] %vm668_vm2, %v663_v11  ;;  %v2816_v23 = vpack.i.bf16 %v910_v22, %v894_v16  ;;  %v897_v19 = vsub.f32 %v4556_v14, %v3823_v51  ;;  %v913_v45 = vsub.f32 %v3673_v20, %v3823_v51  ;;  %v898_v0 = vsub.f32 %v4558_v17, %v3823_v51  ;;  %v4559_v11 = vld [vmem:[#allocation18_spill] sm:$0xff]  ;;  %v4565_v16 = vld [vmem:[#allocation41_spill] sm:$0xff] }
 0x1a6   : > { %697 = vst.msk [vmem:[#allocation2 + $0x70] sm:$0xf] %vm668_vm2, %v664_v46  ;;  %v2818_v31 = vpack.i.bf16 %v911_v54, %v895_v18  ;;  %v2820_v50 = vpack.i.bf16 %v912_v62, %v896_v8  ;;  %v914_v47 = vsub.f32 %v3684_v15, %v3823_v51  ;;  %v899_v20 = vsub.f32 %v3519_v61, %v3823_v51  ;;  %v4560_v46 = vld [vmem:[#allocation19_spill] sm:$0xff]  ;;  %v3935_v15 = vld [vmem:[%s4453_s4 + $0x2] ss:$0 sm:$0xff]  ;;  %v4567_v62 = vld [vmem:[#allocation22_spill] sm:$0xff] }
 0x1a7   : > { %698 = vst.msk [vmem:[#allocation2 + $0x74] sm:$0xf] %vm668_vm2, %v665_v38  ;;  %2521 = vmatmul.msk.f32.gmra.mxu2 %vm288_vm1, %v4546_v41  ;;  %v2822_v63 = vpack.i.bf16 %v913_v45, %v897_v19  ;;  %v915_v36 = vsub.f32 %v3691_v27, %v3823_v51  ;;  %v4561_v38 = vld [vmem:[#allocation20_spill] sm:$0xff]  ;;  %v901_v35 = vsub.f32 %v3540_v12, %v3823_v51  ;;  %v2856_v59 = vld [vmem:[%s3061_s30 + $0xc0] sm:$0xff]  ;;  %v2857_v8 = vld [vmem:[%s3061_s30 + $0xc8] sm:$0xff] }
 0x1a8   : > { %699 = vst.msk [vmem:[#allocation2 + $0x78] sm:$0xf] %vm668_vm2, %v666_v29  ;;  %v2824_v1 = vpack.i.bf16 %v914_v47, %v898_v0  ;;  %v917_v29 = vsub.f32 %v3710_v24, %v3823_v51  ;;  %v4563_v24 = vld [vmem:[#allocation40_spill] sm:$0xff]  ;;  %v918_v26 = vsub.f32 %v4564_v25, %v3823_v51  ;;  %v903_v22 = vsub.f32 %v4565_v16, %v3823_v51 }
 0x1a9   : > { %700 = vst.msk [vmem:[#allocation2 + $0x7c] sm:$0xf] %vm668_vm2, %v667_v57  ;;  %v2826_v53 = vpack.i.bf16 %v915_v36, %v899_v20  ;;  %v902_v41 = vsub.f32 %v4563_v24, %v3823_v51 }
 0x1aa   : > { %2811 = vxpose.xlu0.b32.cont [2/16] (narrow) %v2810_v48, 8  ;;  %v2830_v57 = vpack.i.bf16 %v917_v29, %v901_v35 }
 0x1ab   : > { %v2832_v9 = vpack.i.bf16 %v918_v26, %v902_v41 }
 0x1af   : > { %2522 = vmatmul.msk.f32.gmra.mxu2 %vm288_vm1, %v4548_v30 }
 0x1b2   : > { %2813 = vxpose.xlu0.b32.cont [3/16] (narrow) %v2812_v60, 8 }
 0x1b7   : > { %2523 = vmatmul.msk.f32.gmra.mxu2 %vm288_vm1, %v4550_v49 }
 0x1ba   : > { %2815 = vxpose.xlu0.b32.cont [4/16] (narrow) %v2814_v13, 8  ;;  %v2854_v13 = vld [vmem:[%s3061_s30 + $0xb0] sm:$0xff] }
 0x1bf   : > { %2524 = vmatmul.msk.f32.gmra.mxu2 %vm288_vm1, %v4552_v28  ;;  %v1018_v43 = vpop.f32.mrf.mxu2 }
 0x1c0   : > { %v1019_v3 = vadd.f32 %v3935_v15, %v1018_v43 }
 0x1c2   : > { %2817 = vxpose.xlu0.b32.cont [5/16] (narrow) %v2816_v23, 8  ;;  %v1114_v33 = vpack.c.bf16 %v1019_v3, %v1019_v3  ;;  %v4566_v23 = vld [vmem:[#allocation43_spill] sm:$0xff] }
 0x1c3   : > { %v919_v28 = vsub.f32 %v4566_v23, %v3823_v51 }
 0x1c4   : > { %1146 = vst.msk [vmem:[#allocation4] sm:$0xf] %vm668_vm2, %v1114_v33 }
 0x1c5   : > { %v2834_v18 = vpack.i.bf16 %v919_v28, %v903_v22 }
 0x1c7   : > { %2525 = vmatmul.msk.f32.gmra.mxu2 %vm288_vm1, %v4553_v34  ;;  %v1021_v21 = vpop.f32.mrf.mxu2 }
 0x1c8   : > { %v1022_v27 = vadd.f32 %v3935_v15, %v1021_v21 }
 0x1ca   : > { %2819 = vxpose.xlu0.b32.cont [6/16] (narrow) %v2818_v31, 8  ;;  %v1115_v40 = vpack.c.bf16 %v1022_v27, %v1022_v27  ;;  %v2855_v31 = vld [vmem:[%s3061_s30 + $0xb8] sm:$0xff] }
 0x1cc   : > { %1147 = vst.msk [vmem:[#allocation4 + $0x4] sm:$0xf] %vm668_vm2, %v1115_v40 }
 0x1cf   : > { %2526 = vmatmul.msk.f32.gmra.mxu2 %vm288_vm1, %v4555_v10  ;;  %v1024_v56 = vpop.f32.mrf.mxu2 }
 0x1d0   : > { %v1025_v5 = vadd.f32 %v3935_v15, %v1024_v56 }
 0x1d2   : > { %2821 = vxpose.xlu0.b32.cont [7/16] (narrow) %v2820_v50, 8  ;;  %v1116_v7 = vpack.c.bf16 %v1025_v5, %v1025_v5 }
 0x1d4   : > { %1148 = vst.msk [vmem:[#allocation4 + $0x8] sm:$0xf] %vm668_vm2, %v1116_v7  ;;  %v1178_v7 = vpack.c.bf16 %v3726_v6, %v3726_v6 }
 0x1d7   : > { %2527 = vmatmul.msk.f32.gmra.mxu2 %vm288_vm1, %v4557_v37  ;;  %v1027_v44 = vpop.f32.mrf.mxu2 }
 0x1da   : > { %2823 = vxpose.xlu0.b32.cont [8/16] (narrow) %v2822_v63, 8 }
 0x1df   : > { %2528 = vmatmul.msk.f32.gmra.mxu2 %vm288_vm1, %v4559_v11  ;;  %v1030_v61 = vpop.f32.mrf.mxu2 }
 0x1e0   : > { %v1031_v48 = vadd.f32 %v3935_v15, %v1030_v61 }
 0x1e2   : > { %2825 = vxpose.xlu0.b32.cont [9/16] (narrow) %v2824_v1, 8  ;;  %v1118_v30 = vpack.c.bf16 %v1031_v48, %v1031_v48 }
 0x1e4   : > { %1150 = vst.msk [vmem:[#allocation4 + $0x10] sm:$0xf] %vm668_vm2, %v1118_v30  ;;  %v1099_v30 = vpop.f32.mrf.mxu3 }
 0x1e7   : > { %2529 = vmatmul.msk.f32.gmra.mxu2 %vm288_vm1, %v4560_v46  ;;  %v1033_v32 = vpop.f32.mrf.mxu2 }
 0x1e8   : > { %v1034_v12 = vadd.f32 %v3935_v15, %v1033_v32 }
 0x1ea   : > { %2827 = vxpose.xlu0.b32.cont [10/16] (narrow) %v2826_v53, 8  ;;  %v1119_v55 = vpack.c.bf16 %v1034_v12, %v1034_v12 }
 0x1ec   : > { %1151 = vst.msk [vmem:[#allocation4 + $0x14] sm:$0xf] %vm668_vm2, %v1119_v55  ;;  %v1100_v55 = vadd.f32 %v3935_v15, %v1099_v30  ;;  %v1102_v6 = vpop.f32.mrf.mxu3 }
 0x1ed   : > { %v1103_v22 = vadd.f32 %v3935_v15, %v1102_v6 }
 0x1ef   : > { %2530 = vmatmul.msk.f32.gmra.mxu2 %vm288_vm1, %v4561_v38  ;;  %v1036_v4 = vpop.f32.mrf.mxu2 }
 0x1f0   : > { %v1037_v49 = vadd.f32 %v3935_v15, %v1036_v4 }
 0x1f2   : > { %2829 = vxpose.xlu0.b32.cont [11/16] (narrow) %v3867_v39, 8  ;;  %v1028_v39 = vadd.f32 %v3935_v15, %v1027_v44  ;;  %v1120_v42 = vpack.c.bf16 %v1037_v49, %v1037_v49 }
 0x1f4   : > { %v1117_v60 = vpack.c.bf16 %v1028_v39, %v1028_v39  ;;  %1152 = vst.msk [vmem:[#allocation4 + $0x18] sm:$0xf] %vm668_vm2, %v1120_v42 }
 0x1f6   : > { %1149 = vst.msk [vmem:[#allocation4 + $0xc] sm:$0xf] %vm668_vm2, %v1117_v60 }
 0x1f7   : > { %2531 = vmatmul.msk.f32.gmra.mxu2 %vm288_vm1, %v4562_v58 }
 0x1fa   : > { %2831 = vxpose.xlu0.b32.cont [12/16] (narrow) %v2830_v57, 8 }
 0x1ff   : > { %2532 = vmatmul.msk.f32.gmra.mxu2 %vm288_vm1, %v2854_v13  ;;  %v1141_v13 = vpack.c.bf16 %v1100_v55, %v1100_v55 }
 0x201   : > { %1173 = vst.msk [vmem:[#allocation4 + $0x6c] sm:$0xf] %vm668_vm2, %v1141_v13 }
 0x202   : > { %2833 = vxpose.xlu0.b32.cont [13/16] (narrow) %v2832_v9, 8 }
 0x207   : > { %2533 = vmatmul.msk.f32.gmra.mxu2 %vm288_vm1, %v2855_v31 }
 0x20a   : > { %v1039_v54 = vpop.f32.mrf.mxu2  ;;  %2835 = vxpose.xlu0.b32.cont [14/16] (narrow) %v2834_v18, 8  ;;  %v1142_v18 = vpack.c.bf16 %v1103_v22, %v1103_v22 }
 0x20b   : > { %v1040_v50 = vadd.f32 %v3935_v15, %v1039_v54 }
 0x20c   : > { %1174 = vst.msk [vmem:[#allocation4 + $0x70] sm:$0xf] %vm668_vm2, %v1142_v18 }
 0x20d   : > { %v1121_v45 = vpack.c.bf16 %v1040_v50, %v1040_v50 }
 0x20f   : > { %2534 = vmatmul.msk.f32.gmra.mxu2 %vm288_vm1, %v2856_v59  ;;  %1153 = vst.msk [vmem:[#allocation4 + $0x1c] sm:$0xf] %vm668_vm2, %v1121_v45  ;;  %v1105_v59 = vpop.f32.mrf.mxu3 }
 0x212   : > { %v1042_v34 = vpop.f32.mrf.mxu2  ;;  %2837 = vxpose.xlu0.b32.cont [15/16] (narrow) %v3871_v52, 8 }
 0x213   : > { %v1043_v10 = vadd.f32 %v3935_v15, %v1042_v34 }
 0x215   : > { %v1122_v63 = vpack.c.bf16 %v1043_v10, %v1043_v10 }
 0x216   : > { %v2728_v34 = vld [vmem:[#allocation4 + $0x18] sm:$0xff] }
 0x217   : > { %2535 = vmatmul.msk.f32.gmra.mxu2 %vm288_vm1, %v2857_v8  ;;  %1154 = vst.msk [vmem:[#allocation4 + $0x20] sm:$0xf] %vm668_vm2, %v1122_v63  ;;  %v1106_v8 = vadd.f32 %v3935_v15, %v1105_v59  ;;  %v2725_v63 = vld [vmem:[#allocation4] sm:$0xff] }
 0x21a   : > { %2839 = vxpose.xlu0.b32.end [16/16] (narrow) %v3873_v2, 8  ;;  %v1045_v51 = vpop.f32.mrf.mxu2 }
 0x21b   : > { %v1046_v14 = vadd.f32 %v3935_v15, %v1045_v51  ;;  %v2727_v51 = vld [vmem:[#allocation4 + $0x10] sm:$0xff] }
 0x21d   : > { %v1123_v52 = vpack.c.bf16 %v1046_v14, %v1046_v14  ;;  %v2726_v14 = vld [vmem:[#allocation4 + $0x8] sm:$0xff] }
 0x21f   : > { %2536 = vmatmul.msk.f32.gmra.mxu2 %vm288_vm1, %v4567_v62  ;;  %1155 = vst.msk [vmem:[#allocation4 + $0x24] sm:$0xf] %vm668_vm2, %v1123_v52 }
 0x222   : > { %v1048_v43 = vpop.f32.mrf.mxu2 }
 0x223   : > { %v1049_v37 = vadd.f32 %v3935_v15, %v1048_v43  ;;  %v1143_v43 = vpack.c.bf16 %v1106_v8, %v1106_v8 }
 0x225   : > { %v1124_v17 = vpack.c.bf16 %v1049_v37, %v1049_v37  ;;  %1175 = vst.msk [vmem:[#allocation4 + $0x74] sm:$0xf] %vm668_vm2, %v1143_v43 }
 0x226   : > { %v2729_v23 = vld [vmem:[#allocation4 + $0x20] sm:$0xff] }
 0x227   : > { %1156 = vst.msk [vmem:[#allocation4 + $0x28] sm:$0xf] %vm668_vm2, %v1124_v17 }
 0x22a   : > { %v1051_v19 = vpop.f32.mrf.mxu2 }
 0x22b   : > { %v1052_v0 = vadd.f32 %v3935_v15, %v1051_v19  ;;  %v1108_v19 = vpop.f32.mrf.mxu3 }
 0x22c   : > { %v1109_v45 = vadd.f32 %v3935_v15, %v1108_v19 }
 0x22d   : > { %v1125_v1 = vpack.c.bf16 %v1052_v0, %v1052_v0 }
 0x22f   : > { %1157 = vst.msk [vmem:[#allocation4 + $0x2c] sm:$0xf] %vm668_vm2, %v1125_v1 }
 0x232   : > { %v1054_v2 = vpop.f32.mrf.mxu2 }
 0x233   : > { %v1055_v47 = vadd.f32 %v3935_v15, %v1054_v2  ;;  %v1144_v2 = vpack.c.bf16 %v1109_v45, %v1109_v45  ;;  %v1111_v17 = vpop.f32.mrf.mxu3 }
 0x234   : > { %v1112_v0 = vadd.f32 %v3935_v15, %v1111_v17 }
 0x235   : > { %v1126_v56 = vpack.c.bf16 %v1055_v47, %v1055_v47  ;;  %1176 = vst.msk [vmem:[#allocation4 + $0x78] sm:$0xf] %vm668_vm2, %v1144_v2 }
 0x236   : > { %v2730_v16 = vld [vmem:[#allocation4 + $0x28] sm:$0xff]  ;;  %v1145_v1 = vpack.c.bf16 %v1112_v0, %v1112_v0 }
 0x237   : > { %1158 = vst.msk [vmem:[#allocation4 + $0x30] sm:$0xf] %vm668_vm2, %v1126_v56 }
 0x238   : > { %1177 = vst.msk [vmem:[#allocation4 + $0x7c] sm:$0xf] %vm668_vm2, %v1145_v1 }
 0x23a   : > { %v1057_v21 = vpop.f32.mrf.mxu2 }
 0x23b   : > { %v1058_v61 = vadd.f32 %v3935_v15, %v1057_v21 }
 0x23d   : > { %v1127_v35 = vpack.c.bf16 %v1058_v61, %v1058_v61 }
 0x23f   : > { %1159 = vst.msk [vmem:[#allocation4 + $0x34] sm:$0xf] %vm668_vm2, %v1127_v35  ;;  %v2740_v35 = vld [vmem:[#allocation4 + $0x78] sm:$0xff] }
 0x242   : > { %v1060_v11 = vpop.f32.mrf.mxu2 }
 0x243   : > { %v1061_v38 = vadd.f32 %v3935_v15, %v1060_v11 }
 0x245   : > { %v1128_v29 = vpack.c.bf16 %v1061_v38, %v1061_v38 }
 0x246   : > { %v2840_v20 = vpop.trf.xlu0  ;;  %v2731_v9 = vld [vmem:[#allocation4 + $0x30] sm:$0xff] }
 0x247   : > { %v2844_v36 = vunpack.i.h.bf16 %v2840_v20  ;;  %v2841_v53 = vunpack.i.l.bf16 %v2840_v20  ;;  %1160 = vst.msk [vmem:[#allocation4 + $0x38] sm:$0xf] %vm668_vm2, %v1128_v29 }
 0x249   : > { %v986_v44 = vpack.c.bf16 %v2844_v36, %v2841_v53 }
 0x24a   : > { %v1063_v3 = vpop.f32.mrf.mxu2 }
 0x24b   : > { %v988_v46 = vrot.slane %v986_v44, 2  ;;  %v1064_v27 = vadd.f32 %v3935_v15, %v1063_v3 }
 0x24d   : > { %v992_v33 = vsel %vm989_vm3, %v986_v44, %v988_v46  ;;  %v1129_v32 = vpack.c.bf16 %v1064_v27, %v1064_v27 }
 0x24e   : > { %994 = vst [vmem:[#allocation3] sm:$0xf] %v992_v33 }
 0x24f   : > { %1161 = vst.msk [vmem:[#allocation4 + $0x3c] sm:$0xf] %vm668_vm2, %v1129_v32 }
 0x252   : > { %v1066_v40 = vpop.f32.mrf.mxu2 }
 0x253   : > { %v1067_v58 = vadd.f32 %v3935_v15, %v1066_v40 }
 0x255   : > { %v1179_v57 = vld [vmem:[#allocation3] sm:$0xf]  ;;  %v1130_v5 = vpack.c.bf16 %v1067_v58, %v1067_v58 }
 0x256   : > { %1181 = vst [vmem:[#allocation1] ss:$4 sm:$0xff] %v1179_v57  ;;  %v2732_v60 = vld [vmem:[#allocation4 + $0x38] sm:$0xff]  ;;  %v2739_v57 = vld [vmem:[#allocation4 + $0x70] sm:$0xff] }
 0x257   : > { %1162 = vst.msk [vmem:[#allocation4 + $0x40] sm:$0xf] %vm668_vm2, %v1130_v5 }
 0x25a   : > { %v1069_v39 = vpop.f32.mrf.mxu2 }
 0x25b   : > { %v1070_v24 = vadd.f32 %v3935_v15, %v1069_v39 }
 0x25d   : > { %v1182_v48 = vld.sshfl [vmem:[#allocation1] sm:$0xff pattern:$0x73625140]  ;;  %v1183_v12 = vld.sshfl [vmem:[#allocation1 + $0x8] sm:$0xff pattern:$0x73625140]  ;;  %v1131_v26 = vpack.c.bf16 %v1070_v24, %v1070_v24 }
 0x25e   : > { %v1187_v41 = vsel %vm989_vm3, %v1182_v48, 0  ;;  %v1189_v25 = vsel %vm989_vm3, %v1183_v12, 0 }
 0x25f   : > { %1198 = vmatpush.bf16.msrb.mxu3 %v1187_v41  ;;  %1163 = vst.msk [vmem:[#allocation4 + $0x44] sm:$0xf] %vm668_vm2, %v1131_v26 }
 0x262   : > { %2542 = vmatmul.msk.bf16.vlgmr.msrb.gmra.mxu3 %vm288_vm1, %v1178_v7  ;;  %v1072_v4 = vpop.f32.mrf.mxu2 }
 0x263   : > { %1211 = vmatpush.bf16.msra.mxu3 %v1189_v25  ;;  %v1073_v49 = vadd.f32 %v3935_v15, %v1072_v4 }
 0x265   : > { %v1132_v42 = vpack.c.bf16 %v1073_v49, %v1073_v49 }
 0x266   : > { %v2733_v24 = vld [vmem:[#allocation4 + $0x40] sm:$0xff] }
 0x267   : > { %1359 = vmatpush.bf16.msrb.mxu3 %v2732_v60  ;;  %1164 = vst.msk [vmem:[#allocation4 + $0x48] sm:$0xf] %vm668_vm2, %v1132_v42 }
 0x26a   : > { %v1075_v28 = vpop.f32.mrf.mxu2 }
 0x26b   : > { %1360 = vmatpush.bf16.msrb.mxu3 %v2731_v9  ;;  %v1076_v54 = vadd.f32 %v3935_v15, %v1075_v28 }
 0x26d   : > { %v1133_v31 = vpack.c.bf16 %v1076_v54, %v1076_v54 }
 0x26f   : > { %1361 = vmatpush.bf16.msrb.mxu3 %v2730_v16  ;;  %1165 = vst.msk [vmem:[#allocation4 + $0x4c] sm:$0xf] %vm668_vm2, %v1133_v31 }
 0x272   : > { %2543 = vmatmul.msk.bf16.vlgmr.msra.gmra.mxu3 %vm288_vm1, %v1178_v7  ;;  %v1078_v62 = vpop.f32.mrf.mxu2 }
 0x273   : > { %1362 = vmatpush.bf16.msrb.mxu3 %v2729_v23  ;;  %v1079_v50 = vadd.f32 %v3935_v15, %v1078_v62 }
 0x275   : > { %v1134_v10 = vpack.c.bf16 %v1079_v50, %v1079_v50 }
 0x276   : > { %v2734_v12 = vld [vmem:[#allocation4 + $0x48] sm:$0xff] }
 0x277   : > { %1363 = vmatpush.bf16.msrb.mxu3 %v2728_v34  ;;  %1166 = vst.msk [vmem:[#allocation4 + $0x50] sm:$0xf] %vm668_vm2, %v1134_v10 }
 0x27a   : > { %v1081_v52 = vpop.f32.mrf.mxu2 }
 0x27b   : > { %1364 = vmatpush.bf16.msrb.mxu3 %v2727_v51  ;;  %v1082_v21 = vadd.f32 %v3935_v15, %v1081_v52 }
 0x27d   : > { %v1135_v37 = vpack.c.bf16 %v1082_v21, %v1082_v21 }
 0x27f   : > { %1365 = vmatpush.bf16.msrb.mxu3 %v2726_v14  ;;  %1167 = vst.msk [vmem:[#allocation4 + $0x54] sm:$0xf] %vm668_vm2, %v1135_v37 }
 0x282   : > { %v1084_v47 = vpop.f32.mrf.mxu2 }
 0x283   : > { %1366 = vmatpush.bf16.msrb.mxu3 %v2725_v63  ;;  %v1085_v56 = vadd.f32 %v3935_v15, %v1084_v47 }
 0x285   : > { %v1136_v11 = vpack.c.bf16 %v1085_v56, %v1085_v56 }
 0x286   : > { %v2735_v39 = vld [vmem:[#allocation4 + $0x50] sm:$0xff] }
 0x287   : > { %1168 = vst.msk [vmem:[#allocation4 + $0x58] sm:$0xf] %vm668_vm2, %v1136_v11  ;;  %1372 = vmatpush.bf16.msra.mxu3 %v2740_v35 }
 0x28a   : > { %v1087_v20 = vpop.f32.mrf.mxu2 }
 0x28b   : > { %v1088_v36 = vadd.f32 %v3935_v15, %v1087_v20  ;;  %1373 = vmatpush.bf16.msra.mxu3 %v2739_v57 }
 0x28d   : > { %v1137_v53 = vpack.c.bf16 %v1088_v36, %v1088_v36 }
 0x28f   : > { %1169 = vst.msk [vmem:[#allocation4 + $0x5c] sm:$0xf] %vm668_vm2, %v1137_v53 }
 0x292   : > { %v1090_v44 = vpop.f32.mrf.mxu2 }
 0x293   : > { %v1091_v46 = vadd.f32 %v3935_v15, %v1090_v44 }
 0x295   : > { %v1138_v3 = vpack.c.bf16 %v1091_v46, %v1091_v46 }
 0x296   : > { %v2736_v5 = vld [vmem:[#allocation4 + $0x58] sm:$0xff] }
 0x297   : > { %1170 = vst.msk [vmem:[#allocation4 + $0x60] sm:$0xf] %vm668_vm2, %v1138_v3 }
 0x29a   : > { %v1093_v33 = vpop.f32.mrf.mxu2 }
 0x29b   : > { %v1094_v61 = vadd.f32 %v3935_v15, %v1093_v33 }
 0x29d   : > { %v1139_v38 = vpack.c.bf16 %v1094_v61, %v1094_v61 }
 0x29f   : > { %1171 = vst.msk [vmem:[#allocation4 + $0x64] sm:$0xf] %vm668_vm2, %v1139_v38 }
 0x2a2   : > { %v1096_v27 = vpop.f32.mrf.mxu2 }
 0x2a3   : > { %v1097_v29 = vadd.f32 %v3935_v15, %v1096_v27 }
 0x2a5   : > { %v1140_v40 = vpack.c.bf16 %v1097_v29, %v1097_v29 }
 0x2a6   : > { %v2737_v58 = vld [vmem:[#allocation4 + $0x60] sm:$0xff] }
 0x2a7   : > { %1172 = vst.msk [vmem:[#allocation4 + $0x68] sm:$0xf] %vm668_vm2, %v1140_v40 }
 0x2ae   : > { %v2738_v32 = vld [vmem:[#allocation4 + $0x68] sm:$0xff] }
 0x2af   : > { %1374 = vmatpush.bf16.msra.mxu3 %v2738_v32 }
 0x2b3   : > { %1375 = vmatpush.bf16.msra.mxu3 %v2737_v58 }
 0x2b7   : > { %1376 = vmatpush.bf16.msra.mxu3 %v2736_v5 }
 0x2bb   : > { %1377 = vmatpush.bf16.msra.mxu3 %v2735_v39 }
 0x2bf   : > { %1378 = vmatpush.bf16.msra.mxu3 %v2734_v12 }
 0x2c3   : > { %1379 = vmatpush.bf16.msra.mxu3 %v2733_v24 }
 0x2e5   : > { %v1200_v48 = vpop.f32.mrf.mxu3 }
 0x2e6   : > { %v1218_v25 = vsel %vm1217_vm4, %v1200_v48, -inf }
 0x2ed   : > { %v1202_v41 = vpop.f32.mrf.mxu3 }
 0x2f5   : > { %v1213_v15 = vpop.f32.mrf.mxu3 }
 0x2f6   : > { %v1219_v26 = vsel %vm1217_vm4, %v1213_v15, -inf }
 0x2f7   : > { %v1220_v7 = vmax.f32 %v1218_v25, %v1219_v26 }
 0x2f9   : > { %1221 = vmax.xlane.f32.xlu1 %v1220_v7 }
 0x2fd   : > { %v1215_v60 = vpop.f32.mrf.mxu3 }
 0x36c   : > { %v1222_v30 = vpop.xlane.xlu1 %1221 }
 0x36d   : > { %v1223_v55 = vsub.f32 %v1200_v48, %v1222_v30  ;;  %v1224_v9 = vsub.f32 %v1213_v15, %v1222_v30 }
 0x36f   : > { %v1225_v4 = vmul.f32 1.442695, %v1223_v55  ;;  %v1227_v13 = vmul.f32 1.442695, %v1224_v9 }
 0x371   : > { %2848 = vpow2.f32 %v1225_v4 }
 0x372   : > { %2850 = vpow2.f32 %v1227_v13 }
 0x377   : > { %v2849_v49 = vpop.eup %2848 }
 0x378   : > { %v2851_v42 = vpop.eup %2850  ;;  %v1229_v16 = vpack.c.bf16 %v2849_v49, %v2849_v49  ;;  %v1385_v6 = vsel %vm1217_vm4, %v2849_v49, 0.0 }
 0x379   : > { %v1386_v22 = vsel %vm1217_vm4, %v2851_v42, 0.0  ;;  %v1230_v28 = vpack.c.bf16 %v2851_v42, %v2851_v42 }
 0x37a   : > { %1367 = vmatmul.bf16.vlgmr.msrb.gmra.mxu3 %v1229_v16  ;;  %v1387_v23 = vadd.f32 %v1386_v22, %v1385_v6 }
 0x37c   : > { %1388 = vadd.xlane.f32.xlu1 %v1387_v23 }
 0x38a   : > { %1380 = vmatmul.bf16.vlgmr.msra.gmra.mxu3 %v1230_v28 }
 0x3ef   : > { %v1389_v18 = vpop.xlane.xlu1 %1388 }
 0x3f0   : > { %2852 = vrcp.f32 %v1389_v18  ;;  %v1401_v43 = vand.u32 2147483648, %v1389_v18  ;;  %vm1395_vm6 = vweird.f32 %v1389_v18  ;;  %v1399_v50 = vand.u32 2147483647, %v1389_v18 }
 0x3f2   : > { %v1402_v14 = vor.u32 1.1754944e-38, %v1401_v43  ;;  %vm1400_vm8 = vcmp.eq.f32.partialorder %v1399_v50, 8.507059e+37 }
 0x3f6   : > { %v2853_v54 = vpop.eup %2852 }
 0x3f7   : > { %v1391_v31 = vmul.f32 %v2853_v54, %v1389_v18  ;;  %vm1396_vm5 = vweird.f32 %v2853_v54 }
 0x3f8   : > { %vm1397_vm7 = vmor %vm1395_vm6, %vm1396_vm5 }
 0x3f9   : > { %v1392_v59 = vsub.f32 1.0, %v1391_v31 }
 0x3fb   : > { %v1393_v8 = vmul.f32 %v2853_v54, %v1392_v59 }
 0x3fd   : > { %v1368_v34 = vpop.f32.mrf.mxu3  ;;  %v1394_v62 = vadd.f32 %v2853_v54, %v1393_v8 }
 0x3ff   : > { %v1398_v10 = vsel %vm1397_vm7, %v2853_v54, %v1394_v62 }
 0x400   : > { %v1403_v63 = vsel %vm1400_vm8, %v1402_v14, %v1398_v10 }
 0x405   : > { %v1370_v51 = vpop.f32.mrf.mxu3 }
 0x40d   : > { %v1381_v19 = vpop.f32.mrf.mxu3 }
 0x40e   : > { %v1382_v45 = vadd.f32 %v1381_v19, %v1368_v34 }
 0x410   : > { %v1404_v52 = vmul.f32 %v1403_v63, %v1382_v45 }
 0x412   : > { %1406 = vst.msk [vmem:[#allocation5] sm:$0x1] %vm1405_vm9, %v1404_v52 }
 0x415   : > { %v1383_v2 = vpop.f32.mrf.mxu3 }
 0x416 PF: > { %v1428_v21 = vld [vmem:[#allocation3] sm:$0xf]  ;;  %s2608_s29 = sshll.u32 %s2977_s18, 7  ;;  %vm1498_vm10 = vcmask 1041408   ;;  %vm1473_vm11 = vcmask 31744   ;;  %v2755_v23 = vld [vmem:[#allocation4 + $0x30] sm:$0xff] }
 0x417   : > { %1470 = vst [vmem:[#allocation1] ss:$4 sm:$0xff] %v1428_v21  ;;  %s1408_s6 = sshra.s32 %s2608_s29, 3  ;;  %v2756_v6 = vld [vmem:[#allocation4 + $0x38] sm:$0xff]  ;;  %v2763_v28 = vld [vmem:[#allocation4 + $0x70] sm:$0xff]  ;;  %v2754_v34 = vld [vmem:[#allocation4 + $0x28] sm:$0xff]  ;;  %s4196_s9 = scalar_lea.vmem %s3061_s30, %s2608_s29 }
 0x418   : > { %s2609_s7 = sshll.u32 %s1408_s6, 2  ;;  %v2764_v22 = vld [vmem:[#allocation4 + $0x78] sm:$0xff]  ;;  %1937 = vmatpush.bf16.msra.mxu2 %v2756_v6  ;;  %v2762_v59 = vld [vmem:[#allocation4 + $0x68] sm:$0xff]  ;;  %v2753_v62 = vld [vmem:[#allocation4 + $0x20] sm:$0xff] }
 0x419   : > { %s1411_s8 = scalar_lea.vmem [#allocation2], %s2609_s7  ;;  %1986 = vmatpush.bf16.msra.mxu3 %v2764_v22  ;;  %v2761_v43 = vld [vmem:[#allocation4 + $0x60] sm:$0xff]  ;;  %v2752_v10 = vld [vmem:[#allocation4 + $0x18] sm:$0xff]  ;;  %v2751_v63 = vld [vmem:[#allocation4 + $0x10] sm:$0xff] }
 0x41a   : > { %v2741_v1 = vld [vmem:[%s1411_s8] sm:$0xff]  ;;  %v2742_v56 = vld [vmem:[%s1411_s8 + $0x8] sm:$0xff]  ;;  %v2743_v11 = vld [vmem:[%s1411_s8 + $0x10] sm:$0xff] }
 0x41b   : > { %v2744_v20 = vld [vmem:[%s1411_s8 + $0x18] sm:$0xff]  ;;  %v2745_v36 = vld [vmem:[%s1411_s8 + $0x20] sm:$0xff]  ;;  %v2746_v53 = vld [vmem:[%s1411_s8 + $0x28] sm:$0xff] }
 0x41c   : > { %v2747_v44 = vld [vmem:[%s1411_s8 + $0x30] sm:$0xff]  ;;  %v2748_v46 = vld [vmem:[%s1411_s8 + $0x38] sm:$0xff]  ;;  %1938 = vmatpush.bf16.msra.mxu2 %v2755_v23  ;;  %v2760_v14 = vld [vmem:[#allocation4 + $0x58] sm:$0xff] }
 0x41d   : > { %1987 = vmatpush.bf16.msra.mxu3 %v2763_v28  ;;  %v2759_v52 = vld [vmem:[#allocation4 + $0x50] sm:$0xff]  ;;  %v2750_v21 = vld [vmem:[#allocation4 + $0x8] sm:$0xff] }
 0x41e   : > { %v1471_v37 = vld.sshfl [vmem:[#allocation1] sm:$0xff pattern:$0x73625140]  ;;  %v1472_v17 = vld.sshfl [vmem:[#allocation1 + $0x8] sm:$0xff pattern:$0x73625140] }
 0x41f   : > { %v1499_v0 = vsel %vm1498_vm10, %v1471_v37, 0  ;;  %v1501_v47 = vsel %vm1498_vm10, %v1472_v17, 0  ;;  %v2758_v37 = vld [vmem:[#allocation4 + $0x48] sm:$0xff] }
 0x420   : > { %1510 = vmatpush.bf16.msra.mxu0 %v1499_v0  ;;  %1559 = vmatpush.bf16.msra.mxu1 %v1501_v47  ;;  %v2749_v47 = vld [vmem:[#allocation4] sm:$0xff] }
 0x421   : > { %1939 = vmatpush.bf16.msra.mxu2 %v2754_v34  ;;  %1988 = vmatpush.bf16.msra.mxu3 %v2762_v59 }
 0x423   : > { %2642 = vmatmul.msk.bf16.vlgmr.msra.gmra.mxu0 %vm1473_vm11, %v2741_v1  ;;  %2650 = vmatmul.msk.bf16.vlgmr.msra.gmra.mxu1 %vm1473_vm11, %v2741_v1  ;;  %v2757_v1 = vld [vmem:[#allocation4 + $0x40] sm:$0xff] }
 0x425   : > { %1940 = vmatpush.bf16.msra.mxu2 %v2753_v62  ;;  %1989 = vmatpush.bf16.msra.mxu3 %v2761_v43 }
 0x429   : > { %1941 = vmatpush.bf16.msra.mxu2 %v2752_v10  ;;  %1990 = vmatpush.bf16.msra.mxu3 %v2760_v14 }
 0x42d   : > { %1942 = vmatpush.bf16.msra.mxu2 %v2751_v63  ;;  %1991 = vmatpush.bf16.msra.mxu3 %v2759_v52 }
 0x431   : > { %1943 = vmatpush.bf16.msra.mxu2 %v2750_v21  ;;  %1992 = vmatpush.bf16.msra.mxu3 %v2758_v37 }
 0x433   : > { %2643 = vmatmul.msk.bf16.gmra.mxu0 %vm1473_vm11, %v2742_v56  ;;  %2651 = vmatmul.msk.bf16.gmra.mxu1 %vm1473_vm11, %v2742_v56 }
 0x435   : > { %1944 = vmatpush.bf16.msra.mxu2 %v2749_v47  ;;  %1993 = vmatpush.bf16.msra.mxu3 %v2757_v1 }
 0x443   : > { %2644 = vmatmul.msk.bf16.gmra.mxu0 %vm1473_vm11, %v2743_v11  ;;  %2652 = vmatmul.msk.bf16.gmra.mxu1 %vm1473_vm11, %v2743_v11 }
 0x453   : > { %2645 = vmatmul.msk.bf16.gmra.mxu0 %vm1473_vm11, %v2744_v20  ;;  %2653 = vmatmul.msk.bf16.gmra.mxu1 %vm1473_vm11, %v2744_v20 }
 0x463   : > { %2646 = vmatmul.msk.bf16.gmra.mxu0 %vm1473_vm11, %v2745_v36  ;;  %2654 = vmatmul.msk.bf16.gmra.mxu1 %vm1473_vm11, %v2745_v36 }
 0x473   : > { %2647 = vmatmul.msk.bf16.gmra.mxu0 %vm1473_vm11, %v2746_v53  ;;  %2655 = vmatmul.msk.bf16.gmra.mxu1 %vm1473_vm11, %v2746_v53 }
 0x483   : > { %2648 = vmatmul.msk.bf16.gmra.mxu0 %vm1473_vm11, %v2747_v44  ;;  %2656 = vmatmul.msk.bf16.gmra.mxu1 %vm1473_vm11, %v2747_v44 }
 0x493   : > { %2649 = vmatmul.msk.bf16.gmra.mxu0 %vm1473_vm11, %v2748_v46  ;;  %2657 = vmatmul.msk.bf16.gmra.mxu1 %vm1473_vm11, %v2748_v46 }
 0x4a0   : > { %v4060_v3 = vpop.f32.mrf.mxu0  ;;  %v4062_v33 = vpop.f32.mrf.mxu1 }
 0x4a1   : > { %v1601_v61 = vmax.f32 %v4060_v3, %v4062_v33 }
 0x4a3   : > { %1602 = vmax.xlane.f32.xlu0 %v1601_v61 }
 0x4a8   : > { %v4066_v38 = vpop.f32.mrf.mxu0  ;;  %v4068_v27 = vpop.f32.mrf.mxu1 }
 0x4a9   : > { %v1604_v35 = vmax.f32 %v4066_v38, %v4068_v27 }
 0x4ab   : > { %1605 = vmax.xlane.f32.xlu0 %v1604_v35 }
 0x4b0   : > { %v4072_v29 = vpop.f32.mrf.mxu0  ;;  %v4074_v40 = vpop.f32.mrf.mxu1 }
 0x4b1   : > { %v1607_v57 = vmax.f32 %v4072_v29, %v4074_v40 }
 0x4b3   : > { %1608 = vmax.xlane.f32.xlu1 %v1607_v57 }
 0x4b8   : > { %v4078_v32 = vpop.f32.mrf.mxu0  ;;  %v4080_v58 = vpop.f32.mrf.mxu1 }
 0x4b9   : > { %v1610_v5 = vmax.f32 %v4078_v32, %v4080_v58 }
 0x4bb   : > { %1611 = vmax.xlane.f32.xlu1 %v1610_v5 }
 0x4c0   : > { %v4084_v39 = vpop.f32.mrf.mxu0  ;;  %v4086_v48 = vpop.f32.mrf.mxu1 }
 0x4c1   : > { %v1613_v12 = vmax.f32 %v4084_v39, %v4086_v48 }
 0x4c3   : > { %1614 = vmax.xlane.f32.xlu2 %v1613_v12 }
 0x4c8   : > { %v4090_v24 = vpop.f32.mrf.mxu0  ;;  %v4092_v41 = vpop.f32.mrf.mxu1 }
 0x4c9   : > { %v1616_v15 = vmax.f32 %v4090_v24, %v4092_v41 }
 0x4cb   : > { %1617 = vmax.xlane.f32.xlu2 %v1616_v15 }
 0x4d0   : > { %v4096_v25 = vpop.f32.mrf.mxu0  ;;  %v4098_v26 = vpop.f32.mrf.mxu1 }
 0x4d1   : > { %v1619_v7 = vmax.f32 %v4096_v25, %v4098_v26 }
 0x4d3   : > { %1620 = vmax.xlane.f32.xlu0 %v1619_v7 }
 0x4d8   : > { %v4102_v60 = vpop.f32.mrf.mxu0  ;;  %v4104_v30 = vpop.f32.mrf.mxu1 }
 0x4d9   : > { %v1622_v55 = vmax.f32 %v4102_v60, %v4104_v30 }
 0x4db   : > { %1623 = vmax.xlane.f32.xlu1 %v1622_v55 }
 0x4e0   : > { %v4108_v9 = vpop.f32.mrf.mxu0  ;;  %v4110_v4 = vpop.f32.mrf.mxu1 }
 0x4e1   : > { %v1625_v13 = vmax.f32 %v4108_v9, %v4110_v4 }
 0x4e3   : > { %1626 = vmax.xlane.f32.xlu2 %v1625_v13 }
 0x4e8   : > { %v4114_v49 = vpop.f32.mrf.mxu0  ;;  %v4116_v42 = vpop.f32.mrf.mxu1 }
 0x4e9   : > { %v1628_v16 = vmax.f32 %v4114_v49, %v4116_v42 }
 0x4eb   : > { %1629 = vmax.xlane.f32.xlu0 %v1628_v16 }
 0x4f0   : > { %v4120_v18 = vpop.f32.mrf.mxu0  ;;  %v4122_v54 = vpop.f32.mrf.mxu1 }
 0x4f1   : > { %v1631_v31 = vmax.f32 %v4120_v18, %v4122_v54 }
 0x4f3   : > { %1632 = vmax.xlane.f32.xlu1 %v1631_v31 }
 0x4f8   : > { %v4126_v8 = vpop.f32.mrf.mxu0  ;;  %v4128_v51 = vpop.f32.mrf.mxu1 }
 0x4f9   : > { %v1634_v50 = vmax.f32 %v4126_v8, %v4128_v51 }
 0x4fb   : > { %1635 = vmax.xlane.f32.xlu2 %v1634_v50 }
 0x500   : > { %v4132_v19 = vpop.f32.mrf.mxu0  ;;  %v4134_v45 = vpop.f32.mrf.mxu1 }
 0x501   : > { %v1637_v2 = vmax.f32 %v4132_v19, %v4134_v45 }
 0x503   : > { %1638 = vmax.xlane.f32.xlu0 %v1637_v2 }
 0x508   : > { %v4138_v17 = vpop.f32.mrf.mxu0  ;;  %v4140_v0 = vpop.f32.mrf.mxu1 }
 0x509   : > { %v1640_v56 = vmax.f32 %v4138_v17, %v4140_v0 }
 0x50b   : > { %1641 = vmax.xlane.f32.xlu1 %v1640_v56 }
 0x510   : > { %v4144_v11 = vpop.f32.mrf.mxu0  ;;  %v4146_v20 = vpop.f32.mrf.mxu1 }
 0x511   : > { %v1643_v36 = vmax.f32 %v4144_v11, %v4146_v20 }
 0x513   : > { %1644 = vmax.xlane.f32.xlu2 %v1643_v36 }
 0x516   : > { %v1603_v53 = vpop.xlane.xlu0 %1602 }
 0x517   : > { %v1649_v44 = vsub.f32 %v4060_v3, %v1603_v53  ;;  %v1650_v46 = vsub.f32 %v4062_v33, %v1603_v53 }
 0x518   : > { %v4152_v61 = vpop.f32.mrf.mxu0  ;;  %v4154_v35 = vpop.f32.mrf.mxu1 }
 0x519   : > { %v1681_v57 = vmul.f32 1.442695, %v1649_v44  ;;  %v1683_v5 = vmul.f32 1.442695, %v1650_v46  ;;  %v1646_v12 = vmax.f32 %v4152_v61, %v4154_v35 }
 0x51b   : > { %2859 = vpow2.f32 %v1681_v57  ;;  %1647 = vmax.xlane.f32.xlu0 %v1646_v12 }
 0x51c   : > { %2861 = vpow2.f32 %v1683_v5 }
 0x51e   : > { %v1606_v15 = vpop.xlane.xlu0 %1605 }
 0x51f   : > { %v1651_v7 = vsub.f32 %v4066_v38, %v1606_v15  ;;  %v1652_v55 = vsub.f32 %v4068_v27, %v1606_v15 }
 0x521   : > { %v2860_v3 = vpop.eup %2859  ;;  %v1685_v13 = vmul.f32 1.442695, %v1651_v7  ;;  %v1687_v33 = vmul.f32 1.442695, %v1652_v55 }
 0x522   : > { %v2862_v16 = vpop.eup %2861 }
 0x523   : > { %2863 = vpow2.f32 %v1685_v13  ;;  %v1745_v6 = vadd.f32 %v2862_v16, %v2860_v3 }
 0x524   : > { %2865 = vpow2.f32 %v1687_v33 }
 0x525   : > { %1746 = vadd.xlane.f32.xlu1 %v1745_v6 }
 0x526   : > { %v1609_v22 = vpop.xlane.xlu1 %1608 }
 0x527   : > { %v1653_v23 = vsub.f32 %v4072_v29, %v1609_v22  ;;  %v1654_v28 = vsub.f32 %v4074_v40, %v1609_v22 }
 0x529   : > { %v2864_v31 = vpop.eup %2863  ;;  %v1689_v34 = vmul.f32 1.442695, %v1653_v23  ;;  %v1691_v59 = vmul.f32 1.442695, %v1654_v28 }
 0x52a   : > { %v2866_v62 = vpop.eup %2865  ;;  %v1793_v38 = vpack.c.bf16 %v2864_v31, %v2860_v3 }
 0x52b   : > { %2867 = vpow2.f32 %v1689_v34  ;;  %v1794_v27 = vpack.c.bf16 %v2866_v62, %v2862_v16  ;;  %v1748_v43 = vadd.f32 %v2866_v62, %v2864_v31 }
 0x52c   : > { %2869 = vpow2.f32 %v1691_v59  ;;  %1945 = vmatmul.bf16.vlgmr.msra.gmra.mxu2 %v1793_v38 }
 0x52d   : > { %1994 = vmatmul.bf16.vlgmr.msra.gmra.mxu3 %v1794_v27  ;;  %1749 = vadd.xlane.f32.xlu2 %v1748_v43 }
 0x52e   : > { %v1612_v50 = vpop.xlane.xlu1 %1611 }
 0x52f   : > { %v1655_v10 = vsub.f32 %v4078_v32, %v1612_v50  ;;  %v1656_v14 = vsub.f32 %v4080_v58, %v1612_v50 }
 0x531   : > { %v2868_v29 = vpop.eup %2867  ;;  %v1693_v63 = vmul.f32 1.442695, %v1655_v10  ;;  %v1695_v40 = vmul.f32 1.442695, %v1656_v14 }
 0x532   : > { %v2870_v52 = vpop.eup %2869 }
 0x533   : > { %2871 = vpow2.f32 %v1693_v63  ;;  %v1751_v2 = vadd.f32 %v2870_v52, %v2868_v29 }
 0x534   : > { %2873 = vpow2.f32 %v1695_v40 }
 0x535   : > { %1752 = vadd.xlane.f32.xlu0 %v1751_v2 }
 0x536   : > { %v1615_v21 = vpop.xlane.xlu2 %1614 }
 0x537   : > { %v1657_v37 = vsub.f32 %v4084_v39, %v1615_v21  ;;  %v1658_v47 = vsub.f32 %v4086_v48, %v1615_v21 }
 0x539   : > { %v2872_v1 = vpop.eup %2871  ;;  %v1697_v56 = vmul.f32 1.442695, %v1657_v37  ;;  %v1699_v36 = vmul.f32 1.442695, %v1658_v47 }
 0x53a   : > { %v2874_v53 = vpop.eup %2873  ;;  %v1795_v32 = vpack.c.bf16 %v2872_v1, %v2868_v29 }
 0x53b   : > { %2875 = vpow2.f32 %v1697_v56  ;;  %v1796_v58 = vpack.c.bf16 %v2874_v53, %v2870_v52  ;;  %v1754_v44 = vadd.f32 %v2874_v53, %v2872_v1 }
 0x53c   : > { %2877 = vpow2.f32 %v1699_v36  ;;  %1950 = vmatmul.bf16.gmra.mxu2 %v1795_v32 }
 0x53d   : > { %1999 = vmatmul.bf16.gmra.mxu3 %v1796_v58  ;;  %1755 = vadd.xlane.f32.xlu1 %v1754_v44 }
 0x53e   : > { %v1618_v46 = vpop.xlane.xlu2 %1617 }
 0x53f   : > { %v1659_v57 = vsub.f32 %v4090_v24, %v1618_v46  ;;  %v1660_v5 = vsub.f32 %v4092_v41, %v1618_v46 }
 0x541   : > { %v2876_v39 = vpop.eup %2875  ;;  %v1701_v12 = vmul.f32 1.442695, %v1659_v57  ;;  %v1703_v48 = vmul.f32 1.442695, %v1660_v5 }
 0x542   : > { %v2878_v15 = vpop.eup %2877 }
 0x543   : > { %2879 = vpow2.f32 %v1701_v12  ;;  %v1757_v7 = vadd.f32 %v2878_v15, %v2876_v39 }
 0x544   : > { %2881 = vpow2.f32 %v1703_v48 }
 0x545   : > { %1758 = vadd.xlane.f32.xlu2 %v1757_v7 }
 0x546   : > { %v1621_v55 = vpop.xlane.xlu0 %1620 }
 0x547   : > { %v1661_v3 = vsub.f32 %v4096_v25, %v1621_v55  ;;  %v1662_v13 = vsub.f32 %v4098_v26, %v1621_v55 }
 0x549   : > { %v2880_v33 = vpop.eup %2879  ;;  %v1705_v16 = vmul.f32 1.442695, %v1661_v3  ;;  %v1707_v6 = vmul.f32 1.442695, %v1662_v13 }
 0x54a   : > { %v2882_v22 = vpop.eup %2881  ;;  %v1797_v24 = vpack.c.bf16 %v2880_v33, %v2876_v39 }
 0x54b   : > { %2883 = vpow2.f32 %v1705_v16  ;;  %v1798_v41 = vpack.c.bf16 %v2882_v22, %v2878_v15  ;;  %v1760_v23 = vadd.f32 %v2882_v22, %v2880_v33 }
 0x54c   : > { %2885 = vpow2.f32 %v1707_v6  ;;  %1955 = vmatmul.bf16.gmra.mxu2 %v1797_v24 }
 0x54d   : > { %2004 = vmatmul.bf16.gmra.mxu3 %v1798_v41  ;;  %1761 = vadd.xlane.f32.xlu0 %v1760_v23 }
 0x54e   : > { %v1624_v28 = vpop.xlane.xlu1 %1623 }
 0x54f   : > { %v1663_v31 = vsub.f32 %v4102_v60, %v1624_v28  ;;  %v1664_v34 = vsub.f32 %v4104_v30, %v1624_v28 }
 0x551   : > { %v2884_v25 = vpop.eup %2883  ;;  %v1709_v59 = vmul.f32 1.442695, %v1663_v31  ;;  %v1711_v26 = vmul.f32 1.442695, %v1664_v34 }
 0x552   : > { %v2886_v62 = vpop.eup %2885 }
 0x553   : > { %2887 = vpow2.f32 %v1709_v59  ;;  %v1763_v38 = vadd.f32 %v2886_v62, %v2884_v25 }
 0x554   : > { %2889 = vpow2.f32 %v1711_v26 }
 0x555   : > { %1764 = vadd.xlane.f32.xlu1 %v1763_v38 }
 0x556   : > { %v1627_v27 = vpop.xlane.xlu2 %1626 }
 0x557   : > { %v1665_v43 = vsub.f32 %v4108_v9, %v1627_v27  ;;  %v1666_v50 = vsub.f32 %v4110_v4, %v1627_v27 }
 0x559   : > { %v2888_v10 = vpop.eup %2887  ;;  %v1713_v14 = vmul.f32 1.442695, %v1665_v43  ;;  %v1715_v29 = vmul.f32 1.442695, %v1666_v50 }
 0x55a   : > { %v2890_v63 = vpop.eup %2889  ;;  %v1799_v60 = vpack.c.bf16 %v2888_v10, %v2884_v25 }
 0x55b   : > { %2891 = vpow2.f32 %v1713_v14  ;;  %v1800_v30 = vpack.c.bf16 %v2890_v63, %v2886_v62  ;;  %v1766_v40 = vadd.f32 %v2890_v63, %v2888_v10 }
 0x55c   : > { %2893 = vpow2.f32 %v1715_v29  ;;  %1960 = vmatmul.bf16.gmra.mxu2 %v1799_v60 }
 0x55d   : > { %2009 = vmatmul.bf16.gmra.mxu3 %v1800_v30  ;;  %1767 = vadd.xlane.f32.xlu2 %v1766_v40 }
 0x55e   : > { %v1630_v52 = vpop.xlane.xlu0 %1629 }
 0x55f   : > { %v1667_v2 = vsub.f32 %v4114_v49, %v1630_v52  ;;  %v1668_v21 = vsub.f32 %v4116_v42, %v1630_v52 }
 0x561   : > { %v2892_v9 = vpop.eup %2891  ;;  %v1717_v37 = vmul.f32 1.442695, %v1667_v2  ;;  %v1719_v4 = vmul.f32 1.442695, %v1668_v21 }
 0x562   : > { %v2894_v47 = vpop.eup %2893 }
 0x563   : > { %2895 = vpow2.f32 %v1717_v37  ;;  %v1769_v1 = vadd.f32 %v2894_v47, %v2892_v9 }
 0x564   : > { %2897 = vpow2.f32 %v1719_v4 }
 0x565   : > { %1770 = vadd.xlane.f32.xlu0 %v1769_v1 }
 0x566   : > { %v1633_v56 = vpop.xlane.xlu1 %1632 }
 0x567   : > { %v1669_v36 = vsub.f32 %v4120_v18, %v1633_v56  ;;  %v1670_v53 = vsub.f32 %v4122_v54, %v1633_v56 }
 0x569   : > { %v2896_v32 = vpop.eup %2895  ;;  %v1721_v58 = vmul.f32 1.442695, %v1669_v36  ;;  %v1723_v44 = vmul.f32 1.442695, %v1670_v53 }
 0x56a   : > { %v2898_v46 = vpop.eup %2897  ;;  %v1801_v49 = vpack.c.bf16 %v2896_v32, %v2892_v9 }
 0x56b   : > { %2899 = vpow2.f32 %v1721_v58  ;;  %v1802_v42 = vpack.c.bf16 %v2898_v46, %v2894_v47  ;;  %v1772_v57 = vadd.f32 %v2898_v46, %v2896_v32 }
 0x56c   : > { %2901 = vpow2.f32 %v1723_v44  ;;  %1965 = vmatmul.bf16.gmra.mxu2 %v1801_v49 }
 0x56d   : > { %2014 = vmatmul.bf16.gmra.mxu3 %v1802_v42  ;;  %1773 = vadd.xlane.f32.xlu1 %v1772_v57 }
 0x56e   : > { %v1636_v5 = vpop.xlane.xlu2 %1635 }
 0x56f   : > { %v1671_v39 = vsub.f32 %v4126_v8, %v1636_v5  ;;  %v1672_v12 = vsub.f32 %v4128_v51, %v1636_v5 }
 0x571   : > { %v2900_v18 = vpop.eup %2899  ;;  %v1725_v48 = vmul.f32 1.442695, %v1671_v39  ;;  %v1727_v54 = vmul.f32 1.442695, %v1672_v12 }
 0x572   : > { %v2902_v15 = vpop.eup %2901 }
 0x573   : > { %2903 = vpow2.f32 %v1725_v48  ;;  %v1775_v7 = vadd.f32 %v2902_v15, %v2900_v18 }
 0x574   : > { %2905 = vpow2.f32 %v1727_v54 }
 0x575   : > { %1776 = vadd.xlane.f32.xlu2 %v1775_v7 }
 0x576   : > { %v1639_v55 = vpop.xlane.xlu0 %1638 }
 0x577   : > { %v1673_v3 = vsub.f32 %v4132_v19, %v1639_v55  ;;  %v1674_v13 = vsub.f32 %v4134_v45, %v1639_v55  ;;  %v2276_v55 = vld [vmem:[%s4196_s9] sm:$0xff] }
 0x579   : > { %v2904_v33 = vpop.eup %2903  ;;  %v1729_v16 = vmul.f32 1.442695, %v1673_v3  ;;  %v1731_v6 = vmul.f32 1.442695, %v1674_v13 }
 0x57a   : > { %v2906_v22 = vpop.eup %2905  ;;  %v1803_v8 = vpack.c.bf16 %v2904_v33, %v2900_v18 }
 0x57b   : > { %2907 = vpow2.f32 %v1729_v16  ;;  %v1804_v51 = vpack.c.bf16 %v2906_v22, %v2902_v15  ;;  %v1778_v24 = vadd.f32 %v2906_v22, %v2904_v33  ;;  %v4204_v33 = vld [vmem:[#allocation5] ss:$0 sm:$0xff] }
 0x57c   : > { %2909 = vpow2.f32 %v1731_v6  ;;  %1970 = vmatmul.bf16.gmra.mxu2 %v1803_v8 }
 0x57d   : > { %2019 = vmatmul.bf16.gmra.mxu3 %v1804_v51  ;;  %1779 = vadd.xlane.f32.xlu0 %v1778_v24 }
 0x57e   : > { %v1642_v41 = vpop.xlane.xlu1 %1641 }
 0x57f   : > { %v1675_v23 = vsub.f32 %v4138_v17, %v1642_v41  ;;  %v1676_v28 = vsub.f32 %v4140_v0, %v1642_v41 }
 0x581   : > { %v2908_v19 = vpop.eup %2907  ;;  %v1733_v31 = vmul.f32 1.442695, %v1675_v23  ;;  %v1735_v45 = vmul.f32 1.442695, %v1676_v28 }
 0x582   : > { %v2910_v34 = vpop.eup %2909 }
 0x583   : > { %2911 = vpow2.f32 %v1733_v31  ;;  %v1781_v25 = vadd.f32 %v2910_v34, %v2908_v19 }
 0x584   : > { %2913 = vpow2.f32 %v1735_v45 }
 0x585   : > { %1782 = vadd.xlane.f32.xlu1 %v1781_v25 }
 0x586   : > { %v1645_v59 = vpop.xlane.xlu2 %1644 }
 0x587   : > { %v1677_v26 = vsub.f32 %v4144_v11, %v1645_v59  ;;  %v1678_v62 = vsub.f32 %v4146_v20, %v1645_v59 }
 0x589   : > { %v2912_v38 = vpop.eup %2911  ;;  %v1737_v27 = vmul.f32 1.442695, %v1677_v26  ;;  %v1739_v43 = vmul.f32 1.442695, %v1678_v62  ;;  %v2277_v26 = vld [vmem:[%s4196_s9 + $0x8] sm:$0xff] }
 0x58a   : > { %v2914_v50 = vpop.eup %2913  ;;  %v1805_v17 = vpack.c.bf16 %v2912_v38, %v2908_v19 }
 0x58b   : > { %2915 = vpow2.f32 %v1737_v27  ;;  %v1806_v0 = vpack.c.bf16 %v2914_v50, %v2910_v34  ;;  %v1784_v10 = vadd.f32 %v2914_v50, %v2912_v38 }
 0x58c   : > { %2917 = vpow2.f32 %v1739_v43  ;;  %1975 = vmatmul.bf16.gmra.mxu2 %v1805_v17 }
 0x58d   : > { %2024 = vmatmul.bf16.gmra.mxu3 %v1806_v0  ;;  %1785 = vadd.xlane.f32.xlu2 %v1784_v10 }
 0x58e   : > { %v1648_v14 = vpop.xlane.xlu0 %1647 }
 0x58f   : > { %v1679_v29 = vsub.f32 %v4152_v61, %v1648_v14  ;;  %v1680_v63 = vsub.f32 %v4154_v35, %v1648_v14 }
 0x591   : > { %v2916_v11 = vpop.eup %2915  ;;  %v1741_v60 = vmul.f32 1.442695, %v1679_v29  ;;  %v1743_v20 = vmul.f32 1.442695, %v1680_v63 }
 0x592   : > { %v2918_v30 = vpop.eup %2917 }
 0x593   : > { %2919 = vpow2.f32 %v1741_v60  ;;  %v1787_v40 = vadd.f32 %v2918_v30, %v2916_v11 }
 0x594   : > { %2921 = vpow2.f32 %v1743_v20 }
 0x595   : > { %1788 = vadd.xlane.f32.xlu0 %v1787_v40 }
 0x598   : > { %v1747_v52 = vpop.xlane.xlu1 %1746 }
 0x599   : > { %v2920_v2 = vpop.eup %2919  ;;  %2923 = vrcp.f32 %v1747_v52  ;;  %v2046_v46 = vand.u32 2147483648, %v1747_v52  ;;  %vm2040_vm13 = vweird.f32 %v1747_v52  ;;  %v2044_v49 = vand.u32 2147483647, %v1747_v52 }
 0x59a   : > { %v2922_v21 = vpop.eup %2921  ;;  %v1807_v9 = vpack.c.bf16 %v2920_v2, %v2916_v11 }
 0x59b   : > { %v1808_v37 = vpack.c.bf16 %v2922_v21, %v2918_v30  ;;  %v1790_v4 = vadd.f32 %v2922_v21, %v2920_v2  ;;  %v2047_v48 = vor.u32 1.1754944e-38, %v2046_v46  ;;  %vm2045_vm15 = vcmp.eq.f32.partialorder %v2044_v49, 8.507059e+37  ;;  %v2278_v2 = vld [vmem:[%s4196_s9 + $0x10] sm:$0xff] }
 0x59c   : > { %1980 = vmatmul.bf16.gmra.mxu2 %v1807_v9 }
 0x59d   : > { %2029 = vmatmul.bf16.gmra.mxu3 %v1808_v37  ;;  %1791 = vadd.xlane.f32.xlu1 %v1790_v4 }
 0x59f   : > { %v2924_v61 = vpop.eup %2923 }
 0x5a0   : > { %v2036_v35 = vmul.f32 %v2924_v61, %v1747_v52  ;;  %v1750_v47 = vpop.xlane.xlu2 %1749  ;;  %vm2041_vm12 = vweird.f32 %v2924_v61 }
 0x5a1   : > { %2925 = vrcp.f32 %v1750_v47  ;;  %vm2042_vm14 = vmor %vm2040_vm13, %vm2041_vm12  ;;  %v2061_v6 = vand.u32 2147483648, %v1750_v47  ;;  %vm2055_vm1 = vweird.f32 %v1750_v47  ;;  %v2059_v8 = vand.u32 2147483647, %v1750_v47 }
 0x5a2   : > { %v2037_v1 = vsub.f32 1.0, %v2036_v35 }
 0x5a3   : > { %v2062_v45 = vor.u32 1.1754944e-38, %v2061_v6  ;;  %vm2060_vm3 = vcmp.eq.f32.partialorder %v2059_v8, 8.507059e+37 }
 0x5a4   : > { %v2038_v36 = vmul.f32 %v2924_v61, %v2037_v1 }
 0x5a6   : > { %v2039_v44 = vadd.f32 %v2924_v61, %v2038_v36 }
 0x5a7   : > { %v2926_v56 = vpop.eup %2925 }
 0x5a8   : > { %v2051_v53 = vmul.f32 %v2926_v56, %v1750_v47  ;;  %v4188_v32 = vpop.xlane.xlu0 %1752  ;;  %v2043_v39 = vsel %vm2042_vm14, %v2924_v61, %v2039_v44  ;;  %vm2056_vm0 = vweird.f32 %v2926_v56 }
 0x5a9   : > { %2927 = vrcp.f32 %v4188_v32  ;;  %v2048_v7 = vsel %vm2045_vm15, %v2047_v48, %v2043_v39  ;;  %vm2057_vm2 = vmor %vm2055_vm1, %vm2056_vm0  ;;  %v2076_v43 = vand.u32 2147483648, %v4188_v32  ;;  %vm2070_vm5 = vweird.f32 %v4188_v32 }
 0x5aa   : > { %v2052_v58 = vsub.f32 1.0, %v2051_v53  ;;  %v2074_v17 = vand.u32 2147483647, %v4188_v32 }
 0x5ab   : > { %v2077_v20 = vor.u32 1.1754944e-38, %v2076_v43 }
 0x5ac   : > { %v2053_v57 = vmul.f32 %v2926_v56, %v2052_v58  ;;  %vm2075_vm7 = vcmp.eq.f32.partialorder %v2074_v17, 8.507059e+37 }
 0x5ae   : > { %v2054_v16 = vadd.f32 %v2926_v56, %v2053_v57  ;;  %v2279_v57 = vld [vmem:[%s4196_s9 + $0x18] sm:$0xff] }
 0x5af   : > { %v4191_v42 = vpop.eup %2927  ;;  %v1946_v5 = vpop.f32.mrf.mxu2 }
 0x5b0   : > { %v2066_v12 = vmul.f32 %v4191_v42, %v4188_v32  ;;  %v1995_v18 = vpop.f32.mrf.mxu3  ;;  %v4200_v54 = vpop.xlane.xlu1 %1755  ;;  %v2058_v28 = vsel %vm2057_vm2, %v2926_v56, %v2054_v16  ;;  %vm2071_vm4 = vweird.f32 %v4191_v42 }
 0x5b1   : > { %v1996_v15 = vadd.f32 %v1995_v18, %v1946_v5  ;;  %2929 = vrcp.f32 %v4200_v54  ;;  %v2063_v59 = vsel %vm2060_vm3, %v2062_v45, %v2058_v28  ;;  %vm2072_vm6 = vmor %vm2070_vm5, %vm2071_vm4  ;;  %v2091_v4 = vand.u32 2147483648, %v4200_v54 }
 0x5b2   : > { %v2067_v3 = vsub.f32 1.0, %v2066_v12  ;;  %vm2085_vm9 = vweird.f32 %v4200_v54  ;;  %v2089_v35 = vand.u32 2147483647, %v4200_v54 }
 0x5b3   : > { %v2049_v13 = vmul.f32 %v2048_v7, %v1996_v15  ;;  %v2092_v44 = vor.u32 1.1754944e-38, %v2091_v4 }
 0x5b4   : > { %v2068_v24 = vmul.f32 %v4191_v42, %v2067_v3  ;;  %vm2090_vm12 = vcmp.eq.f32.partialorder %v2089_v35, 8.507059e+37 }
 0x5b5   : > { %v2292_v22 = vadd.f32 %v2276_v55, %v2049_v13 }
 0x5b6   : > { %v2069_v27 = vadd.f32 %v4191_v42, %v2068_v24 }
 0x5b7   : > { %v4206_v51 = vpop.eup %2929  ;;  %v2312_v41 = vadd.f32 %v4204_v33, %v2292_v22  ;;  %v1948_v23 = vpop.f32.mrf.mxu2 }
 0x5b8   : > { %v2081_v19 = vmul.f32 %v4206_v51, %v4200_v54  ;;  %v1997_v31 = vpop.f32.mrf.mxu3  ;;  %v4212_v34 = vpop.xlane.xlu2 %1758  ;;  %v2073_v63 = vsel %vm2072_vm6, %v4191_v42, %v2069_v27  ;;  %vm2086_vm8 = vweird.f32 %v4206_v51 }
 0x5b9   : > { %2328 = vst.msk [vmem:[%s3066_s10] sm:$0xff] %vm1473_vm11, %v2312_v41  ;;  %v1998_v25 = vadd.f32 %v1997_v31, %v1948_v23  ;;  %2931 = vrcp.f32 %v4212_v34  ;;  %v2078_v52 = vsel %vm2075_vm7, %v2077_v20, %v2073_v63  ;;  %vm2087_vm10 = vmor %vm2085_vm9, %vm2086_vm8  ;;  %v2106_v18 = vand.u32 2147483648, %v4212_v34  ;;  %v2280_v41 = vld [vmem:[%s4196_s9 + $0x20] sm:$0xff] }
 0x5ba   : > { %v2082_v62 = vsub.f32 1.0, %v2081_v19  ;;  %vm2100_vm14 = vweird.f32 %v4212_v34  ;;  %v2104_v54 = vand.u32 2147483647, %v4212_v34 }
 0x5bb   : > { %v2064_v38 = vmul.f32 %v2063_v59, %v1998_v25  ;;  %v2107_v22 = vor.u32 1.1754944e-38, %v2106_v18 }
 0x5bc   : > { %v2083_v10 = vmul.f32 %v4206_v51, %v2082_v62  ;;  %vm2105_vm0 = vcmp.eq.f32.partialorder %v2104_v54, 8.507059e+37 }
 0x5bd   : > { %v2293_v50 = vadd.f32 %v2277_v26, %v2064_v38 }
 0x5be   : > { %v2084_v37 = vadd.f32 %v4206_v51, %v2083_v10 }
 0x5bf   : > { %v4223_v0 = vpop.eup %2931  ;;  %v2313_v14 = vadd.f32 %v4204_v33, %v2293_v50  ;;  %v1951_v29 = vpop.f32.mrf.mxu2 }
 0x5c0   : > { %v2096_v11 = vmul.f32 %v4223_v0, %v4212_v34  ;;  %v2000_v60 = vpop.f32.mrf.mxu3  ;;  %v4230_v30 = vpop.xlane.xlu0 %1761  ;;  %v2088_v53 = vsel %vm2087_vm10, %v4206_v51, %v2084_v37  ;;  %vm2101_vm13 = vweird.f32 %v4223_v0 }
 0x5c1   : > { %2329 = vst.msk [vmem:[%s3066_s10 + $0x8] sm:$0xff] %vm1473_vm11, %v2313_v14  ;;  %v2001_v40 = vadd.f32 %v2000_v60, %v1951_v29  ;;  %2933 = vrcp.f32 %v4230_v30  ;;  %v2093_v42 = vsel %vm2090_vm12, %v2092_v44, %v2088_v53  ;;  %vm2102_vm15 = vmor %vm2100_vm14, %vm2101_vm13  ;;  %v2121_v31 = vand.u32 2147483648, %v4230_v30  ;;  %v2281_v14 = vld [vmem:[%s4196_s9 + $0x28] sm:$0xff] }
 0x5c2   : > { %v2097_v21 = vsub.f32 1.0, %v2096_v11  ;;  %vm2115_vm2 = vweird.f32 %v4230_v30  ;;  %v2119_v34 = vand.u32 2147483647, %v4230_v30 }
 0x5c3   : > { %v2079_v9 = vmul.f32 %v2078_v52, %v2001_v40  ;;  %v2122_v50 = vor.u32 1.1754944e-38, %v2121_v31 }
 0x5c4   : > { %v2098_v1 = vmul.f32 %v4223_v0, %v2097_v21  ;;  %vm2120_vm4 = vcmp.eq.f32.partialorder %v2119_v34, 8.507059e+37 }
 0x5c5   : > { %v2294_v61 = vadd.f32 %v2278_v2, %v2079_v9 }
 0x5c6   : > { %v2099_v12 = vadd.f32 %v4223_v0, %v2098_v1 }
 0x5c7   : > { %v4241_v47 = vpop.eup %2933  ;;  %v2314_v56 = vadd.f32 %v4204_v33, %v2294_v61  ;;  %v1953_v36 = vpop.f32.mrf.mxu2 }
 0x5c8   : > { %v2111_v32 = vmul.f32 %v4241_v47, %v4230_v30  ;;  %v2002_v58 = vpop.f32.mrf.mxu3  ;;  %v4248_v46 = vpop.xlane.xlu1 %1764  ;;  %v2103_v13 = vsel %vm2102_vm15, %v4223_v0, %v2099_v12  ;;  %vm2116_vm1 = vweird.f32 %v4241_v47 }
 0x5c9   : > { %2330 = vst.msk [vmem:[%s3066_s10 + $0x10] sm:$0xff] %vm1473_vm11, %v2314_v56  ;;  %v2003_v49 = vadd.f32 %v2002_v58, %v1953_v36  ;;  %2935 = vrcp.f32 %v4248_v46  ;;  %v2108_v24 = vsel %vm2105_vm0, %v2107_v22, %v2103_v13  ;;  %vm2117_vm3 = vmor %vm2115_vm2, %vm2116_vm1  ;;  %v2136_v60 = vand.u32 2147483648, %v4248_v46  ;;  %v2282_v56 = vld [vmem:[%s4196_s9 + $0x30] sm:$0xff] }
 0x5ca   : > { %v2112_v5 = vsub.f32 1.0, %v2111_v32  ;;  %vm2130_vm6 = vweird.f32 %v4248_v46  ;;  %v2134_v30 = vand.u32 2147483647, %v4248_v46 }
 0x5cb   : > { %v2094_v39 = vmul.f32 %v2093_v42, %v2003_v49  ;;  %v2137_v61 = vor.u32 1.1754944e-38, %v2136_v60 }
 0x5cc   : > { %v2113_v7 = vmul.f32 %v4241_v47, %v2112_v5  ;;  %vm2135_vm8 = vcmp.eq.f32.partialorder %v2134_v30, 8.507059e+37 }
 0x5cd   : > { %v2295_v48 = vadd.f32 %v2279_v57, %v2094_v39 }
 0x5ce   : > { %v2114_v19 = vadd.f32 %v4241_v47, %v2113_v7 }
 0x5cf   : > { %v4259_v15 = vpop.eup %2935  ;;  %v2315_v55 = vadd.f32 %v4204_v33, %v2295_v48  ;;  %v1956_v3 = vpop.f32.mrf.mxu2 }
 0x5d0   : > { %v2126_v16 = vmul.f32 %v4259_v15, %v4248_v46  ;;  %v2005_v6 = vpop.f32.mrf.mxu3  ;;  %v4266_v8 = vpop.xlane.xlu2 %1767  ;;  %v2118_v38 = vsel %vm2117_vm3, %v4241_v47, %v2114_v19  ;;  %vm2131_vm5 = vweird.f32 %v4259_v15 }
 0x5d1   : > { %2331 = vst.msk [vmem:[%s3066_s10 + $0x18] sm:$0xff] %vm1473_vm11, %v2315_v55  ;;  %v2006_v51 = vadd.f32 %v2005_v6, %v1956_v3  ;;  %2937 = vrcp.f32 %v4266_v8  ;;  %v2123_v10 = vsel %vm2120_vm4, %v2122_v50, %v2118_v38  ;;  %vm2132_vm7 = vmor %vm2130_vm6, %vm2131_vm5  ;;  %v2151_v58 = vand.u32 2147483648, %v4266_v8  ;;  %v2283_v55 = vld [vmem:[%s4196_s9 + $0x38] sm:$0xff] }
 0x5d2   : > { %v2127_v23 = vsub.f32 1.0, %v2126_v16  ;;  %vm2145_vm10 = vweird.f32 %v4266_v8  ;;  %v2149_v46 = vand.u32 2147483647, %v4266_v8 }
 0x5d3   : > { %v2109_v28 = vmul.f32 %v2108_v24, %v2006_v51  ;;  %v2152_v48 = vor.u32 1.1754944e-38, %v2151_v58 }
 0x5d4   : > { %v2128_v59 = vmul.f32 %v4259_v15, %v2127_v23  ;;  %vm2150_vm13 = vcmp.eq.f32.partialorder %v2149_v46, 8.507059e+37 }
 0x5d5   : > { %v2296_v45 = vadd.f32 %v2280_v41, %v2109_v28 }
 0x5d6   : > { %v2129_v11 = vadd.f32 %v4259_v15, %v2128_v59 }
 0x5d7   : > { %v4277_v25 = vpop.eup %2937  ;;  %v2316_v26 = vadd.f32 %v4204_v33, %v2296_v45  ;;  %v1958_v62 = vpop.f32.mrf.mxu2 }
 0x5d8   : > { %v2141_v27 = vmul.f32 %v4277_v25, %v4266_v8  ;;  %v2007_v43 = vpop.f32.mrf.mxu3  ;;  %v4284_v17 = vpop.xlane.xlu0 %1770  ;;  %v2133_v9 = vsel %vm2132_vm7, %v4259_v15, %v2129_v11  ;;  %vm2146_vm9 = vweird.f32 %v4277_v25 }
 0x5d9   : > { %2332 = vst.msk [vmem:[%s3066_s10 + $0x20] sm:$0xff] %vm1473_vm11, %v2316_v26  ;;  %v2008_v0 = vadd.f32 %v2007_v43, %v1958_v62  ;;  %2939 = vrcp.f32 %v4284_v17  ;;  %v2138_v1 = vsel %vm2135_vm8, %v2137_v61, %v2133_v9  ;;  %vm2147_vm12 = vmor %vm2145_vm10, %vm2146_vm9  ;;  %v2166_v6 = vand.u32 2147483648, %v4284_v17  ;;  %v2284_v26 = vld [vmem:[%s4196_s9 + $0x40] sm:$0xff] }
 0x5da   : > { %v2142_v29 = vsub.f32 1.0, %v2141_v27  ;;  %vm2160_vm15 = vweird.f32 %v4284_v17  ;;  %v2164_v8 = vand.u32 2147483647, %v4284_v17 }
 0x5db   : > { %v2124_v63 = vmul.f32 %v2123_v10, %v2008_v0  ;;  %v2167_v45 = vor.u32 1.1754944e-38, %v2166_v6 }
 0x5dc   : > { %v2143_v52 = vmul.f32 %v4277_v25, %v2142_v29  ;;  %vm2165_vm1 = vcmp.eq.f32.partialorder %v2164_v8, 8.507059e+37 }
 0x5dd   : > { %v2297_v20 = vadd.f32 %v2281_v14, %v2124_v63 }
 0x5de   : > { %v2144_v32 = vadd.f32 %v4277_v25, %v2143_v52 }
 0x5df   : > { %v4295_v40 = vpop.eup %2939  ;;  %v2317_v2 = vadd.f32 %v4204_v33, %v2297_v20  ;;  %v1961_v21 = vpop.f32.mrf.mxu2 }
 0x5e0   : > { %v2156_v37 = vmul.f32 %v4295_v40, %v4284_v17  ;;  %v2010_v4 = vpop.f32.mrf.mxu3  ;;  %v4302_v35 = vpop.xlane.xlu1 %1773  ;;  %v2148_v39 = vsel %vm2147_vm12, %v4277_v25, %v2144_v32  ;;  %vm2161_vm14 = vweird.f32 %v4295_v40 }
 0x5e1   : > { %2333 = vst.msk [vmem:[%s3066_s10 + $0x28] sm:$0xff] %vm1473_vm11, %v2317_v2  ;;  %v2011_v47 = vadd.f32 %v2010_v4, %v1961_v21  ;;  %2941 = vrcp.f32 %v4302_v35  ;;  %v2153_v7 = vsel %vm2150_vm13, %v2152_v48, %v2148_v39  ;;  %vm2162_vm0 = vmor %vm2160_vm15, %vm2161_vm14  ;;  %v2181_v43 = vand.u32 2147483648, %v4302_v35  ;;  %v2285_v2 = vld [vmem:[%s4196_s9 + $0x48] sm:$0xff] }
 0x5e2   : > { %v2157_v36 = vsub.f32 1.0, %v2156_v37  ;;  %vm2175_vm3 = vweird.f32 %v4302_v35  ;;  %v2179_v17 = vand.u32 2147483647, %v4302_v35 }
 0x5e3   : > { %v2139_v53 = vmul.f32 %v2138_v1, %v2011_v47  ;;  %v2182_v20 = vor.u32 1.1754944e-38, %v2181_v43 }
 0x5e4   : > { %v2158_v42 = vmul.f32 %v4295_v40, %v2157_v36  ;;  %vm2180_vm5 = vcmp.eq.f32.partialorder %v2179_v17, 8.507059e+37 }
 0x5e5   : > { %v2298_v44 = vadd.f32 %v2282_v56, %v2139_v53 }
 0x5e6   : > { %v2159_v16 = vadd.f32 %v4295_v40, %v2158_v42 }
 0x5e7   : > { %v4313_v49 = vpop.eup %2941  ;;  %v2318_v57 = vadd.f32 %v4204_v33, %v2298_v44  ;;  %v1963_v5 = vpop.f32.mrf.mxu2 }
 0x5e8   : > { %v2171_v12 = vmul.f32 %v4313_v49, %v4302_v35  ;;  %v2012_v18 = vpop.f32.mrf.mxu3  ;;  %v4320_v54 = vpop.xlane.xlu2 %1776  ;;  %v2163_v28 = vsel %vm2162_vm0, %v4295_v40, %v2159_v16  ;;  %vm2176_vm2 = vweird.f32 %v4313_v49 }
 0x5e9   : > { %2334 = vst.msk [vmem:[%s3066_s10 + $0x30] sm:$0xff] %vm1473_vm11, %v2318_v57  ;;  %v2013_v15 = vadd.f32 %v2012_v18, %v1963_v5  ;;  %2943 = vrcp.f32 %v4320_v54  ;;  %v2168_v59 = vsel %vm2165_vm1, %v2167_v45, %v2163_v28  ;;  %vm2177_vm4 = vmor %vm2175_vm3, %vm2176_vm2  ;;  %v2196_v4 = vand.u32 2147483648, %v4320_v54  ;;  %v2286_v57 = vld [vmem:[%s4196_s9 + $0x50] sm:$0xff] }
 0x5ea   : > { %v2172_v3 = vsub.f32 1.0, %v2171_v12  ;;  %vm2190_vm7 = vweird.f32 %v4320_v54  ;;  %v2194_v35 = vand.u32 2147483647, %v4320_v54 }
 0x5eb   : > { %v2154_v13 = vmul.f32 %v2153_v7, %v2013_v15  ;;  %v2197_v44 = vor.u32 1.1754944e-38, %v2196_v4 }
 0x5ec   : > { %v2173_v24 = vmul.f32 %v4313_v49, %v2172_v3  ;;  %vm2195_vm9 = vcmp.eq.f32.partialorder %v2194_v35, 8.507059e+37 }
 0x5ed   : > { %v2299_v22 = vadd.f32 %v2283_v55, %v2154_v13 }
 0x5ee   : > { %v2174_v27 = vadd.f32 %v4313_v49, %v2173_v24 }
 0x5ef   : > { %v4331_v51 = vpop.eup %2943  ;;  %v2319_v41 = vadd.f32 %v4204_v33, %v2299_v22  ;;  %v1966_v23 = vpop.f32.mrf.mxu2 }
 0x5f0   : > { %v2186_v19 = vmul.f32 %v4331_v51, %v4320_v54  ;;  %v2015_v31 = vpop.f32.mrf.mxu3  ;;  %v4338_v34 = vpop.xlane.xlu0 %1779  ;;  %v2178_v63 = vsel %vm2177_vm4, %v4313_v49, %v2174_v27  ;;  %vm2191_vm6 = vweird.f32 %v4331_v51 }
 0x5f1   : > { %2335 = vst.msk [vmem:[%s3066_s10 + $0x38] sm:$0xff] %vm1473_vm11, %v2319_v41  ;;  %v2016_v25 = vadd.f32 %v2015_v31, %v1966_v23  ;;  %2945 = vrcp.f32 %v4338_v34  ;;  %v2183_v52 = vsel %vm2180_vm5, %v2182_v20, %v2178_v63  ;;  %vm2192_vm8 = vmor %vm2190_vm7, %vm2191_vm6  ;;  %v2211_v18 = vand.u32 2147483648, %v4338_v34  ;;  %v2287_v41 = vld [vmem:[%s4196_s9 + $0x58] sm:$0xff] }
 0x5f2   : > { %v2187_v62 = vsub.f32 1.0, %v2186_v19  ;;  %vm2205_vm12 = vweird.f32 %v4338_v34  ;;  %v2209_v54 = vand.u32 2147483647, %v4338_v34 }
 0x5f3   : > { %v2169_v38 = vmul.f32 %v2168_v59, %v2016_v25  ;;  %v2212_v22 = vor.u32 1.1754944e-38, %v2211_v18 }
 0x5f4   : > { %v2188_v10 = vmul.f32 %v4331_v51, %v2187_v62  ;;  %vm2210_vm14 = vcmp.eq.f32.partialorder %v2209_v54, 8.507059e+37 }
 0x5f5   : > { %v2300_v50 = vadd.f32 %v2284_v26, %v2169_v38 }
 0x5f6   : > { %v2189_v37 = vadd.f32 %v4331_v51, %v2188_v10 }
 0x5f7   : > { %v4349_v0 = vpop.eup %2945  ;;  %v2320_v14 = vadd.f32 %v4204_v33, %v2300_v50  ;;  %v1968_v29 = vpop.f32.mrf.mxu2 }
 0x5f8   : > { %v2201_v11 = vmul.f32 %v4349_v0, %v4338_v34  ;;  %v2017_v60 = vpop.f32.mrf.mxu3  ;;  %v4356_v30 = vpop.xlane.xlu1 %1782  ;;  %v2193_v53 = vsel %vm2192_vm8, %v4331_v51, %v2189_v37  ;;  %vm2206_vm10 = vweird.f32 %v4349_v0 }
 0x5f9   : > { %2336 = vst.msk [vmem:[%s3066_s10 + $0x40] sm:$0xff] %vm1473_vm11, %v2320_v14  ;;  %v2018_v40 = vadd.f32 %v2017_v60, %v1968_v29  ;;  %2947 = vrcp.f32 %v4356_v30  ;;  %v2198_v42 = vsel %vm2195_vm9, %v2197_v44, %v2193_v53  ;;  %vm2207_vm13 = vmor %vm2205_vm12, %vm2206_vm10  ;;  %v2226_v31 = vand.u32 2147483648, %v4356_v30  ;;  %v2288_v14 = vld [vmem:[%s4196_s9 + $0x60] sm:$0xff] }
 0x5fa   : > { %v2202_v21 = vsub.f32 1.0, %v2201_v11  ;;  %vm2220_vm0 = vweird.f32 %v4356_v30  ;;  %v2224_v34 = vand.u32 2147483647, %v4356_v30 }
 0x5fb   : > { %v2184_v9 = vmul.f32 %v2183_v52, %v2018_v40  ;;  %v2227_v50 = vor.u32 1.1754944e-38, %v2226_v31 }
 0x5fc   : > { %v2203_v1 = vmul.f32 %v4349_v0, %v2202_v21  ;;  %vm2225_vm2 = vcmp.eq.f32.partialorder %v2224_v34, 8.507059e+37 }
 0x5fd   : > { %v2301_v61 = vadd.f32 %v2285_v2, %v2184_v9 }
 0x5fe   : > { %v2204_v12 = vadd.f32 %v4349_v0, %v2203_v1  ;;  %v2289_v1 = vld [vmem:[%s4196_s9 + $0x68] sm:$0xff] }
 0x5ff   : > { %v4367_v47 = vpop.eup %2947  ;;  %v2321_v56 = vadd.f32 %v4204_v33, %v2301_v61  ;;  %v1971_v36 = vpop.f32.mrf.mxu2 }
 0x600   : > { %v2216_v32 = vmul.f32 %v4367_v47, %v4356_v30  ;;  %v2020_v58 = vpop.f32.mrf.mxu3  ;;  %v4374_v46 = vpop.xlane.xlu2 %1785  ;;  %v2208_v13 = vsel %vm2207_vm13, %v4349_v0, %v2204_v12  ;;  %vm2221_vm15 = vweird.f32 %v4367_v47 }
 0x601   : > { %2337 = vst.msk [vmem:[%s3066_s10 + $0x48] sm:$0xff] %vm1473_vm11, %v2321_v56  ;;  %v2021_v49 = vadd.f32 %v2020_v58, %v1971_v36  ;;  %2949 = vrcp.f32 %v4374_v46  ;;  %v2213_v24 = vsel %vm2210_vm14, %v2212_v22, %v2208_v13  ;;  %vm2222_vm1 = vmor %vm2220_vm0, %vm2221_vm15  ;;  %v2241_v60 = vand.u32 2147483648, %v4374_v46 }
 0x602   : > { %v2217_v5 = vsub.f32 1.0, %v2216_v32  ;;  %vm2235_vm4 = vweird.f32 %v4374_v46  ;;  %v2239_v20 = vand.u32 2147483647, %v4374_v46 }
 0x603   : > { %v2199_v39 = vmul.f32 %v2198_v42, %v2021_v49  ;;  %v2242_v37 = vor.u32 1.1754944e-38, %v2241_v60 }
 0x604   : > { %v2218_v7 = vmul.f32 %v4367_v47, %v2217_v5  ;;  %vm2240_vm6 = vcmp.eq.f32.partialorder %v2239_v20, 8.507059e+37 }
 0x605   : > { %v2302_v48 = vadd.f32 %v2286_v57, %v2199_v39 }
 0x606   : > { %v2219_v19 = vadd.f32 %v4367_v47, %v2218_v7 }
 0x607   : > { %v2950_v15 = vpop.eup %2949  ;;  %v2322_v55 = vadd.f32 %v4204_v33, %v2302_v48  ;;  %v1973_v3 = vpop.f32.mrf.mxu2  ;;  %v2290_v48 = vld [vmem:[%s4196_s9 + $0x70] sm:$0xff] }
 0x608   : > { %v2231_v16 = vmul.f32 %v2950_v15, %v4374_v46  ;;  %v2022_v6 = vpop.f32.mrf.mxu3  ;;  %v4389_v8 = vpop.xlane.xlu0 %1788  ;;  %v2223_v38 = vsel %vm2222_vm1, %v4367_v47, %v2219_v19  ;;  %vm2236_vm3 = vweird.f32 %v2950_v15 }
 0x609   : > { %2338 = vst.msk [vmem:[%s3066_s10 + $0x50] sm:$0xff] %vm1473_vm11, %v2322_v55  ;;  %v2023_v51 = vadd.f32 %v2022_v6, %v1973_v3  ;;  %2951 = vrcp.f32 %v4389_v8  ;;  %v2228_v10 = vsel %vm2225_vm2, %v2227_v50, %v2223_v38  ;;  %vm2237_vm5 = vmor %vm2235_vm4, %vm2236_vm3  ;;  %v2256_v32 = vand.u32 2147483648, %v4389_v8 }
 0x60a   : > { %v2232_v23 = vsub.f32 1.0, %v2231_v16  ;;  %vm2250_vm8 = vweird.f32 %v4389_v8  ;;  %v2254_v58 = vand.u32 2147483647, %v4389_v8 }
 0x60b   : > { %v2214_v28 = vmul.f32 %v2213_v24, %v2023_v51  ;;  %v2257_v5 = vor.u32 1.1754944e-38, %v2256_v32 }
 0x60c   : > { %v2233_v59 = vmul.f32 %v2950_v15, %v2232_v23  ;;  %vm2255_vm10 = vcmp.eq.f32.partialorder %v2254_v58, 8.507059e+37 }
 0x60d   : > { %v2303_v45 = vadd.f32 %v2287_v41, %v2214_v28  ;;  %v2291_v41 = vld [vmem:[%s4196_s9 + $0x78] sm:$0xff] }
 0x60e   : > { %v2234_v11 = vadd.f32 %v2950_v15, %v2233_v59 }
 0x60f   : > { %v2952_v25 = vpop.eup %2951  ;;  %v2323_v26 = vadd.f32 %v4204_v33, %v2303_v45  ;;  %v1976_v62 = vpop.f32.mrf.mxu2 }
 0x610   : > { %v2246_v27 = vmul.f32 %v2952_v25, %v4389_v8  ;;  %v2025_v43 = vpop.f32.mrf.mxu3  ;;  %v4403_v17 = vpop.xlane.xlu1 %1791  ;;  %v2238_v9 = vsel %vm2237_vm5, %v2950_v15, %v2234_v11  ;;  %vm2251_vm7 = vweird.f32 %v2952_v25 }
 0x611   : > { %2339 = vst.msk [vmem:[%s3066_s10 + $0x58] sm:$0xff] %vm1473_vm11, %v2323_v26  ;;  %v2026_v0 = vadd.f32 %v2025_v43, %v1976_v62  ;;  %2953 = vrcp.f32 %v4403_v17  ;;  %v2243_v47 = vsel %vm2240_vm6, %v2242_v37, %v2238_v9  ;;  %vm2252_vm9 = vmor %vm2250_vm8, %vm2251_vm7  ;;  %v2271_v7 = vand.u32 2147483648, %v4403_v17 }
 0x612   : > { %v2247_v29 = vsub.f32 1.0, %v2246_v27  ;;  %vm2265_vm13 = vweird.f32 %v4403_v17  ;;  %v2269_v55 = vand.u32 2147483647, %v4403_v17 }
 0x613   : > { %v2229_v63 = vmul.f32 %v2228_v10, %v2026_v0  ;;  %v2272_v22 = vor.u32 1.1754944e-38, %v2271_v7 }
 0x614   : > { %v2248_v52 = vmul.f32 %v2952_v25, %v2247_v29  ;;  %vm2270_vm15 = vcmp.eq.f32.partialorder %v2269_v55, 8.507059e+37 }
 0x615   : > { %v2304_v30 = vadd.f32 %v2288_v14, %v2229_v63 }
 0x616   : > { %v2249_v53 = vadd.f32 %v2952_v25, %v2248_v52 }
 0x617   : > { %v2954_v40 = vpop.eup %2953  ;;  %v2324_v2 = vadd.f32 %v4204_v33, %v2304_v30  ;;  %v1978_v21 = vpop.f32.mrf.mxu2 }
 0x618   : > { %v2261_v4 = vmul.f32 %v2954_v40, %v4403_v17  ;;  %v2027_v61 = vpop.f32.mrf.mxu3  ;;  %v2253_v57 = vsel %vm2252_vm9, %v2952_v25, %v2249_v53  ;;  %vm2266_vm12 = vweird.f32 %v2954_v40 }
 0x619   : > { %2340 = vst.msk [vmem:[%s3066_s10 + $0x60] sm:$0xff] %vm1473_vm11, %v2324_v2  ;;  %v2028_v35 = vadd.f32 %v2027_v61, %v1978_v21  ;;  %v2258_v18 = vsel %vm2255_vm10, %v2257_v5, %v2253_v57  ;;  %vm2267_vm14 = vmor %vm2265_vm13, %vm2266_vm12 }
 0x61a   : > { %v2262_v56 = vsub.f32 1.0, %v2261_v4 }
 0x61b   : > { %v2244_v36 = vmul.f32 %v2243_v47, %v2028_v35 }
 0x61c   : > { %v2263_v46 = vmul.f32 %v2954_v40, %v2262_v56 }
 0x61d   : > { %v2305_v44 = vadd.f32 %v2289_v1, %v2244_v36 }
 0x61e   : > { %v2264_v15 = vadd.f32 %v2954_v40, %v2263_v46 }
 0x61f   : > { %v2325_v49 = vadd.f32 %v4204_v33, %v2305_v44  ;;  %v1981_v42 = vpop.f32.mrf.mxu2 }
 0x620   : > { %v2030_v39 = vpop.f32.mrf.mxu3  ;;  %v2268_v6 = vsel %vm2267_vm14, %v2954_v40, %v2264_v15 }
 0x621   : > { %2341 = vst.msk [vmem:[%s3066_s10 + $0x68] sm:$0xff] %vm1473_vm11, %v2325_v49  ;;  %v2031_v12 = vadd.f32 %v2030_v39, %v1981_v42  ;;  %v2273_v24 = vsel %vm2270_vm15, %v2272_v22, %v2268_v6 }
 0x623   : > { %v2259_v54 = vmul.f32 %v2258_v18, %v2031_v12 }
 0x625   : > { %v2306_v3 = vadd.f32 %v2290_v48, %v2259_v54 }
 0x627   : > { %v2326_v13 = vadd.f32 %v4204_v33, %v2306_v3  ;;  %v1983_v16 = vpop.f32.mrf.mxu2 }
 0x628   : > { %v2032_v8 = vpop.f32.mrf.mxu3 }
 0x629   : > { %2342 = vst.msk [vmem:[%s3066_s10 + $0x70] sm:$0xff] %vm1473_vm11, %v2326_v13  ;;  %v2033_v51 = vadd.f32 %v2032_v8, %v1983_v16 }
 0x62b   : > { %v2274_v23 = vmul.f32 %v2273_v24, %v2033_v51 }
 0x62d   : > { %v2307_v28 = vadd.f32 %v2291_v41, %v2274_v23 }
 0x62f   : > { %v2327_v19 = vadd.f32 %v4204_v33, %v2307_v28 }
 0x631   : > { %2343 = vst.msk [vmem:[%s3066_s10 + $0x78] sm:$0xff] %vm1473_vm11, %v2327_v19 }
 0x632 PF: > { %s15_s22 = sadd.s32 1, %s2993_s22   ;;  %s4568_s18 = smov %s2985_s20 }
 0x633   : > { %p12_p8 = scmp.ge.s32.totalorder %s15_s22, 6   ;;  %s4569_s19 = smov %s2989_s21 }
 0x634   : > { %s4570_s20 = smov %s4573_s23  ;;  %s4571_s21 = smov %s4577_s24 }
 0x635   :  { %14 = sbr.rel (!%p12_p8) target bundleno = 3 (0x3), region = 76 }

</bundles_post_ra>
